<compile_context>
chip_gen: v6e
topology: v6e:2x2x1
jax: 0.10.0
libtpu: 0.0.40
codegen_flags: <defaults>
</compile_context>

<pallas_src>
import functools

import jax
import jax.numpy as jnp
from jax import lax
from jax.experimental import pallas as pl
from jax.experimental.pallas import tpu as pltpu


# --------------------------------------------------------------------------
# Tiling / VMEM-budget helpers
# --------------------------------------------------------------------------
@functools.lru_cache(maxsize=None)
def _vmem_limit_bytes():
    cap = None
    try:
        cap = int(pltpu.get_tpu_info().vmem_capacity_bytes)
    except Exception:
        cap = None
    if not cap:
        cap = 64 * 1024 * 1024  # conservative default (v7x: 64 MiB / TC)
    # ~75% of physical: 48 MiB on v7x, 96 MiB on 128-MiB v5e/v6e parts.
    return max(48 * 1024 * 1024, min((cap * 3) // 4, 112 * 1024 * 1024))


def _round_up(x, m):
    return ((x + m - 1) // m) * m


def _largest_divisor(n, cap, multiple=1):
    for d in range(min(cap, n), 0, -1):
        if n % d == 0 and d % multiple == 0:
            return d
    return None


def _pick_seq_tile(s, cap):
    # Second-minor block dim must be a multiple of 8 (or the full dim).
    d = _largest_divisor(s, cap, multiple=8)
    return d if d is not None else s


def _pick_batch_tile(b_pad):
    # Prefer >=2 tiles (so the "parallel" axis can split across TensorCores),
    # each as wide as possible (<=128) so the per-timestep recurrent matmul
    # actually fills MXU rows.
    for tb in (128, 64, 32, 16, 8):
        if b_pad % tb == 0 and b_pad // tb >= 2:
            return tb
    return b_pad


def _pick_seq_chunk(s, tb, g4, budget_bytes=24 * 1024 * 1024):
    # bf16 gate chunks: 2 directions x 2 pipeline buffers per direction.
    per_step = 2 * 2 * tb * g4 * 2
    cap = max(1, min(64, budget_bytes // per_step))
    d = _largest_divisor(s, cap)
    return d if d is not None else 1


def _resident_spec(shape, single_buffer):
    """BlockSpec for a weight/bias that is identical for every grid step."""
    zeros = (0,) * len(shape)
    index_map = lambda *_: zeros
    if single_buffer:
        # Constant-index operands are still double-buffered by default;
        # single-buffer them to free VMEM (perf-review item, esp. for v7x).
        return pl.BlockSpec(shape, index_map, pipeline_mode=pl.Buffered(1))
    return pl.BlockSpec(shape, index_map)


# --------------------------------------------------------------------------
# Pass 1: fused input-to-hidden projection (both directions, biases folded)
#   gates[s, b, :] = x[b, s, :] @ [W_ih_f^T | W_ih_b^T] + (b_ih + b_hh)
# --------------------------------------------------------------------------
def input_proj_kernel(x_ref, w_ref, b_ref, gf_ref, gb_ref):
    # x_ref: [tb, ts, H] f32 block of the original [B, S, H] encoder output.
    # w_ref: [H, 8H] bf16 (fwd|bwd, gate order i,f,g,o), b_ref: [1, 8H] f32.
    # gf_ref/gb_ref: [ts, tb, 4H] bf16 pre-gates, already in seq-major layout.
    ts, tb, g4 = gf_ref.shape
    h = x_ref.shape[-1]

    x = x_ref[...]                                              # [tb, ts, H]
    # Fold the b-major -> t-major relayout into the kernel with static
    # sublane slices on the small input tile (overlaps with the MXU matmul).
    rows = jnp.concatenate([x[:, j, :] for j in range(ts)], axis=0)
    rows = rows.astype(jnp.bfloat16)                            # [ts*tb, H]

    g = jnp.dot(rows, w_ref[...], preferred_element_type=jnp.float32)
    g = g + b_ref[...]                                          # biases folded once
    g = g.reshape(ts, tb, 2 * g4)
    gf_ref[...] = g[..., :g4].astype(gf_ref.dtype)              # forward dir
    gb_ref[...] = g[..., g4:].astype(gb_ref.dtype)              # backward dir


def input_projection(x, w_in, b_in, *, ts, tb, single_buffer):
    """x: [B_pad, S, H] f32.  Returns (gf, gb): [S, B_pad, 4H] bf16 each."""
    b_pad, s, h = x.shape
    g8 = w_in.shape[1]
    g4 = g8 // 2

    return pl.pallas_call(
        input_proj_kernel,
        out_shape=(jax.ShapeDtypeStruct((s, b_pad, g4), jnp.bfloat16),
                   jax.ShapeDtypeStruct((s, b_pad, g4), jnp.bfloat16)),
        grid=(pl.cdiv(s, ts), b_pad // tb),
        in_specs=[
            pl.BlockSpec((tb, ts, h), lambda si, bi: (bi, si, 0)),
            _resident_spec((h, g8), single_buffer),
            _resident_spec((1, g8), single_buffer),
        ],
        out_specs=(pl.BlockSpec((ts, tb, g4), lambda si, bi: (si, bi, 0)),
                   pl.BlockSpec((ts, tb, g4), lambda si, bi: (si, bi, 0))),
        compiler_params=pltpu.CompilerParams(
            dimension_semantics=("parallel", "parallel"),
            vmem_limit_bytes=_vmem_limit_bytes()),
    )(x, w_in, b_in)


# --------------------------------------------------------------------------
# Pass 2: fused bidirectional recurrence (chunk-streamed gates) + Linear head
# --------------------------------------------------------------------------
def bilstm_head_kernel(gf_ref, gb_ref, whh_f_ref, whh_b_ref, wfc_ref, bfc_ref,
                       out_ref, state_ref):
    # gf_ref: [C, tb, 4H] bf16 forward pre-gates, chunk si (ascending).
    # gb_ref: [C, tb, 4H] bf16 backward pre-gates, chunk n-1-si (descending).
    # whh_*_ref: [H, 4H] bf16.  wfc_ref: [2H, Lp] bf16.  bfc_ref: [1, Lp] f32.
    # state_ref: [4, tb, H] f32 scratch holding (h_f, c_f, h_b, c_b) across
    #            the sequence-chunk ("arbitrary") grid axis.
    si = pl.program_id(1)
    cs, tb, g4 = gf_ref.shape
    h = g4 // 4

    @pl.when(si == 0)
    def _():
        state_ref[...] = jnp.zeros_like(state_ref)

    # Hoist resident recurrent weights out of the timestep loop.
    whh_f = whh_f_ref[...]
    whh_b = whh_b_ref[...]

    def cell(pre, c_prev):
        # PyTorch LSTM gate order: i, f, g, o
        i = jax.nn.sigmoid(pre[:, 0 * h:1 * h])
        f = jax.nn.sigmoid(pre[:, 1 * h:2 * h])
        g = jnp.tanh(pre[:, 2 * h:3 * h])
        o = jax.nn.sigmoid(pre[:, 3 * h:4 * h])
        c_new = f * c_prev + i * g
        return o * jnp.tanh(c_new), c_new

    def body(t, carry):
        h_f, c_f, h_b, c_b = carry
        # Forward step: global timestep si*C + t.
        pre_f = gf_ref[t].astype(jnp.float32) + jnp.dot(
            h_f.astype(jnp.bfloat16), whh_f, preferred_element_type=jnp.float32)
        h_f, c_f = cell(pre_f, c_f)
        # Backward step: global timestep S-1 - (si*C + t) (chunk is reversed).
        pre_b = gb_ref[cs - 1 - t].astype(jnp.float32) + jnp.dot(
            h_b.astype(jnp.bfloat16), whh_b, preferred_element_type=jnp.float32)
        h_b, c_b = cell(pre_b, c_b)
        return h_f, c_f, h_b, c_b

    carry = (state_ref[0], state_ref[1], state_ref[2], state_ref[3])
    unroll = 2 if h <= 256 else 1  # keep vreg pressure bounded at real scale
    h_f, c_f, h_b, c_b = lax.fori_loop(0, cs, body, carry, unroll=unroll)
    state_ref[0] = h_f
    state_ref[1] = c_f
    state_ref[2] = h_b
    state_ref[3] = c_b

    @pl.when(si == pl.num_programs(1) - 1)
    def _():
        # logits = cat(h_fwd_last, h_bwd_last) @ fc_w^T + fc_b (lane-dense Lp).
        logits = (
            jnp.dot(h_f.astype(jnp.bfloat16), wfc_ref[0:h, :],
                    preferred_element_type=jnp.float32)
            + jnp.dot(h_b.astype(jnp.bfloat16), wfc_ref[h:2 * h, :],
                      preferred_element_type=jnp.float32)
            + bfc_ref[...])
        out_ref[...] = logits.astype(out_ref.dtype)


def bilstm_head(gf, gb, whh_f_t, whh_b_t, wfc, bfc, *, tb, chunk,
                single_buffer):
    s, b_pad, g4 = gf.shape
    h = g4 // 4
    lp = wfc.shape[1]
    n_chunks = s // chunk

    return pl.pallas_call(
        bilstm_head_kernel,
        out_shape=jax.ShapeDtypeStruct((b_pad, lp), jnp.float32),
        grid=(b_pad // tb, n_chunks),
        in_specs=[
            # Forward gates: ascending sequence chunks.
            pl.BlockSpec((chunk, tb, g4), lambda bi, si: (si, bi, 0)),
            # Backward gates: descending chunks from the tail.
            pl.BlockSpec((chunk, tb, g4),
                         lambda bi, si: (n_chunks - 1 - si, bi, 0)),
            _resident_spec((h, g4), single_buffer),
            _resident_spec((h, g4), single_buffer),
            _resident_spec((2 * h, lp), single_buffer),
            _resident_spec((1, lp), single_buffer),
        ],
        out_specs=pl.BlockSpec((tb, lp), lambda bi, si: (bi, 0)),
        scratch_shapes=[pltpu.VMEM((4, tb, h), jnp.float32)],
        compiler_params=pltpu.CompilerParams(
            dimension_semantics=("parallel", "arbitrary"),
            vmem_limit_bytes=_vmem_limit_bytes()),
    )(gf, gb, whh_f_t, whh_b_t, wfc, bfc)


# --------------------------------------------------------------------------
# Module head wrapper (BiLSTM + Linear on the encoder output)
# --------------------------------------------------------------------------
def _prep_weights(params, hidden_dim, num_labels):
    h = hidden_dim
    lp = _round_up(max(num_labels, 1), 128)  # lane-dense padded label dim
    w_in = jnp.concatenate([params["wih_f"].T, params["wih_b"].T],
                           axis=1).astype(jnp.bfloat16)               # [H, 8H]
    b_in = jnp.concatenate([params["bih_f"] + params["bhh_f"],
                            params["bih_b"] + params["bhh_b"]]
                           ).reshape(1, 8 * h).astype(jnp.float32)     # [1, 8H]
    whh_f_t = params["whh_f"].T.astype(jnp.bfloat16)                   # [H, 4H]
    whh_b_t = params["whh_b"].T.astype(jnp.bfloat16)
    wfc = jnp.zeros((2 * h, lp), jnp.float32).at[:, :num_labels].set(
        params["fc_w"].T).astype(jnp.bfloat16)
    bfc = jnp.zeros((1, lp), jnp.float32).at[0, :num_labels].set(params["fc_b"])
    return w_in, b_in, whh_f_t, whh_b_t, wfc, bfc


def _head_impl(last_hidden_state, params, *, single_buffer):
    bsz, seq, hid = last_hidden_state.shape
    num_labels = params["fc_b"].shape[0]
    w_in, b_in, whh_f_t, whh_b_t, wfc, bfc = _prep_weights(
        params, hid, num_labels)

    # Pad batch to a sublane multiple once (padded rows produce garbage logits
    # that are sliced away; avoids masked partial stores in both passes).
    b_pad = _round_up(bsz, 8)
    x = last_hidden_state.astype(jnp.float32)
    if b_pad != bsz:
        x = jnp.pad(x, ((0, b_pad - bsz), (0, 0), (0, 0)))

    # ---- pass 1 tiling: large pipelined row tiles ----
    tb1 = _largest_divisor(b_pad, 128, multiple=8) or b_pad
    target_rows = 512 if _vmem_limit_bytes() >= 96 * 1024 * 1024 else 256
    ts = _pick_seq_tile(seq, max(8, target_rows // tb1))

    gf, gb = input_projection(x, w_in, b_in, ts=ts, tb=tb1,
                              single_buffer=single_buffer)

    # ---- pass 2 tiling: wide batch tiles + streamed sequence chunks ----
    tb2 = _pick_batch_tile(b_pad)
    chunk = _pick_seq_chunk(seq, tb2, 4 * hid)
    logits = bilstm_head(gf, gb, whh_f_t, whh_b_t, wfc, bfc,
                         tb=tb2, chunk=chunk, single_buffer=single_buffer)
    return logits[:bsz, :num_labels]


def roberta_bilstm_head(last_hidden_state, params):
    """last_hidden_state: [B, S, H] float32 (stand-in for encoder output)."""
    try:
        return _head_impl(last_hidden_state, params, single_buffer=True)
    except Exception:
        # TODO(synk): pl.Buffered(1) (single-buffered resident weights) not
        # accepted by this jax build; fall back to default double-buffering
        # (identical semantics, slightly higher VMEM use).
        return _head_impl(last_hidden_state, params, single_buffer=False)


def forward(input_ids, attention_mask, params, labels=None):
    """Mirrors RobertaBiLSTM.forward (encoder replaced by embedding stand-in)."""
    del attention_mask  # LSTM head does not pack sequences, as in the spec
    hidden = params["embedding"][input_ids]                       # [B, S, H]
    logits = roberta_bilstm_head(hidden.astype(jnp.float32), params)
    if labels is not None:
        logp = jax.nn.log_softmax(logits, axis=-1)
        loss = -jnp.mean(jnp.take_along_axis(logp, labels[:, None], axis=1))
        return {"loss": loss, "logits": logits}
    return {"logits": logits}


# --------------------------------------------------------------------------
# Pure-JAX reference (f32) of the BiLSTM + FC head, for a sanity check
# --------------------------------------------------------------------------
def _bilstm_head_ref(x, params):
    b, s, h = x.shape

    def cell(pre, c):
        i = jax.nn.sigmoid(pre[:, :h])
        f = jax.nn.sigmoid(pre[:, h:2 * h])
        g = jnp.tanh(pre[:, 2 * h:3 * h])
        o = jax.nn.sigmoid(pre[:, 3 * h:])
        c = f * c + i * g
        return o * jnp.tanh(c), c

    def run(order, wih, whh, bih, bhh):
        hh = jnp.zeros((b, h), jnp.float32)
        cc = jnp.zeros((b, h), jnp.float32)
        for t in order:
            pre = x[:, t, :] @ wih.T + bih + hh @ whh.T + bhh
            hh, cc = cell(pre, cc)
        return hh

    h_f = run(range(s), params["wih_f"], params["whh_f"],
              params["bih_f"], params["bhh_f"])
    h_b = run(range(s - 1, -1, -1), params["wih_b"], params["whh_b"],
              params["bih_b"], params["bhh_b"])
    return jnp.concatenate([h_f, h_b], axis=1) @ params["fc_w"].T + params["fc_b"]


# --------------------------------------------------------------------------
# Deterministic parameter init (shapes follow the PyTorch module)
# --------------------------------------------------------------------------
def init_params(key, hidden_dim, num_labels, vocab_size):
    ks = jax.random.split(key, 12)
    h = hidden_dim
    bound = 1.0 / jnp.sqrt(h)
    u = lambda k, shape: jax.random.uniform(k, shape, jnp.float32, -bound, bound)
    return {
        "embedding": jax.random.normal(ks[0], (vocab_size, h), jnp.float32) * 0.5,
        # nn.LSTM(input=H, hidden=H, num_layers=1, bidirectional=True)
        "wih_f": u(ks[1], (4 * h, h)),
        "whh_f": u(ks[2], (4 * h, h)),
        "bih_f": u(ks[3], (4 * h,)),
        "bhh_f": u(ks[4], (4 * h,)),
        "wih_b": u(ks[5], (4 * h, h)),
        "whh_b": u(ks[6], (4 * h, h)),
        "bih_b": u(ks[7], (4 * h,)),
        "bhh_b": u(ks[8], (4 * h,)),
        # nn.Linear(2H, num_labels)
        "fc_w": u(ks[9], (num_labels, 2 * h)),
        "fc_b": u(ks[10], (num_labels,)),
    }


if __name__ == "__main__":
    # Small but lane/sublane-aligned demo shapes (H mult of 128, B mult of 8).
    B, S, H = 16, 16, 128
    NUM_LABELS, VOCAB = 30, 100

    key = jax.random.PRNGKey(0)
    k_par, k_ids, k_lbl = jax.random.split(key, 3)

    params = init_params(k_par, H, NUM_LABELS, VOCAB)
    input_ids = jax.random.randint(k_ids, (B, S), 0, VOCAB, dtype=jnp.int32)
    attention_mask = jnp.ones((B, S), dtype=jnp.int32)
    labels = jax.random.randint(k_lbl, (B,), 0, NUM_LABELS, dtype=jnp.int32)

    out = forward(input_ids, attention_mask, params, labels=labels)
    jax.block_until_ready(out["logits"])
    jax.block_until_ready(out["loss"])

    assert out["logits"].shape == (B, NUM_LABELS)
    assert jnp.isfinite(out["loss"])

    # Loose-tolerance check against the pure-f32 reference (kernel runs the
    # matmuls / gate storage in bf16, so exact match is not expected).
    ref_logits = _bilstm_head_ref(
        params["embedding"][input_ids].astype(jnp.float32), params)
    max_err = float(jnp.max(jnp.abs(out["logits"] - ref_logits)))
    assert max_err < 3e-2, f"max |kernel - ref| = {max_err}"

    print("KERNEL_OK")
</pallas_src>

<mosaic_0001>
module attributes {stable_mosaic.version = 11 : i64} {
  func.func @input_proj_kernel(%arg0: i32, %arg1: i32, %arg2: memref<16x16x128xf32, #tpu.memory_space<vmem>>, %arg3: memref<128x1024xbf16, #tpu.memory_space<vmem>>, %arg4: memref<1x1024xf32, #tpu.memory_space<vmem>>, %arg5: memref<16x16x512xbf16, #tpu.memory_space<vmem>>, %arg6: memref<16x16x512xbf16, #tpu.memory_space<vmem>>) attributes {dimension_semantics = [#tpu.dimension_semantics<parallel>, #tpu.dimension_semantics<parallel>], iteration_bounds = array<i64: 1, 1>, scalar_prefetch = 0 : i64, scratch_operands = 0 : i64, tpu.core_type = #tpu.core_type<tc>, window_params = [{transform_indices = @transform_0, window_bounds = array<i64: 16, 16, 128>}, {pipeline_mode = #tpu.pipeline_mode<synchronous>, transform_indices = @transform_1, window_bounds = array<i64: 128, 1024>}, {pipeline_mode = #tpu.pipeline_mode<synchronous>, transform_indices = @transform_2, window_bounds = array<i64: 1, 1024>}, {transform_indices = @transform_3, window_bounds = array<i64: 16, 16, 512>}, {transform_indices = @transform_4, window_bounds = array<i64: 16, 16, 512>}]} {
    %c0 = arith.constant 0 : index
    %c0_0 = arith.constant 0 : index
    %c0_1 = arith.constant 0 : index
    %0 = vector.load %arg2[%c0, %c0_0, %c0_1] : memref<16x16x128xf32, #tpu.memory_space<vmem>>, vector<16x16x128xf32>
    %1 = vector.extract_strided_slice %0 {offsets = [0, 0, 0], sizes = [16, 1, 128], strides = [1, 1, 1]} : vector<16x16x128xf32> to vector<16x1x128xf32>
    %2 = vector.shape_cast %1 : vector<16x1x128xf32> to vector<16x128xf32>
    %3 = vector.extract_strided_slice %0 {offsets = [0, 1, 0], sizes = [16, 1, 128], strides = [1, 1, 1]} : vector<16x16x128xf32> to vector<16x1x128xf32>
    %4 = vector.shape_cast %3 : vector<16x1x128xf32> to vector<16x128xf32>
    %5 = vector.extract_strided_slice %0 {offsets = [0, 2, 0], sizes = [16, 1, 128], strides = [1, 1, 1]} : vector<16x16x128xf32> to vector<16x1x128xf32>
    %6 = vector.shape_cast %5 : vector<16x1x128xf32> to vector<16x128xf32>
    %7 = vector.extract_strided_slice %0 {offsets = [0, 3, 0], sizes = [16, 1, 128], strides = [1, 1, 1]} : vector<16x16x128xf32> to vector<16x1x128xf32>
    %8 = vector.shape_cast %7 : vector<16x1x128xf32> to vector<16x128xf32>
    %9 = vector.extract_strided_slice %0 {offsets = [0, 4, 0], sizes = [16, 1, 128], strides = [1, 1, 1]} : vector<16x16x128xf32> to vector<16x1x128xf32>
    %10 = vector.shape_cast %9 : vector<16x1x128xf32> to vector<16x128xf32>
    %11 = vector.extract_strided_slice %0 {offsets = [0, 5, 0], sizes = [16, 1, 128], strides = [1, 1, 1]} : vector<16x16x128xf32> to vector<16x1x128xf32>
    %12 = vector.shape_cast %11 : vector<16x1x128xf32> to vector<16x128xf32>
    %13 = vector.extract_strided_slice %0 {offsets = [0, 6, 0], sizes = [16, 1, 128], strides = [1, 1, 1]} : vector<16x16x128xf32> to vector<16x1x128xf32>
    %14 = vector.shape_cast %13 : vector<16x1x128xf32> to vector<16x128xf32>
    %15 = vector.extract_strided_slice %0 {offsets = [0, 7, 0], sizes = [16, 1, 128], strides = [1, 1, 1]} : vector<16x16x128xf32> to vector<16x1x128xf32>
    %16 = vector.shape_cast %15 : vector<16x1x128xf32> to vector<16x128xf32>
    %17 = vector.extract_strided_slice %0 {offsets = [0, 8, 0], sizes = [16, 1, 128], strides = [1, 1, 1]} : vector<16x16x128xf32> to vector<16x1x128xf32>
    %18 = vector.shape_cast %17 : vector<16x1x128xf32> to vector<16x128xf32>
    %19 = vector.extract_strided_slice %0 {offsets = [0, 9, 0], sizes = [16, 1, 128], strides = [1, 1, 1]} : vector<16x16x128xf32> to vector<16x1x128xf32>
    %20 = vector.shape_cast %19 : vector<16x1x128xf32> to vector<16x128xf32>
    %21 = vector.extract_strided_slice %0 {offsets = [0, 10, 0], sizes = [16, 1, 128], strides = [1, 1, 1]} : vector<16x16x128xf32> to vector<16x1x128xf32>
    %22 = vector.shape_cast %21 : vector<16x1x128xf32> to vector<16x128xf32>
    %23 = vector.extract_strided_slice %0 {offsets = [0, 11, 0], sizes = [16, 1, 128], strides = [1, 1, 1]} : vector<16x16x128xf32> to vector<16x1x128xf32>
    %24 = vector.shape_cast %23 : vector<16x1x128xf32> to vector<16x128xf32>
    %25 = vector.extract_strided_slice %0 {offsets = [0, 12, 0], sizes = [16, 1, 128], strides = [1, 1, 1]} : vector<16x16x128xf32> to vector<16x1x128xf32>
    %26 = vector.shape_cast %25 : vector<16x1x128xf32> to vector<16x128xf32>
    %27 = vector.extract_strided_slice %0 {offsets = [0, 13, 0], sizes = [16, 1, 128], strides = [1, 1, 1]} : vector<16x16x128xf32> to vector<16x1x128xf32>
    %28 = vector.shape_cast %27 : vector<16x1x128xf32> to vector<16x128xf32>
    %29 = vector.extract_strided_slice %0 {offsets = [0, 14, 0], sizes = [16, 1, 128], strides = [1, 1, 1]} : vector<16x16x128xf32> to vector<16x1x128xf32>
    %30 = vector.shape_cast %29 : vector<16x1x128xf32> to vector<16x128xf32>
    %31 = vector.extract_strided_slice %0 {offsets = [0, 15, 0], sizes = [16, 1, 128], strides = [1, 1, 1]} : vector<16x16x128xf32> to vector<16x1x128xf32>
    %32 = vector.shape_cast %31 : vector<16x1x128xf32> to vector<16x128xf32>
    %33 = tpu.concatenate %2, %4, %6, %8, %10, %12, %14, %16, %18, %20, %22, %24, %26, %28, %30, %32 in 0 : vector<16x128xf32>, vector<16x128xf32>, vector<16x128xf32>, vector<16x128xf32>, vector<16x128xf32>, vector<16x128xf32>, vector<16x128xf32>, vector<16x128xf32>, vector<16x128xf32>, vector<16x128xf32>, vector<16x128xf32>, vector<16x128xf32>, vector<16x128xf32>, vector<16x128xf32>, vector<16x128xf32>, vector<16x128xf32> -> vector<256x128xf32>
    %34 = arith.truncf %33 : vector<256x128xf32> to vector<256x128xbf16>
    %c0_2 = arith.constant 0 : index
    %c0_3 = arith.constant 0 : index
    %35 = vector.load %arg3[%c0_2, %c0_3] : memref<128x1024xbf16, #tpu.memory_space<vmem>>, vector<128x1024xbf16>
    %cst = arith.constant dense<0.000000e+00> : vector<256x1024xf32>
    %36 = tpu.matmul %34, %35, %cst {dimension_numbers = #tpu.dot_dimension_numbers<[1], [0], [0], [1], [0, 0, 1, 1], [], []>} : vector<256x128xbf16>, vector<128x1024xbf16>, vector<256x1024xf32> -> vector<256x1024xf32>
    %c0_4 = arith.constant 0 : index
    %c0_5 = arith.constant 0 : index
    %37 = vector.load %arg4[%c0_4, %c0_5] : memref<1x1024xf32, #tpu.memory_space<vmem>>, vector<1x1024xf32>
    %38 = vector.broadcast %37 : vector<1x1024xf32> to vector<256x1024xf32>
    %39 = arith.addf %36, %38 : vector<256x1024xf32>
    %40 = vector.shape_cast %39 : vector<256x1024xf32> to vector<16x16x1024xf32>
    %41 = vector.extract_strided_slice %40 {offsets = [0, 0, 0], sizes = [16, 16, 512], strides = [1, 1, 1]} : vector<16x16x1024xf32> to vector<16x16x512xf32>
    %42 = arith.truncf %41 : vector<16x16x512xf32> to vector<16x16x512xbf16>
    %c0_6 = arith.constant 0 : index
    %c0_7 = arith.constant 0 : index
    %c0_8 = arith.constant 0 : index
    %43 = vector.load %arg5[%c0_6, %c0_7, %c0_8] : memref<16x16x512xbf16, #tpu.memory_space<vmem>>, vector<16x16x512xbf16>
    tpu.vector_store %arg5[%c0_6, %c0_7, %c0_8], %42 {strides = array<i32>} : memref<16x16x512xbf16, #tpu.memory_space<vmem>>, vector<16x16x512xbf16>,
    %44 = vector.extract_strided_slice %40 {offsets = [0, 0, 512], sizes = [16, 16, 512], strides = [1, 1, 1]} : vector<16x16x1024xf32> to vector<16x16x512xf32>
    %45 = arith.truncf %44 : vector<16x16x512xf32> to vector<16x16x512xbf16>
    %c0_9 = arith.constant 0 : index
    %c0_10 = arith.constant 0 : index
    %c0_11 = arith.constant 0 : index
    %46 = vector.load %arg6[%c0_9, %c0_10, %c0_11] : memref<16x16x512xbf16, #tpu.memory_space<vmem>>, vector<16x16x512xbf16>
    tpu.vector_store %arg6[%c0_9, %c0_10, %c0_11], %45 {strides = array<i32>} : memref<16x16x512xbf16, #tpu.memory_space<vmem>>, vector<16x16x512xbf16>,
    return
  }
  func.func @transform_0(%arg0: i32, %arg1: i32) -> (i32, i32, i32) {
    %c0_i32 = arith.constant 0 : i32
    %c0_i32_0 = arith.constant 0 : i32
    return %arg1, %arg0, %c0_i32 : i32, i32, i32
  }
  func.func @transform_1(%arg0: i32, %arg1: i32) -> (i32, i32) {
    %c0_i32 = arith.constant 0 : i32
    %c0_i32_0 = arith.constant 0 : i32
    %c0_i32_1 = arith.constant 0 : i32
    return %c0_i32, %c0_i32_0 : i32, i32
  }
  func.func @transform_2(%arg0: i32, %arg1: i32) -> (i32, i32) {
    %c0_i32 = arith.constant 0 : i32
    %c0_i32_0 = arith.constant 0 : i32
    %c0_i32_1 = arith.constant 0 : i32
    return %c0_i32, %c0_i32_0 : i32, i32
  }
  func.func @transform_3(%arg0: i32, %arg1: i32) -> (i32, i32, i32) {
    %c0_i32 = arith.constant 0 : i32
    %c0_i32_0 = arith.constant 0 : i32
    return %arg0, %arg1, %c0_i32 : i32, i32, i32
  }
  func.func @transform_4(%arg0: i32, %arg1: i32) -> (i32, i32, i32) {
    %c0_i32 = arith.constant 0 : i32
    %c0_i32_0 = arith.constant 0 : i32
    return %arg0, %arg1, %c0_i32 : i32, i32, i32
  }
}

module attributes {stable_mosaic.version = 11 : i64} {
  func.func @input_proj_kernel(%arg0: i32, %arg1: i32, %arg2: memref<16x16x128xf32, #tpu.memory_space<vmem>>, %arg3: memref<128x1024xbf16, #tpu.memory_space<vmem>>, %arg4: memref<1x1024xf32, #tpu.memory_space<vmem>>, %arg5: memref<16x16x512xbf16, #tpu.memory_space<vmem>>, %arg6: memref<16x16x512xbf16, #tpu.memory_space<vmem>>) attributes {dimension_semantics = [#tpu.dimension_semantics<parallel>, #tpu.dimension_semantics<parallel>], iteration_bounds = array<i64: 1, 1>, scalar_prefetch = 0 : i64, scratch_operands = 0 : i64, tpu.core_type = #tpu.core_type<tc>, window_params = [{transform_indices = @transform_0, window_bounds = array<i64: 16, 16, 128>}, {pipeline_mode = #tpu.pipeline_mode<synchronous>, transform_indices = @transform_1, window_bounds = array<i64: 128, 1024>}, {pipeline_mode = #tpu.pipeline_mode<synchronous>, transform_indices = @transform_2, window_bounds = array<i64: 1, 1024>}, {transform_indices = @transform_3, window_bounds = array<i64: 16, 16, 512>}, {transform_indices = @transform_4, window_bounds = array<i64: 16, 16, 512>}]} {
    %c0 = arith.constant 0 : index
    %c0_0 = arith.constant 0 : index
    %c0_1 = arith.constant 0 : index
    %0 = vector.load %arg2[%c0, %c0_0, %c0_1] : memref<16x16x128xf32, #tpu.memory_space<vmem>>, vector<16x16x128xf32>
    %1 = vector.extract_strided_slice %0 {offsets = [0, 0, 0], sizes = [16, 1, 128], strides = [1, 1, 1]} : vector<16x16x128xf32> to vector<16x1x128xf32>
    %2 = vector.shape_cast %1 : vector<16x1x128xf32> to vector<16x128xf32>
    %3 = vector.extract_strided_slice %0 {offsets = [0, 1, 0], sizes = [16, 1, 128], strides = [1, 1, 1]} : vector<16x16x128xf32> to vector<16x1x128xf32>
    %4 = vector.shape_cast %3 : vector<16x1x128xf32> to vector<16x128xf32>
    %5 = vector.extract_strided_slice %0 {offsets = [0, 2, 0], sizes = [16, 1, 128], strides = [1, 1, 1]} : vector<16x16x128xf32> to vector<16x1x128xf32>
    %6 = vector.shape_cast %5 : vector<16x1x128xf32> to vector<16x128xf32>
    %7 = vector.extract_strided_slice %0 {offsets = [0, 3, 0], sizes = [16, 1, 128], strides = [1, 1, 1]} : vector<16x16x128xf32> to vector<16x1x128xf32>
    %8 = vector.shape_cast %7 : vector<16x1x128xf32> to vector<16x128xf32>
    %9 = vector.extract_strided_slice %0 {offsets = [0, 4, 0], sizes = [16, 1, 128], strides = [1, 1, 1]} : vector<16x16x128xf32> to vector<16x1x128xf32>
    %10 = vector.shape_cast %9 : vector<16x1x128xf32> to vector<16x128xf32>
    %11 = vector.extract_strided_slice %0 {offsets = [0, 5, 0], sizes = [16, 1, 128], strides = [1, 1, 1]} : vector<16x16x128xf32> to vector<16x1x128xf32>
    %12 = vector.shape_cast %11 : vector<16x1x128xf32> to vector<16x128xf32>
    %13 = vector.extract_strided_slice %0 {offsets = [0, 6, 0], sizes = [16, 1, 128], strides = [1, 1, 1]} : vector<16x16x128xf32> to vector<16x1x128xf32>
    %14 = vector.shape_cast %13 : vector<16x1x128xf32> to vector<16x128xf32>
    %15 = vector.extract_strided_slice %0 {offsets = [0, 7, 0], sizes = [16, 1, 128], strides = [1, 1, 1]} : vector<16x16x128xf32> to vector<16x1x128xf32>
    %16 = vector.shape_cast %15 : vector<16x1x128xf32> to vector<16x128xf32>
    %17 = vector.extract_strided_slice %0 {offsets = [0, 8, 0], sizes = [16, 1, 128], strides = [1, 1, 1]} : vector<16x16x128xf32> to vector<16x1x128xf32>
    %18 = vector.shape_cast %17 : vector<16x1x128xf32> to vector<16x128xf32>
    %19 = vector.extract_strided_slice %0 {offsets = [0, 9, 0], sizes = [16, 1, 128], strides = [1, 1, 1]} : vector<16x16x128xf32> to vector<16x1x128xf32>
    %20 = vector.shape_cast %19 : vector<16x1x128xf32> to vector<16x128xf32>
    %21 = vector.extract_strided_slice %0 {offsets = [0, 10, 0], sizes = [16, 1, 128], strides = [1, 1, 1]} : vector<16x16x128xf32> to vector<16x1x128xf32>
    %22 = vector.shape_cast %21 : vector<16x1x128xf32> to vector<16x128xf32>
    %23 = vector.extract_strided_slice %0 {offsets = [0, 11, 0], sizes = [16, 1, 128], strides = [1, 1, 1]} : vector<16x16x128xf32> to vector<16x1x128xf32>
    %24 = vector.shape_cast %23 : vector<16x1x128xf32> to vector<16x128xf32>
    %25 = vector.extract_strided_slice %0 {offsets = [0, 12, 0], sizes = [16, 1, 128], strides = [1, 1, 1]} : vector<16x16x128xf32> to vector<16x1x128xf32>
    %26 = vector.shape_cast %25 : vector<16x1x128xf32> to vector<16x128xf32>
    %27 = vector.extract_strided_slice %0 {offsets = [0, 13, 0], sizes = [16, 1, 128], strides = [1, 1, 1]} : vector<16x16x128xf32> to vector<16x1x128xf32>
    %28 = vector.shape_cast %27 : vector<16x1x128xf32> to vector<16x128xf32>
    %29 = vector.extract_strided_slice %0 {offsets = [0, 14, 0], sizes = [16, 1, 128], strides = [1, 1, 1]} : vector<16x16x128xf32> to vector<16x1x128xf32>
    %30 = vector.shape_cast %29 : vector<16x1x128xf32> to vector<16x128xf32>
    %31 = vector.extract_strided_slice %0 {offsets = [0, 15, 0], sizes = [16, 1, 128], strides = [1, 1, 1]} : vector<16x16x128xf32> to vector<16x1x128xf32>
    %32 = vector.shape_cast %31 : vector<16x1x128xf32> to vector<16x128xf32>
    %33 = tpu.concatenate %2, %4, %6, %8, %10, %12, %14, %16, %18, %20, %22, %24, %26, %28, %30, %32 in 0 : vector<16x128xf32>, vector<16x128xf32>, vector<16x128xf32>, vector<16x128xf32>, vector<16x128xf32>, vector<16x128xf32>, vector<16x128xf32>, vector<16x128xf32>, vector<16x128xf32>, vector<16x128xf32>, vector<16x128xf32>, vector<16x128xf32>, vector<16x128xf32>, vector<16x128xf32>, vector<16x128xf32>, vector<16x128xf32> -> vector<256x128xf32>
    %34 = arith.truncf %33 : vector<256x128xf32> to vector<256x128xbf16>
    %c0_2 = arith.constant 0 : index
    %c0_3 = arith.constant 0 : index
    %35 = vector.load %arg3[%c0_2, %c0_3] : memref<128x1024xbf16, #tpu.memory_space<vmem>>, vector<128x1024xbf16>
    %cst = arith.constant dense<0.000000e+00> : vector<256x1024xf32>
    %36 = tpu.matmul %34, %35, %cst {dimension_numbers = #tpu.dot_dimension_numbers<[1], [0], [0], [1], [0, 0, 1, 1], [], []>} : vector<256x128xbf16>, vector<128x1024xbf16>, vector<256x1024xf32> -> vector<256x1024xf32>
    %c0_4 = arith.constant 0 : index
    %c0_5 = arith.constant 0 : index
    %37 = vector.load %arg4[%c0_4, %c0_5] : memref<1x1024xf32, #tpu.memory_space<vmem>>, vector<1x1024xf32>
    %38 = vector.broadcast %37 : vector<1x1024xf32> to vector<256x1024xf32>
    %39 = arith.addf %36, %38 : vector<256x1024xf32>
    %40 = vector.shape_cast %39 : vector<256x1024xf32> to vector<16x16x1024xf32>
    %41 = vector.extract_strided_slice %40 {offsets = [0, 0, 0], sizes = [16, 16, 512], strides = [1, 1, 1]} : vector<16x16x1024xf32> to vector<16x16x512xf32>
    %42 = arith.truncf %41 : vector<16x16x512xf32> to vector<16x16x512xbf16>
    %c0_6 = arith.constant 0 : index
    %c0_7 = arith.constant 0 : index
    %c0_8 = arith.constant 0 : index
    %43 = vector.load %arg5[%c0_6, %c0_7, %c0_8] : memref<16x16x512xbf16, #tpu.memory_space<vmem>>, vector<16x16x512xbf16>
    tpu.vector_store %arg5[%c0_6, %c0_7, %c0_8], %42 {strides = array<i32>} : memref<16x16x512xbf16, #tpu.memory_space<vmem>>, vector<16x16x512xbf16>,
    %44 = vector.extract_strided_slice %40 {offsets = [0, 0, 512], sizes = [16, 16, 512], strides = [1, 1, 1]} : vector<16x16x1024xf32> to vector<16x16x512xf32>
    %45 = arith.truncf %44 : vector<16x16x512xf32> to vector<16x16x512xbf16>
    %c0_9 = arith.constant 0 : index
    %c0_10 = arith.constant 0 : index
    %c0_11 = arith.constant 0 : index
    %46 = vector.load %arg6[%c0_9, %c0_10, %c0_11] : memref<16x16x512xbf16, #tpu.memory_space<vmem>>, vector<16x16x512xbf16>
    tpu.vector_store %arg6[%c0_9, %c0_10, %c0_11], %45 {strides = array<i32>} : memref<16x16x512xbf16, #tpu.memory_space<vmem>>, vector<16x16x512xbf16>,
    return
  }
  func.func @transform_0(%arg0: i32, %arg1: i32) -> (i32, i32, i32) {
    %c0_i32 = arith.constant 0 : i32
    %c0_i32_0 = arith.constant 0 : i32
    return %arg1, %arg0, %c0_i32 : i32, i32, i32
  }
  func.func @transform_1(%arg0: i32, %arg1: i32) -> (i32, i32) {
    %c0_i32 = arith.constant 0 : i32
    %c0_i32_0 = arith.constant 0 : i32
    %c0_i32_1 = arith.constant 0 : i32
    return %c0_i32, %c0_i32_0 : i32, i32
  }
  func.func @transform_2(%arg0: i32, %arg1: i32) -> (i32, i32) {
    %c0_i32 = arith.constant 0 : i32
    %c0_i32_0 = arith.constant 0 : i32
    %c0_i32_1 = arith.constant 0 : i32
    return %c0_i32, %c0_i32_0 : i32, i32
  }
  func.func @transform_3(%arg0: i32, %arg1: i32) -> (i32, i32, i32) {
    %c0_i32 = arith.constant 0 : i32
    %c0_i32_0 = arith.constant 0 : i32
    return %arg0, %arg1, %c0_i32 : i32, i32, i32
  }
  func.func @transform_4(%arg0: i32, %arg1: i32) -> (i32, i32, i32) {
    %c0_i32 = arith.constant 0 : i32
    %c0_i32_0 = arith.constant 0 : i32
    return %arg0, %arg1, %c0_i32 : i32, i32, i32
  }
}

</mosaic_0001>

<bundles_post_ra>
// kernel: tpu_custom_call.1
= control target key start
LH: loop header
LB: loop body
LE: loop exit
PB: predicated region body
PF: predicated region fallthrough
CT: control target
= control target key end

     0   :  { %10 = vsyncpa [#allocation3], 0  ;;  %s4422_s0 = inlined_call_operand.hbm [shape: f32[16,16,128], index: 0, kind: input, shape index: {}]   ;;  %s4423_s1 = inlined_call_operand.hbm [shape: bf16[128,1024], index: 1, kind: input, shape index: {}]   ;;  %s4424_s2 = inlined_call_operand.hbm [shape: f32[1,1024], index: 2, kind: input, shape index: {}]   ;;  %s4425_s3 = inlined_call_operand.hbm [shape: bf16[16,16,512], index: 3, kind: output, shape index: {0}]   ;;  %s4426_s4 = inlined_call_operand.hbm [shape: bf16[16,16,512], index: 4, kind: output, shape index: {1}]  }
   0x1   :  { %11 = vsyncpa [#allocation6], 0 }
   0x2   :  { %12 = vsyncpa [#allocation4], 0 }
   0x3   :  { %13 = vsyncpa [#allocation10], 0  ;;  %s3193_s15 = smov [#allocation5]  }
   0x4   :  { %s31_s16 = sshll.u32 %s3193_s15, 4  ;;  %s32_s16 = int_to_ptr.vmem [resolvable:$true] %s31_s16 }
   0x5   :  { %s3093_s17 = scalar_lea.vmem %s32_s16, 8192  ;;  %p3098_p1 = scmp.lt.s32.totalorder %s32_s16, %s32_s16 }
   0x6   :  { %p3094_p0 = scmp.ne.s32.totalorder %s32_s16, %s3093_s17  ;;  %p3099_p2 = scmp.lt.s32.totalorder %s3093_s17, %s3093_s17 }
   0x8   :  { %p3100_p3 = por %p3099_p2, %p3098_p1 }
   0xa   :  { %p3101_p4 = pnand %p3100_p3, %p3094_p0 }
   0xc   :  { %3104 = shalt.err (!%p3101_p4)
}
   0xd   :  { %s3194_s18 = smov 512   ;;  %s3195_s19 = smov 32  }
   0xe   :  { %37 = dma.hbm_to_vmem [thread:$0]  %s4423_s1, 8192, %s32_s16, [#allocation6], %s3194_s18, %s3194_s18, %s3195_s19  }
   0xf   :  { %s3196_s22 = smov [#allocation2]  }
  0x10   :  { %s19_s23 = sshll.u32 %s3196_s22, 4  ;;  %s20_s23 = int_to_ptr.vmem [resolvable:$true] %s19_s23 }
  0x11   :  { %s3113_s24 = scalar_lea.vmem %s20_s23, 4096  ;;  %p3118_p6 = scmp.lt.s32.totalorder %s20_s23, %s20_s23 }
  0x12   :  { %p3114_p5 = scmp.ne.s32.totalorder %s20_s23, %s3113_s24  ;;  %p3119_p7 = scmp.lt.s32.totalorder %s3113_s24, %s3113_s24 }
  0x14   :  { %p3120_p8 = por %p3119_p7, %p3118_p6 }
  0x16   :  { %p3121_p9 = pnand %p3120_p8, %p3114_p5 }
  0x18   :  { %3124 = shalt.err (!%p3121_p9)
}
  0x19   :  { %s3197_s25 = smov 128   ;;  %s3198_s26 = smov 8  }
  0x1a   :  { %25 = dma.hbm_to_vmem [thread:$0]  %s4422_s0, 4096, %s20_s23, [#allocation3], %s3197_s25, %s3197_s25, %s3198_s26  }
  0x1b   :  { %s3199_s29 = smov [#allocation7]  }
  0x1c   :  { %s44_s30 = sshll.u32 %s3199_s29, 4  ;;  %s45_s30 = int_to_ptr.vmem [resolvable:$true] %s44_s30 }
  0x1d   :  { %s3133_s1 = scalar_lea.vmem %s45_s30, 128  ;;  %p3138_p11 = scmp.lt.s32.totalorder %s45_s30, %s45_s30 }
  0x1e   :  { %p3134_p10 = scmp.ne.s32.totalorder %s45_s30, %s3133_s1  ;;  %p3139_p12 = scmp.lt.s32.totalorder %s3133_s1, %s3133_s1 }
  0x20   :  { %p3140_p13 = por %p3139_p12, %p3138_p11 }
  0x22   :  { %p3141_p0 = pnand %p3140_p13, %p3134_p10 }
  0x24   :  { %3144 = shalt.err (!%p3141_p0)
}
  0x25   :  { %47 = dma.hbm_to_vmem [thread:$0]  %s4424_s2, 128, %s45_s30, [#allocation6]  }
  0x26   :  { %3185 = dma.done.wait [#allocation3], 4096  }
  0x27   :  { %3186 = vsyncadd [#allocation3], 4294963200 }
  0x28   :  { %3187 = dma.done.wait [#allocation6], 8320  }
  0x29   :  { %3188 = vsyncadd [#allocation6], 4294958976  ;;  %v4427_v0 = vmov 0   ;;  %v681_v1 = vld [vmem:[#allocation5 + $0x1c0] sm:$0xff]  ;;  %v682_v3 = vld [vmem:[#allocation5 + $0x1c8] sm:$0xff]  ;;  %vm107_vm0 = vcmask 1041409  }
  0x2a   :  { %1083 = vmatprep.mubr.bf16.mxu0 %v4427_v0  ;;  %1276 = vmatprep.mubr.bf16.mxu1 %v4427_v0  ;;  %v685_v2 = vld [vmem:[#allocation5 + $0x1e0] sm:$0xff]  ;;  %v686_v5 = vld [vmem:[#allocation5 + $0x1e8] sm:$0xff]  ;;  %vm110_vm1 = vcmask 1042434   ;;  %vm113_vm2 = vcmask 1043459   ;;  %vm116_vm3 = vcmask 1044484   ;;  %vm119_vm4 = vcmask 1045509  }
  0x2b   :  { %v2810_v4 = vcombine.high %v681_v1, %v685_v2  ;;  %v2809_v6 = vcombine.low %v681_v1, %v685_v2  ;;  %v673_v7 = vld [vmem:[#allocation5 + $0x180] sm:$0xff]  ;;  %v2812_v9 = vcombine.high %v682_v3, %v686_v5  ;;  %v2811_v10 = vcombine.low %v682_v3, %v686_v5  ;;  %v674_v12 = vld [vmem:[#allocation5 + $0x188] sm:$0xff]  ;;  %v3333_v63 = vld [vmem:[#allocation2 + $0x10] sm:$0xff]  ;;  %s3201_s0 = smov [#allocation8]  }
  0x2c   :  { %v677_v8 = vld [vmem:[#allocation5 + $0x1a0] sm:$0xff]  ;;  %v678_v13 = vld [vmem:[#allocation5 + $0x1a8] sm:$0xff]  ;;  %vm122_vm5 = vcmask 1046534   ;;  %v3337_v2 = vld [vmem:[#allocation2 + $0x30] sm:$0xff]  ;;  %vm125_vm6 = vcmask 1047559   ;;  %s2724_s2 = sshll.u32 %s3201_s0, 4  ;;  %s2725_s2 = int_to_ptr.vmem [resolvable:$true] %s2724_s2 }
  0x2d   :  { %v2802_v11 = vcombine.high %v673_v7, %v677_v8  ;;  %v3241_v14 = vld [vmem:[#allocation5 + $0x140] sm:$0xff]  ;;  %1051 = vmatprep.subr.bf16.mxu0 %v2810_v4  ;;  %v2804_v15 = vcombine.high %v674_v12, %v678_v13  ;;  %v3245_v17 = vld [vmem:[#allocation5 + $0x148] sm:$0xff]  ;;  %1244 = vmatprep.subr.bf16.mxu1 %v2812_v9  ;;  %v2801_v19 = vcombine.low %v673_v7, %v677_v8  ;;  %v106_v8 = vrot.slane %v3333_v63, 7  ;;  %v3391_v60 = vld [vmem:[#allocation5 + $0x1d0] sm:$0xff]  ;;  %s3145_s7 = scalar_lea.vmem %s2725_s2, 8192  ;;  %p3150_p2 = scmp.lt.s32.totalorder %s2725_s2, %s2725_s2 }
  0x2e   :  { %v3243_v16 = vld [vmem:[#allocation5 + $0x160] sm:$0xff]  ;;  %v3247_v18 = vld [vmem:[#allocation5 + $0x168] sm:$0xff]  ;;  %1052 = vmatpush1.bf16.msra.mxu0 %v2809_v6  ;;  %1245 = vmatpush1.bf16.msra.mxu1 %v2811_v10  ;;  %v2803_v23 = vcombine.low %v674_v12, %v678_v13  ;;  %v3344_v6 = vld [vmem:[#allocation2 + $0x50] sm:$0xff]  ;;  %v112_v10 = vrot.slane %v3337_v2, 5  ;;  %p3146_p1 = scmp.ne.s32.totalorder %s2725_s2, %s3145_s7  ;;  %p3151_p3 = scmp.lt.s32.totalorder %s3145_s7, %s3145_s7 }
  0x2f   :  { %v3249_v20 = vld [vmem:[#allocation5 + $0x100] sm:$0xff]  ;;  %v3253_v22 = vld [vmem:[#allocation5 + $0x108] sm:$0xff]  ;;  %1053 = vmatprep.subr.bf16.mxu0 %v2802_v11  ;;  %v2794_v24 = vcombine.high %v3241_v14, %v3243_v16  ;;  %1246 = vmatprep.subr.bf16.mxu1 %v2804_v15  ;;  %v2796_v28 = vcombine.high %v3245_v17, %v3247_v18  ;;  %v2793_v29 = vcombine.low %v3241_v14, %v3243_v16  ;;  %v3355_v13 = vld [vmem:[#allocation2 + $0x70] sm:$0xff] }
  0x30   :  { %v3251_v21 = vld [vmem:[#allocation5 + $0x120] sm:$0xff]  ;;  %v3257_v25 = vld [vmem:[#allocation5 + $0x128] sm:$0xff]  ;;  %v2795_v33 = vcombine.low %v3245_v17, %v3247_v18  ;;  %v3359_v15 = vld [vmem:[#allocation2 + $0x90] sm:$0xff]  ;;  %v118_v17 = vrot.slane %v3344_v6, 3  ;;  %p3152_p4 = por %p3151_p3, %p3150_p2 }
  0x31   :  { %v3259_v26 = vld [vmem:[#allocation5 + $0xc0] sm:$0xff]  ;;  %v3267_v30 = vld [vmem:[#allocation5 + $0xc8] sm:$0xff]  ;;  %v2786_v34 = vcombine.high %v3249_v20, %v3251_v21  ;;  %v2788_v35 = vcombine.high %v3253_v22, %v3257_v25  ;;  %v2785_v36 = vcombine.low %v3249_v20, %v3251_v21  ;;  %v2787_v40 = vcombine.low %v3253_v22, %v3257_v25 }
  0x32   :  { %v3261_v27 = vld [vmem:[#allocation5 + $0xe0] sm:$0xff]  ;;  %v3269_v31 = vld [vmem:[#allocation5 + $0xe8] sm:$0xff]  ;;  %1054 = vmatpush1.bf16.msra.mxu0 %v2801_v19  ;;  %1247 = vmatpush1.bf16.msra.mxu1 %v2803_v23  ;;  %v3365_v19 = vld [vmem:[#allocation2 + $0xb0] sm:$0xff]  ;;  %v124_v22 = vrot.slane %v3355_v13, 1  ;;  %p3153_p5 = pnand %p3152_p4, %p3146_p1 }
  0x33   :  { %v3271_v32 = vld [vmem:[#allocation5 + $0x80] sm:$0xff]  ;;  %v3283_v38 = vld [vmem:[#allocation5 + $0x88] sm:$0xff]  ;;  %v2778_v41 = vcombine.high %v3259_v26, %v3261_v27  ;;  %v2780_v42 = vcombine.high %v3267_v30, %v3269_v31  ;;  %v2777_v43 = vcombine.low %v3259_v26, %v3261_v27  ;;  %1055 = vmatprep.subr.bf16.mxu0 %v2794_v24  ;;  %v2779_v47 = vcombine.low %v3267_v30, %v3269_v31 }
  0x34   :  { %v3281_v37 = vld [vmem:[#allocation5 + $0xa0] sm:$0xff]  ;;  %v3285_v39 = vld [vmem:[#allocation5 + $0xa8] sm:$0xff]  ;;  %1248 = vmatprep.subr.bf16.mxu1 %v2796_v28  ;;  %v131_v11 = vrot.slane %v3365_v19, 5 }
  0x35   :  { %v3295_v44 = vld [vmem:[#allocation5 + $0x40] sm:$0xff]  ;;  %v3299_v46 = vld [vmem:[#allocation5 + $0x48] sm:$0xff]  ;;  %v2770_v48 = vcombine.high %v3271_v32, %v3281_v37  ;;  %v2772_v49 = vcombine.high %v3283_v38, %v3285_v39  ;;  %v2769_v53 = vcombine.low %v3271_v32, %v3281_v37  ;;  %v2771_v54 = vcombine.low %v3283_v38, %v3285_v39 }
  0x36   :  { %v3297_v45 = vld [vmem:[#allocation5 + $0x60] sm:$0xff]  ;;  %v3307_v50 = vld [vmem:[#allocation5 + $0x68] sm:$0xff]  ;;  %1056 = vmatpush1.bf16.msra.mxu0 %v2793_v29  ;;  %1249 = vmatpush1.bf16.msra.mxu1 %v2795_v33  ;;  %v127_v29 = vrot.slane %v3359_v15, 7  ;;  %v177_v39 = vrot.slane %v3337_v2, 7 }
  0x37   :  { %v3309_v51 = vld [vmem:[#allocation5] sm:$0xff]  ;;  %v2762_v55 = vcombine.high %v3295_v44, %v3297_v45  ;;  %v3321_v57 = vld [vmem:[#allocation5 + $0x8] sm:$0xff]  ;;  %1057 = vmatprep.subr.bf16.mxu0 %v2786_v34  ;;  %1250 = vmatprep.subr.bf16.mxu1 %v2788_v35  ;;  %v3374_v34 = vld [vmem:[#allocation2 + $0xd0] sm:$0xff] }
  0x38   :  { %v3311_v52 = vld [vmem:[#allocation5 + $0x20] sm:$0xff]  ;;  %v3323_v58 = vld [vmem:[#allocation5 + $0x28] sm:$0xff]  ;;  %v3378_v35 = vld [vmem:[#allocation2 + $0xf0] sm:$0xff]  ;;  %v135_v56 = vrot.slane %v3374_v34, 3 }
  0x39   :  { %v3325_v59 = vld [vmem:[#allocation2] sm:$0xff]  ;;  %v169_v38 = vrot.slane %v3378_v35, 2 }
  0x3a   :  { %v3335_v1 = vld [vmem:[#allocation2 + $0x20] sm:$0xff]  ;;  %v143_v3 = vrot.slane %v3325_v59, 1  ;;  %v108_v24 = vsel %vm107_vm0, %v106_v8, %v3325_v59  ;;  %1058 = vmatpush1.bf16.msra.mxu0 %v2785_v36  ;;  %1251 = vmatpush1.bf16.msra.mxu1 %v2787_v40  ;;  %v139_v40 = vrot.slane %v3378_v35, 1 }
  0x3b   :  { %v3342_v5 = vld [vmem:[#allocation2 + $0x40] sm:$0xff]  ;;  %v109_v9 = vrot.slane %v3335_v1, 6  ;;  %v145_v33 = vrot.slane %v3335_v1, 7  ;;  %1059 = vmatprep.subr.bf16.mxu0 %v2778_v41  ;;  %1252 = vmatprep.subr.bf16.mxu1 %v2780_v42  ;;  %v3414_v41 = vld [vmem:[#allocation5 + $0x1d8] sm:$0xff] }
  0x3c   :  { %v3346_v7 = vld [vmem:[#allocation2 + $0x60] sm:$0xff]  ;;  %v115_v16 = vrot.slane %v3342_v5, 4 }
  0x3d   :  { %v3357_v14 = vld [vmem:[#allocation2 + $0x80] sm:$0xff]  ;;  %v121_v28 = vrot.slane %v3346_v7, 2  ;;  %v111_v12 = vsel %vm110_vm1, %v109_v9, %v108_v24  ;;  %v3393_v9 = vld [vmem:[#allocation5 + $0x1f0] sm:$0xff]  ;;  %v144_v24 = vsel %vm107_vm0, %v3333_v63, %v143_v3 }
  0x3e   :  { %v3363_v18 = vld [vmem:[#allocation2 + $0xa0] sm:$0xff]  ;;  %v114_v62 = vsel %vm113_vm2, %v112_v10, %v111_v12  ;;  %v128_v61 = vsel %vm107_vm0, %v127_v29, %v3357_v14  ;;  %v173_v10 = vrot.slane %v3325_v59, 2  ;;  %v2813_v12 = vcombine.low %v3391_v60, %v3393_v9  ;;  %1060 = vmatpush1.bf16.msra.mxu0 %v2777_v43  ;;  %1253 = vmatpush1.bf16.msra.mxu1 %v2779_v47 }
  0x3f   :  { %v3367_v23 = vld [vmem:[#allocation2 + $0xc0] sm:$0xff]  ;;  %v129_v4 = vrot.slane %v3363_v18, 6  ;;  %v117_v20 = vsel %vm116_vm3, %v115_v16, %v114_v62  ;;  %v3416_v62 = vld [vmem:[#allocation5 + $0x1f8] sm:$0xff]  ;;  %v146_v42 = vsel %vm110_vm1, %v145_v33, %v144_v24  ;;  %v2814_v16 = vcombine.high %v3391_v60, %v3393_v9  ;;  %1061 = vmatprep.subr.bf16.mxu0 %v2770_v48  ;;  %1254 = vmatprep.subr.bf16.mxu1 %v2772_v49 }
  0x40   :  { %v3376_v0 = vld [vmem:[#allocation2 + $0xe0] sm:$0xff]  ;;  %v133_v8 = vrot.slane %v3367_v23, 4  ;;  %v120_v3 = vsel %vm119_vm4, %v118_v17, %v117_v20  ;;  %v147_v17 = vrot.slane %v3337_v2, 6  ;;  %v2815_v27 = vcombine.low %v3414_v41, %v3416_v62 }
  0x41   :  { %v130_v21 = vsel %vm110_vm1, %v129_v4, %v128_v61  ;;  %v137_v36 = vrot.slane %v3376_v0, 2  ;;  %v123_v61 = vsel %vm122_vm5, %v121_v28, %v120_v3  ;;  %v149_v28 = vrot.slane %v3342_v5, 5 }
  0x42   :  { %v132_v25 = vsel %vm113_vm2, %v131_v11, %v130_v21  ;;  %v151_v43 = vrot.slane %v3344_v6, 4  ;;  %v126_v30 = vsel %vm125_vm6, %v124_v22, %v123_v61  ;;  %v148_v31 = vsel %vm113_vm2, %v147_v17, %v146_v42  ;;  %1062 = vmatpush1.bf16.msra.mxu0 %v2769_v53  ;;  %1255 = vmatpush1.bf16.msra.mxu1 %v2771_v54 }
  0x43   :  { %v134_v4 = vsel %vm116_vm3, %v133_v8, %v132_v25  ;;  %v157_v47 = vrot.slane %v3357_v14, 1  ;;  %v159_v48 = vrot.slane %v3363_v18, 7  ;;  %v150_v29 = vsel %vm116_vm3, %v149_v28, %v148_v31  ;;  %1063 = vmatprep.subr.bf16.mxu0 %v2762_v55 }
  0x44   :  { %v136_v11 = vsel %vm119_vm4, %v135_v56, %v134_v4  ;;  %v153_v56 = vrot.slane %v3346_v7, 3  ;;  %v155_v33 = vrot.slane %v3355_v13, 2  ;;  %v161_v8 = vrot.slane %v3365_v19, 6 }
  0x45   :  { %v138_v26 = vsel %vm122_vm5, %v137_v36, %v136_v11  ;;  %v163_v24 = vrot.slane %v3367_v23, 5  ;;  %v152_v20 = vsel %vm119_vm4, %v151_v43, %v150_v29  ;;  %v158_v21 = vsel %vm107_vm0, %v3359_v15, %v157_v47 }
  0x46   :  { %v140_v49 = vsel %vm125_vm6, %v139_v40, %v138_v26  ;;  %v165_v36 = vrot.slane %v3374_v34, 4  ;;  %v154_v32 = vsel %vm122_vm5, %v153_v56, %v152_v20  ;;  %v160_v37 = vsel %vm110_vm1, %v159_v48, %v158_v21  ;;  %v675_v21 = vld [vmem:[#allocation5 + $0x190] sm:$0xff] }
  0x47   :  { %v167_v53 = vrot.slane %v3376_v0, 3  ;;  %v174_v3 = vrot.slane %v3333_v63, 1  ;;  %v4429_v22 = vcombine.high %v3299_v46, %v3307_v50  ;;  %v162_v25 = vsel %vm113_vm2, %v161_v8, %v160_v37 }
  0x48   :  { %v179_v54 = vrot.slane %v3342_v5, 6  ;;  %v156_v55 = vsel %vm125_vm6, %v155_v33, %v154_v32  ;;  %v164_v40 = vsel %vm116_vm3, %v163_v24, %v162_v25  ;;  %v181_v4 = vrot.slane %v3344_v6, 5 }
  0x49   :  { %1256 = vmatprep.subr.bf16.mxu1 %v4429_v22  ;;  %v175_v61 = vsel %vm107_vm0, %v174_v3, %v173_v10  ;;  %v4430_v42 = vcombine.low %v3295_v44, %v3297_v45  ;;  %v166_v11 = vsel %vm119_vm4, %v165_v36, %v164_v40  ;;  %v183_v28 = vrot.slane %v3346_v7, 4  ;;  %v679_v36 = vld [vmem:[#allocation5 + $0x1b0] sm:$0xff]  ;;  %v676_v3 = vld [vmem:[#allocation5 + $0x198] sm:$0xff] }
  0x4a   :  { %v176_v17 = vsel %vm110_vm1, %v3335_v1, %v175_v61  ;;  %v187_v26 = vrot.slane %v3357_v14, 2  ;;  %v4431_v43 = vcombine.low %v3299_v46, %v3307_v50  ;;  %v4432_v10 = vcombine.high %v3309_v51, %v3311_v52  ;;  %v680_v22 = vld [vmem:[#allocation5 + $0x1b8] sm:$0xff] }
  0x4b   :  { %1064 = vmatpush1.bf16.msra.mxu0 %v4430_v42  ;;  %v168_v44 = vsel %vm122_vm5, %v167_v53, %v166_v11  ;;  %v178_v45 = vsel %vm113_vm2, %v177_v39, %v176_v17  ;;  %v188_v56 = vrot.slane %v3359_v15, 1  ;;  %v191_v31 = vrot.slane %v3365_v19, 7 }
  0x4c   :  { %1257 = vmatpush1.bf16.msra.mxu1 %v4431_v43  ;;  %1065 = vmatprep.subr.bf16.mxu0 %v4432_v10  ;;  %v4433_v47 = vcombine.high %v3321_v57, %v3323_v58  ;;  %v2816_v46 = vcombine.high %v3414_v41, %v3416_v62  ;;  %v170_v50 = vsel %vm125_vm6, %v169_v38, %v168_v44  ;;  %v193_v29 = vrot.slane %v3367_v23, 6 }
  0x4d   :  { %v180_v48 = vsel %vm116_vm3, %v179_v54, %v178_v45  ;;  %v3508_v33 = vpack.c.bf16 %v140_v49, %v126_v30  ;;  %v189_v24 = vsel %vm107_vm0, %v188_v56, %v187_v26  ;;  %v195_v20 = vrot.slane %v3374_v34, 5 }
  0x4e   :  { %1258 = vmatprep.subr.bf16.mxu1 %v4433_v47  ;;  %v182_v8 = vsel %vm119_vm4, %v181_v4, %v180_v48  ;;  %v4434_v32 = vcombine.low %v3309_v51, %v3311_v52  ;;  %v3516_v37 = vpack.c.bf16 %v170_v50, %v156_v55  ;;  %v185_v53 = vrot.slane %v3355_v13, 3 }
  0x4f   :  { %v190_v30 = vsel %vm110_vm1, %v3363_v18, %v189_v24  ;;  %v197_v49 = vrot.slane %v3376_v0, 4  ;;  %v4435_v25 = vcombine.low %v3321_v57, %v3323_v58  ;;  %v184_v51 = vsel %vm122_vm5, %v183_v28, %v182_v8 }
  0x50   :  { %1066 = vmatpush1.bf16.msra.mxu0 %v4434_v32  ;;  %v192_v52 = vsel %vm113_vm2, %v191_v31, %v190_v30  ;;  %v199_v38 = vrot.slane %v3378_v35, 3  ;;  %v203_v39 = vrot.slane %v3325_v59, 3  ;;  %v2805_v55 = vcombine.low %v675_v21, %v679_v36 }
  0x51   :  { %1259 = vmatpush1.bf16.msra.mxu1 %v4435_v25  ;;  %1437 = vmatprep.subr.bf16.mxu0 %v2814_v16  ;;  %v194_v54 = vsel %vm116_vm3, %v193_v29, %v192_v52  ;;  %v2806_v40 = vcombine.high %v675_v21, %v679_v36  ;;  %v204_v57 = vrot.slane %v3333_v63, 2  ;;  %v2808_v16 = vcombine.high %v676_v3, %v680_v22 }
  0x52   :  { %1630 = vmatprep.subr.bf16.mxu1 %v2816_v46  ;;  %v196_v58 = vsel %vm119_vm4, %v195_v20, %v194_v54  ;;  %v206_v61 = vrot.slane %v3335_v1, 1  ;;  %v209_v4 = vrot.slane %v3342_v5, 7  ;;  %v186_v42 = vsel %vm125_vm6, %v185_v53, %v184_v51 }
  0x53   :  { %1084 = vmatmul.mubr.bf16.vlgmr.msra.gmra.mxu0 %v3508_v33  ;;  %v2807_v11 = vcombine.low %v676_v3, %v680_v22  ;;  %v205_v17 = vsel %vm107_vm0, %v204_v57, %v203_v39  ;;  %v211_v28 = vrot.slane %v3344_v6, 6  ;;  %v4436_v26 = vmov 0   ;;  %v667_v57 = vld [vmem:[#allocation5 + $0x150] sm:$0xff] }
  0x54   :  { %1277 = vmatmul.mubr.bf16.vlgmr.msra.gmra.mxu1 %v3508_v33  ;;  %1438 = vmatpush1.bf16.msra.mxu0 %v2813_v12  ;;  %v198_v43 = vsel %vm122_vm5, %v197_v49, %v196_v58  ;;  %v207_v10 = vsel %vm110_vm1, %v206_v61, %v205_v17  ;;  %v217_v60 = vrot.slane %v3357_v14, 3  ;;  %v218_v9 = vrot.slane %v3359_v15, 2  ;;  %v671_v58 = vld [vmem:[#allocation5 + $0x170] sm:$0xff]  ;;  %v668_v17 = vld [vmem:[#allocation5 + $0x158] sm:$0xff] }
  0x55   :  { %1631 = vmatpush1.bf16.msra.mxu1 %v2815_v27  ;;  %1093 = vmatprep.mubr.bf16.mxu0 %v4436_v26  ;;  %v208_v12 = vsel %vm113_vm2, %v3337_v2, %v207_v10  ;;  %v213_v44 = vrot.slane %v3346_v7, 5  ;;  %v220_v41 = vrot.slane %v3363_v18, 1  ;;  %v223_v62 = vrot.slane %v3367_v23, 7 }
  0x56   :  { %1286 = vmatprep.mubr.bf16.mxu1 %v4436_v26  ;;  %1439 = vmatprep.subr.bf16.mxu0 %v2806_v40  ;;  %v210_v27 = vsel %vm116_vm3, %v209_v4, %v208_v12  ;;  %v215_v45 = vrot.slane %v3355_v13, 4  ;;  %v219_v56 = vsel %vm107_vm0, %v218_v9, %v217_v60  ;;  %v225_v31 = vrot.slane %v3374_v34, 6 }
  0x57   :  { %1632 = vmatprep.subr.bf16.mxu1 %v2808_v16  ;;  %v212_v47 = vsel %vm119_vm4, %v211_v28, %v210_v27  ;;  %v221_v46 = vsel %vm110_vm1, %v220_v41, %v219_v56  ;;  %v227_v50 = vrot.slane %v3376_v0, 5  ;;  %v233_v48 = vrot.slane %v3325_v59, 4 }
  0x58   :  { %1440 = vmatpush1.bf16.msra.mxu0 %v2805_v55  ;;  %v200_v29 = vsel %vm125_vm6, %v199_v38, %v198_v43  ;;  %v222_v8 = vsel %vm113_vm2, %v3365_v19, %v221_v46  ;;  %v234_v24 = vrot.slane %v3333_v63, 3  ;;  %v236_v20 = vrot.slane %v3335_v1, 2 }
  0x59   :  { %1633 = vmatpush1.bf16.msra.mxu1 %v2807_v11  ;;  %v214_v21 = vsel %vm122_vm5, %v213_v44, %v212_v47  ;;  %v224_v36 = vsel %vm116_vm3, %v223_v62, %v222_v8  ;;  %v229_v32 = vrot.slane %v3378_v35, 4  ;;  %v238_v53 = vrot.slane %v3337_v2, 1 }
  0x5a   :  { %v226_v30 = vsel %vm119_vm4, %v225_v31, %v224_v36  ;;  %v235_v49 = vsel %vm107_vm0, %v234_v24, %v233_v48  ;;  %v241_v3 = vrot.slane %v3344_v6, 7  ;;  %v243_v22 = vrot.slane %v3346_v7, 6 }
  0x5b   :  { %1094 = vmatmul.mubr.bf16.gmra.mxu0 %v3516_v37  ;;  %v228_v25 = vsel %vm122_vm5, %v227_v50, %v226_v30  ;;  %v237_v51 = vsel %vm110_vm1, %v236_v20, %v235_v49  ;;  %v247_v52 = vrot.slane %v3357_v14, 4  ;;  %v248_v38 = vrot.slane %v3359_v15, 3 }
  0x5c   :  { %1287 = vmatmul.mubr.bf16.gmra.mxu1 %v3516_v37  ;;  %1103 = vmatprep.mubr.bf16.mxu0 %v4436_v26  ;;  %v3588_v39 = vpack.c.bf16 %v200_v29, %v186_v42  ;;  %v239_v54 = vsel %vm113_vm2, %v238_v53, %v237_v51  ;;  %v250_v55 = vrot.slane %v3363_v18, 2  ;;  %v252_v40 = vrot.slane %v3365_v19, 1  ;;  %v672_v42 = vld [vmem:[#allocation5 + $0x178] sm:$0xff] }
  0x5d   :  { %1296 = vmatprep.mubr.bf16.mxu1 %v4436_v26  ;;  %v216_v16 = vsel %vm125_vm6, %v215_v45, %v214_v21  ;;  %v240_v61 = vsel %vm116_vm3, %v3342_v5, %v239_v54  ;;  %v249_v4 = vsel %vm107_vm0, %v248_v38, %v247_v52  ;;  %v255_v11 = vrot.slane %v3374_v34, 7 }
  0x5e   :  { %v230_v28 = vsel %vm125_vm6, %v229_v32, %v228_v25  ;;  %v242_v43 = vsel %vm119_vm4, %v241_v3, %v240_v61  ;;  %v245_v10 = vrot.slane %v3355_v13, 5  ;;  %v251_v60 = vsel %vm110_vm1, %v250_v55, %v249_v4 }
  0x5f   :  { %v244_v9 = vsel %vm122_vm5, %v243_v22, %v242_v43  ;;  %v253_v12 = vsel %vm113_vm2, %v252_v40, %v251_v60  ;;  %v257_v44 = vrot.slane %v3376_v0, 6  ;;  %v2798_v41 = vcombine.high %v667_v57, %v671_v58 }
  0x60   :  { %v254_v62 = vsel %vm116_vm3, %v3367_v23, %v253_v12  ;;  %v2797_v27 = vcombine.low %v667_v57, %v671_v58  ;;  %v2799_v45 = vcombine.low %v668_v17, %v672_v42  ;;  %v2800_v56 = vcombine.high %v668_v17, %v672_v42 }
  0x61   :  { %v256_v31 = vsel %vm119_vm4, %v255_v11, %v254_v62  ;;  %1441 = vmatprep.subr.bf16.mxu0 %v2798_v41  ;;  %v263_v47 = vrot.slane %v3325_v59, 5  ;;  %v264_v46 = vrot.slane %v3333_v63, 4  ;;  %v266_v50 = vrot.slane %v3335_v1, 3 }
  0x62   :  { %v3612_v48 = vpack.c.bf16 %v230_v28, %v216_v16  ;;  %1634 = vmatprep.subr.bf16.mxu1 %v2800_v56  ;;  %v268_v29 = vrot.slane %v3337_v2, 2  ;;  %v270_v8 = vrot.slane %v3342_v5, 1  ;;  %v246_v24 = vsel %vm125_vm6, %v245_v10, %v244_v9  ;;  %1442 = vmatpush1.bf16.msra.mxu0 %v2797_v27 }
  0x63   :  { %1104 = vmatmul.mubr.bf16.gmra.mxu0 %v3588_v39  ;;  %v259_v20 = vrot.slane %v3378_v35, 5  ;;  %v265_v21 = vsel %vm107_vm0, %v264_v46, %v263_v47  ;;  %v277_v36 = vrot.slane %v3357_v14, 5  ;;  %v258_v32 = vsel %vm122_vm5, %v257_v44, %v256_v31  ;;  %1635 = vmatpush1.bf16.msra.mxu1 %v2799_v45  ;;  %v659_v47 = vld [vmem:[#allocation5 + $0x110] sm:$0xff] }
  0x64   :  { %1297 = vmatmul.mubr.bf16.gmra.mxu1 %v3588_v39  ;;  %1113 = vmatprep.mubr.bf16.mxu0 %v4436_v26  ;;  %v267_v53 = vsel %vm110_vm1, %v266_v50, %v265_v21  ;;  %v278_v30 = vrot.slane %v3359_v15, 4  ;;  %v280_v49 = vrot.slane %v3363_v18, 3  ;;  %v273_v22 = vrot.slane %v3346_v7, 7  ;;  %v663_v46 = vld [vmem:[#allocation5 + $0x130] sm:$0xff]  ;;  %v664_v21 = vld [vmem:[#allocation5 + $0x138] sm:$0xff] }
  0x65   :  { %1306 = vmatprep.mubr.bf16.mxu1 %v4436_v26  ;;  %v269_v3 = vsel %vm113_vm2, %v268_v29, %v267_v53  ;;  %v282_v25 = vrot.slane %v3365_v19, 2  ;;  %v284_v51 = vrot.slane %v3367_v23, 1  ;;  %v287_v54 = vrot.slane %v3376_v0, 7 }
  0x66   :  { %v271_v52 = vsel %vm116_vm3, %v270_v8, %v269_v3  ;;  %v279_v38 = vsel %vm107_vm0, %v278_v30, %v277_v36  ;;  %v293_v55 = vrot.slane %v3325_v59, 6  ;;  %v294_v58 = vrot.slane %v3333_v63, 5 }
  0x67   :  { %v272_v40 = vsel %vm119_vm4, %v3344_v6, %v271_v52  ;;  %v281_v57 = vsel %vm110_vm1, %v280_v49, %v279_v38  ;;  %v296_v16 = vrot.slane %v3335_v1, 4  ;;  %v260_v61 = vsel %vm125_vm6, %v259_v20, %v258_v32  ;;  %v660_v20 = vld [vmem:[#allocation5 + $0x118] sm:$0xff] }
  0x68   :  { %v275_v4 = vrot.slane %v3355_v13, 6  ;;  %v283_v11 = vsel %vm113_vm2, %v282_v25, %v281_v57  ;;  %v298_v17 = vrot.slane %v3337_v2, 3  ;;  %v274_v42 = vsel %vm122_vm5, %v273_v22, %v272_v40 }
  0x69   :  { %v285_v28 = vsel %vm116_vm3, %v284_v51, %v283_v11  ;;  %v289_v43 = vrot.slane %v3378_v35, 6  ;;  %v295_v10 = vsel %vm107_vm0, %v294_v58, %v293_v55  ;;  %v300_v12 = vrot.slane %v3342_v5, 2  ;;  %v3691_v11 = vld [vmem:[#allocation2 + $0x18] sm:$0xff] }
  0x6a   :  { %v286_v60 = vsel %vm119_vm4, %v3374_v34, %v285_v28  ;;  %v297_v9 = vsel %vm110_vm1, %v296_v16, %v295_v10  ;;  %v307_v44 = vrot.slane %v3357_v14, 6  ;;  %v308_v27 = vrot.slane %v3359_v15, 5  ;;  %v3701_v10 = vld [vmem:[#allocation2 + $0x38] sm:$0xff] }
  0x6b   :  { %1114 = vmatmul.mubr.bf16.gmra.mxu0 %v3612_v48  ;;  %v288_v41 = vsel %vm122_vm5, %v287_v54, %v286_v60  ;;  %v299_v62 = vsel %vm113_vm2, %v298_v17, %v297_v9  ;;  %v310_v45 = vrot.slane %v3363_v18, 4  ;;  %v312_v56 = vrot.slane %v3365_v19, 3 }
  0x6c   :  { %1307 = vmatmul.mubr.bf16.gmra.mxu1 %v3612_v48  ;;  %1123 = vmatprep.mubr.bf16.mxu0 %v4436_v26  ;;  %v314_v31 = vrot.slane %v3367_v23, 2  ;;  %v3663_v50 = vpack.c.bf16 %v260_v61, %v246_v24  ;;  %v302_v29 = vrot.slane %v3344_v6, 1  ;;  %v309_v8 = vsel %vm107_vm0, %v308_v27, %v307_v44  ;;  %v3709_v44 = vld [vmem:[#allocation2 + $0x48] sm:$0xff] }
  0x6d   :  { %1316 = vmatprep.mubr.bf16.mxu1 %v4436_v26  ;;  %v276_v36 = vsel %vm125_vm6, %v275_v4, %v274_v42  ;;  %v290_v32 = vsel %vm125_vm6, %v289_v43, %v288_v41  ;;  %v301_v53 = vsel %vm116_vm3, %v300_v12, %v299_v62  ;;  %v311_v30 = vsel %vm110_vm1, %v310_v45, %v309_v8  ;;  %v3699_v43 = vld [vmem:[#allocation2 + $0x28] sm:$0xff]  ;;  %v3718_v45 = vld [vmem:[#allocation2 + $0x58] sm:$0xff] }
  0x6e   :  { %v313_v49 = vsel %vm113_vm2, %v312_v56, %v311_v30  ;;  %v316_v3 = vrot.slane %v3374_v34, 1  ;;  %v2789_v24 = vcombine.low %v659_v47, %v663_v46  ;;  %v2790_v22 = vcombine.high %v659_v47, %v663_v46  ;;  %v3707_v12 = vld [vmem:[#allocation2 + $0x8] sm:$0xff]  ;;  %v3728_v8 = vld [vmem:[#allocation2 + $0xb8] sm:$0xff] }
  0x6f   :  { %v315_v25 = vsel %vm116_vm3, %v314_v31, %v313_v49  ;;  %v2792_v51 = vcombine.high %v660_v20, %v664_v21  ;;  %v323_v52 = vrot.slane %v3325_v59, 7  ;;  %v324_v38 = vrot.slane %v3333_v63, 6  ;;  %v3738_v30 = vld [vmem:[#allocation2 + $0xc8] sm:$0xff] }
  0x70   :  { %v303_v54 = vsel %vm119_vm4, %v302_v29, %v301_v53  ;;  %1443 = vmatprep.subr.bf16.mxu0 %v2790_v22  ;;  %v2791_v55 = vcombine.low %v660_v20, %v664_v21  ;;  %v326_v40 = vrot.slane %v3335_v1, 5  ;;  %v328_v57 = vrot.slane %v3337_v2, 4  ;;  %v3726_v29 = vld [vmem:[#allocation2 + $0xa8] sm:$0xff]  ;;  %v3745_v22 = vld [vmem:[#allocation2 + $0xd8] sm:$0xff] }
  0x71   :  { %v3680_v58 = vpack.c.bf16 %v290_v32, %v276_v36  ;;  %v305_v16 = vrot.slane %v3355_v13, 7  ;;  %1636 = vmatprep.subr.bf16.mxu1 %v2792_v51  ;;  %v325_v61 = vsel %vm107_vm0, %v324_v38, %v323_v52  ;;  %v330_v59 = vrot.slane %v3342_v5, 3  ;;  %1444 = vmatpush1.bf16.msra.mxu0 %v2789_v24  ;;  %v3736_v53 = vld [vmem:[#allocation2 + $0x88] sm:$0xff] }
  0x72   :  { %v317_v63 = vsel %vm119_vm4, %v316_v3, %v315_v25  ;;  %v327_v1 = vsel %vm110_vm1, %v326_v40, %v325_v61  ;;  %v337_v2 = vrot.slane %v3357_v14, 7  ;;  %v338_v4 = vrot.slane %v3359_v15, 6  ;;  %1637 = vmatpush1.bf16.msra.mxu1 %v2791_v55  ;;  %v3743_v24 = vld [vmem:[#allocation2 + $0x68] sm:$0xff]  ;;  %v651_v40 = vld [vmem:[#allocation5 + $0xd0] sm:$0xff] }
  0x73   :  { %1124 = vmatmul.mubr.bf16.gmra.mxu0 %v3663_v50  ;;  %v304_v17 = vsel %vm122_vm5, %v3346_v7, %v303_v54  ;;  %v329_v5 = vsel %vm113_vm2, %v328_v57, %v327_v1  ;;  %v340_v42 = vrot.slane %v3363_v18, 5  ;;  %v342_v28 = vrot.slane %v3365_v19, 4  ;;  %v3753_v38 = vld [vmem:[#allocation2 + $0xe8] sm:$0xff]  ;;  %v656_v1 = vld [vmem:[#allocation5 + $0xf8] sm:$0xff] }
  0x74   :  { %1317 = vmatmul.mubr.bf16.gmra.mxu1 %v3663_v50  ;;  %1133 = vmatprep.mubr.bf16.mxu0 %v4436_v26  ;;  %v319_v14 = vrot.slane %v3378_v35, 7  ;;  %v332_v15 = vrot.slane %v3344_v6, 2  ;;  %v339_v60 = vsel %vm107_vm0, %v338_v4, %v337_v2  ;;  %v344_v9 = vrot.slane %v3367_v23, 3  ;;  %v3720_v23 = vld [vmem:[#allocation2 + $0x98] sm:$0xff] }
  0x75   :  { %1326 = vmatprep.mubr.bf16.mxu1 %v4436_v26  ;;  %v318_v18 = vsel %vm122_vm5, %v3376_v0, %v317_v63  ;;  %v331_v19 = vsel %vm116_vm3, %v330_v59, %v329_v5  ;;  %v341_v41 = vsel %vm110_vm1, %v340_v42, %v339_v60  ;;  %v369_v62 = vrot.slane %v3691_v11, 7  ;;  %v655_v59 = vld [vmem:[#allocation5 + $0xf0] sm:$0xff]  ;;  %v652_v63 = vld [vmem:[#allocation5 + $0xd8] sm:$0xff] }
  0x76   :  { %v343_v27 = vsel %vm113_vm2, %v342_v28, %v341_v41  ;;  %v346_v6 = vrot.slane %v3374_v34, 2  ;;  %v371_v56 = vrot.slane %v3699_v43, 6  ;;  %v373_v31 = vrot.slane %v3701_v10, 5  ;;  %v3769_v28 = vld [vmem:[#allocation2 + $0x78] sm:$0xff] }
  0x77   :  { %v306_v47 = vsel %vm125_vm6, %v305_v16, %v304_v17  ;;  %v345_v46 = vsel %vm116_vm3, %v344_v9, %v343_v27  ;;  %v370_v20 = vsel %vm107_vm0, %v369_v62, %v3707_v12  ;;  %v375_v34 = vrot.slane %v3709_v44, 4  ;;  %v3775_v62 = vld [vmem:[#allocation2 + $0xf8] sm:$0xff] }
  0x78   :  { %v320_v21 = vsel %vm125_vm6, %v319_v14, %v318_v18  ;;  %v333_v36 = vsel %vm119_vm4, %v332_v15, %v331_v19  ;;  %v334_v32 = vrot.slane %v3346_v7, 1  ;;  %v372_v49 = vsel %vm110_vm1, %v371_v56, %v370_v20 }
  0x79   :  { %v348_v3 = vrot.slane %v3376_v0, 1  ;;  %v374_v25 = vsel %vm113_vm2, %v373_v31, %v372_v49  ;;  %v377_v51 = vrot.slane %v3718_v45, 3  ;;  %v383_v7 = vrot.slane %v3720_v23, 7 }
  0x7a   :  { %v347_v52 = vsel %vm119_vm4, %v346_v6, %v345_v46  ;;  %v376_v0 = vsel %vm116_vm3, %v375_v34, %v374_v25  ;;  %v385_v54 = vrot.slane %v3726_v29, 6  ;;  %v387_v55 = vrot.slane %v3728_v8, 5 }
  0x7b   :  { %1134 = vmatmul.mubr.bf16.gmra.mxu0 %v3680_v58  ;;  %v3759_v57 = vpack.c.bf16 %v320_v21, %v306_v47  ;;  %v384_v16 = vsel %vm107_vm0, %v383_v7, %v3736_v53  ;;  %v389_v61 = vrot.slane %v3738_v30, 4  ;;  %v335_v2 = vsel %vm122_vm5, %v334_v32, %v333_v36 }
  0x7c   :  { %1327 = vmatmul.mubr.bf16.gmra.mxu1 %v3680_v58  ;;  %1143 = vmatprep.mubr.bf16.mxu0 %v4436_v26  ;;  %v379_v4 = vrot.slane %v3743_v24, 2  ;;  %v386_v17 = vsel %vm110_vm1, %v385_v54, %v384_v16  ;;  %v391_v5 = vrot.slane %v3745_v22, 3  ;;  %v349_v42 = vsel %vm122_vm5, %v348_v3, %v347_v52 }
  0x7d   :  { %1336 = vmatprep.mubr.bf16.mxu1 %v4436_v26  ;;  %v378_v14 = vsel %vm119_vm4, %v377_v51, %v376_v0  ;;  %v388_v15 = vsel %vm113_vm2, %v387_v55, %v386_v17  ;;  %v393_v60 = vrot.slane %v3753_v38, 2  ;;  %v2782_v18 = vcombine.high %v651_v40, %v655_v59 }
  0x7e   :  { %v390_v9 = vsel %vm116_vm3, %v389_v61, %v388_v15  ;;  %v2783_v19 = vcombine.low %v652_v63, %v656_v1  ;;  %v2784_v41 = vcombine.high %v652_v63, %v656_v1  ;;  %v2781_v27 = vcombine.low %v651_v40, %v655_v59 }
  0x7f   :  { %v399_v6 = vrot.slane %v3707_v12, 1  ;;  %v401_v56 = vrot.slane %v3699_v43, 7  ;;  %v403_v31 = vrot.slane %v3701_v10, 6  ;;  %v336_v47 = vsel %vm125_vm6, %v3355_v13, %v335_v2  ;;  %1445 = vmatprep.subr.bf16.mxu0 %v2782_v18 }
  0x80   :  { %v350_v46 = vsel %vm125_vm6, %v3378_v35, %v349_v42  ;;  %v381_v20 = vrot.slane %v3769_v28, 1  ;;  %v392_v34 = vsel %vm119_vm4, %v391_v5, %v390_v9  ;;  %1638 = vmatprep.subr.bf16.mxu1 %v2784_v41  ;;  %v380_v21 = vsel %vm122_vm5, %v379_v4, %v378_v14  ;;  %1446 = vmatpush1.bf16.msra.mxu0 %v2781_v27 }
  0x81   :  { %1639 = vmatpush1.bf16.msra.mxu1 %v2783_v19  ;;  %v400_v36 = vsel %vm107_vm0, %v3691_v11, %v399_v6  ;;  %v405_v32 = vrot.slane %v3709_v44, 5  ;;  %v413_v13 = vrot.slane %v3736_v53, 1  ;;  %v395_v35 = vrot.slane %v3775_v62, 1 }
  0x82   :  { %v402_v49 = vsel %vm110_vm1, %v401_v56, %v400_v36  ;;  %v415_v3 = vrot.slane %v3726_v29, 7  ;;  %v417_v25 = vrot.slane %v3728_v8, 6  ;;  %v394_v51 = vsel %vm122_vm5, %v393_v60, %v392_v34  ;;  %v643_v56 = vld [vmem:[#allocation5 + $0x90] sm:$0xff]  ;;  %v648_v36 = vld [vmem:[#allocation5 + $0xb8] sm:$0xff] }
  0x83   :  { %1144 = vmatmul.mubr.bf16.gmra.mxu0 %v3759_v57  ;;  %v404_v7 = vsel %vm113_vm2, %v403_v31, %v402_v49  ;;  %v414_v52 = vsel %vm107_vm0, %v3720_v23, %v413_v13  ;;  %v3803_v0 = vpack.c.bf16 %v350_v46, %v336_v47  ;;  %v407_v54 = vrot.slane %v3718_v45, 4  ;;  %v647_v31 = vld [vmem:[#allocation5 + $0xb0] sm:$0xff] }
  0x84   :  { %1337 = vmatmul.mubr.bf16.gmra.mxu1 %v3759_v57  ;;  %1153 = vmatprep.mubr.bf16.mxu0 %v4436_v26  ;;  %v416_v55 = vsel %vm110_vm1, %v415_v3, %v414_v52  ;;  %v419_v40 = vrot.slane %v3738_v30, 5  ;;  %v406_v16 = vsel %vm116_vm3, %v405_v32, %v404_v7  ;;  %v429_v59 = vrot.slane %v3707_v12, 2 }
  0x85   :  { %1346 = vmatprep.mubr.bf16.mxu1 %v4436_v26  ;;  %v418_v61 = vsel %vm113_vm2, %v417_v25, %v416_v55  ;;  %v430_v63 = vrot.slane %v3691_v11, 1  ;;  %v382_v1 = vsel %vm125_vm6, %v381_v20, %v380_v21  ;;  %v396_v2 = vsel %vm125_vm6, %v395_v35, %v394_v51  ;;  %v644_v21 = vld [vmem:[#allocation5 + $0x98] sm:$0xff] }
  0x86   :  { %v433_v4 = vrot.slane %v3701_v10, 7  ;;  %v409_v17 = vrot.slane %v3743_v24, 3  ;;  %v411_v5 = vrot.slane %v3769_v28, 2  ;;  %v421_v42 = vrot.slane %v3745_v22, 4 }
  0x87   :  { %v431_v14 = vsel %vm107_vm0, %v430_v63, %v429_v59  ;;  %v408_v15 = vsel %vm119_vm4, %v407_v54, %v406_v16  ;;  %v420_v60 = vsel %vm116_vm3, %v419_v40, %v418_v61  ;;  %v435_v18 = vrot.slane %v3709_v44, 6 }
  0x88   :  { %v432_v9 = vsel %vm110_vm1, %v3699_v43, %v431_v14  ;;  %v3825_v19 = vpack.c.bf16 %v396_v2, %v382_v1  ;;  %v443_v27 = vrot.slane %v3736_v53, 2  ;;  %v444_v6 = vrot.slane %v3720_v23, 1 }
  0x89   :  { %v434_v41 = vsel %vm113_vm2, %v433_v4, %v432_v9  ;;  %v423_v47 = vrot.slane %v3753_v38, 3  ;;  %v425_v46 = vrot.slane %v3775_v62, 2  ;;  %v447_v20 = vrot.slane %v3728_v8, 7 }
  0x8a   :  { %v449_v34 = vrot.slane %v3738_v30, 6  ;;  %v410_v32 = vsel %vm122_vm5, %v409_v17, %v408_v15  ;;  %v422_v13 = vsel %vm119_vm4, %v421_v42, %v420_v60  ;;  %v437_v35 = vrot.slane %v3718_v45, 5 }
  0x8b   :  { %1154 = vmatmul.mubr.bf16.gmra.mxu0 %v3803_v0  ;;  %v445_v49 = vsel %vm107_vm0, %v444_v6, %v443_v27  ;;  %v436_v3 = vsel %vm116_vm3, %v435_v18, %v434_v41  ;;  %v451_v51 = vrot.slane %v3745_v22, 5  ;;  %v2773_v7 = vcombine.low %v643_v56, %v647_v31 }
  0x8c   :  { %1347 = vmatmul.mubr.bf16.gmra.mxu1 %v3803_v0  ;;  %1163 = vmatprep.mubr.bf16.mxu0 %v4436_v26  ;;  %v446_v25 = vsel %vm110_vm1, %v3726_v29, %v445_v49  ;;  %v439_v52 = vrot.slane %v3743_v24, 4  ;;  %v2774_v55 = vcombine.high %v643_v56, %v647_v31  ;;  %v2775_v40 = vcombine.low %v644_v21, %v648_v36 }
  0x8d   :  { %1356 = vmatprep.mubr.bf16.mxu1 %v4436_v26  ;;  %v448_v54 = vsel %vm113_vm2, %v447_v20, %v446_v25  ;;  %v2776_v61 = vcombine.high %v644_v21, %v648_v36  ;;  %v459_v59 = vrot.slane %v3707_v12, 3  ;;  %v460_v63 = vrot.slane %v3691_v11, 2 }
  0x8e   :  { %v450_v16 = vsel %vm116_vm3, %v449_v34, %v448_v54  ;;  %v424_v1 = vsel %vm122_vm5, %v423_v47, %v422_v13  ;;  %v438_v2 = vsel %vm119_vm4, %v437_v35, %v436_v3  ;;  %v453_v4 = vrot.slane %v3753_v38, 4  ;;  %1447 = vmatprep.subr.bf16.mxu0 %v2774_v55 }
  0x8f   :  { %v462_v17 = vrot.slane %v3699_v43, 1  ;;  %v412_v42 = vsel %vm125_vm6, %v411_v5, %v410_v32  ;;  %v452_v14 = vsel %vm119_vm4, %v451_v51, %v450_v16  ;;  %1640 = vmatprep.subr.bf16.mxu1 %v2776_v61  ;;  %1448 = vmatpush1.bf16.msra.mxu0 %v2773_v7  ;;  %v461_v15 = vsel %vm107_vm0, %v460_v63, %v459_v59 }
  0x90   :  { %v465_v60 = vrot.slane %v3709_v44, 7  ;;  %v441_v9 = vrot.slane %v3769_v28, 3  ;;  %1641 = vmatpush1.bf16.msra.mxu1 %v2775_v40  ;;  %v473_v41 = vrot.slane %v3736_v53, 3  ;;  %v474_v27 = vrot.slane %v3720_v23, 2 }
  0x91   :  { %v463_v18 = vsel %vm110_vm1, %v462_v17, %v461_v15  ;;  %v426_v5 = vsel %vm125_vm6, %v425_v46, %v424_v1  ;;  %v440_v6 = vsel %vm122_vm5, %v439_v52, %v438_v2  ;;  %v476_v31 = vrot.slane %v3726_v29, 1 }
  0x92   :  { %v464_v56 = vsel %vm113_vm2, %v3701_v10, %v463_v18  ;;  %v454_v47 = vsel %vm122_vm5, %v453_v4, %v452_v14  ;;  %v455_v20 = vrot.slane %v3775_v62, 3  ;;  %v467_v34 = vrot.slane %v3718_v45, 6  ;;  %v639_v14 = vld [vmem:[#allocation5 + $0x70] sm:$0xff] }
  0x93   :  { %1164 = vmatmul.mubr.bf16.gmra.mxu0 %v3825_v19  ;;  %v475_v21 = vsel %vm107_vm0, %v474_v27, %v473_v41  ;;  %v466_v36 = vsel %vm116_vm3, %v465_v60, %v464_v56  ;;  %v479_v32 = vrot.slane %v3738_v30, 7  ;;  %v489_v13 = vrot.slane %v3707_v12, 4  ;;  %v636_v41 = vld [vmem:[#allocation5 + $0x58] sm:$0xff] }
  0x94   :  { %1357 = vmatmul.mubr.bf16.gmra.mxu1 %v3825_v19  ;;  %1173 = vmatprep.mubr.bf16.mxu0 %v4436_v26  ;;  %v477_v46 = vsel %vm110_vm1, %v476_v31, %v475_v21  ;;  %v3879_v35 = vpack.c.bf16 %v426_v5, %v412_v42  ;;  %v490_v3 = vrot.slane %v3691_v11, 3  ;;  %v492_v25 = vrot.slane %v3699_v43, 2  ;;  %v635_v42 = vld [vmem:[#allocation5 + $0x50] sm:$0xff]  ;;  %v640_v27 = vld [vmem:[#allocation5 + $0x78] sm:$0xff] }
  0x95   :  { %1366 = vmatprep.mubr.bf16.mxu1 %v4436_v26  ;;  %v478_v49 = vsel %vm113_vm2, %v3728_v8, %v477_v46  ;;  %v442_v51 = vsel %vm125_vm6, %v441_v9, %v440_v6  ;;  %v469_v7 = vrot.slane %v3743_v24, 5  ;;  %v494_v52 = vrot.slane %v3701_v10, 1 }
  0x96   :  { %v456_v54 = vsel %vm125_vm6, %v455_v20, %v454_v47  ;;  %v468_v55 = vsel %vm119_vm4, %v467_v34, %v466_v36  ;;  %v481_v40 = vrot.slane %v3745_v22, 6  ;;  %v491_v16 = vsel %vm107_vm0, %v490_v3, %v489_v13 }
  0x97   :  { %v480_v61 = vsel %vm116_vm3, %v479_v32, %v478_v49  ;;  %v493_v59 = vsel %vm110_vm1, %v492_v25, %v491_v16  ;;  %v503_v63 = vrot.slane %v3736_v53, 4  ;;  %v504_v1 = vrot.slane %v3720_v23, 3 }
  0x98   :  { %v471_v2 = vrot.slane %v3769_v28, 4  ;;  %v506_v4 = vrot.slane %v3726_v29, 2  ;;  %v508_v17 = vrot.slane %v3728_v8, 1  ;;  %v3902_v15 = vpack.c.bf16 %v456_v54, %v442_v51 }
  0x99   :  { %v483_v60 = vrot.slane %v3753_v38, 5  ;;  %v495_v9 = vsel %vm113_vm2, %v494_v52, %v493_v59  ;;  %v505_v18 = vsel %vm107_vm0, %v504_v1, %v503_v63  ;;  %v470_v5 = vsel %vm122_vm5, %v469_v7, %v468_v55 }
  0x9a   :  { %v482_v6 = vsel %vm119_vm4, %v481_v40, %v480_v61  ;;  %v497_v56 = vrot.slane %v3718_v45, 7  ;;  %v507_v31 = vsel %vm110_vm1, %v506_v4, %v505_v18  ;;  %v511_v20 = vrot.slane %v3745_v22, 7 }
  0x9b   :  { %1174 = vmatmul.mubr.bf16.gmra.mxu0 %v3879_v35  ;;  %v509_v47 = vsel %vm113_vm2, %v508_v17, %v507_v31  ;;  %v2765_v34 = vcombine.low %v635_v42, %v639_v14  ;;  %v2766_v21 = vcombine.high %v635_v42, %v639_v14  ;;  %v496_v36 = vsel %vm116_vm3, %v3709_v44, %v495_v9 }
  0x9c   :  { %1367 = vmatmul.mubr.bf16.gmra.mxu1 %v3879_v35  ;;  %1183 = vmatprep.mubr.bf16.mxu0 %v4436_v26  ;;  %v510_v46 = vsel %vm116_vm3, %v3738_v30, %v509_v47  ;;  %v2767_v32 = vcombine.low %v636_v41, %v640_v27  ;;  %v2768_v13 = vcombine.high %v636_v41, %v640_v27  ;;  %v485_v49 = vrot.slane %v3775_v62, 4 }
  0x9d   :  { %1376 = vmatprep.mubr.bf16.mxu1 %v4436_v26  ;;  %1449 = vmatprep.subr.bf16.mxu0 %v2766_v21  ;;  %v519_v3 = vrot.slane %v3707_v12, 5  ;;  %v520_v25 = vrot.slane %v3691_v11, 4  ;;  %v522_v51 = vrot.slane %v3699_v43, 3  ;;  %v472_v7 = vsel %vm125_vm6, %v471_v2, %v470_v5 }
  0x9e   :  { %v484_v52 = vsel %vm122_vm5, %v483_v60, %v482_v6  ;;  %v499_v54 = vrot.slane %v3743_v24, 6  ;;  %v513_v55 = vrot.slane %v3753_v38, 6  ;;  %1642 = vmatprep.subr.bf16.mxu1 %v2768_v13  ;;  %1450 = vmatpush1.bf16.msra.mxu0 %v2765_v34  ;;  %v498_v40 = vsel %vm119_vm4, %v497_v56, %v496_v36 }
  0x9f   :  { %v512_v16 = vsel %vm119_vm4, %v511_v20, %v510_v46  ;;  %1643 = vmatpush1.bf16.msra.mxu1 %v2767_v32  ;;  %v521_v61 = vsel %vm107_vm0, %v520_v25, %v519_v3  ;;  %v533_v59 = vrot.slane %v3736_v53, 5  ;;  %v501_v63 = vrot.slane %v3769_v28, 5 }
  0xa0   :  { %v524_v1 = vrot.slane %v3701_v10, 2  ;;  %v534_v2 = vrot.slane %v3720_v23, 4  ;;  %v536_v4 = vrot.slane %v3726_v29, 3  ;;  %v486_v17 = vsel %vm125_vm6, %v485_v49, %v484_v52 }
  0xa1   :  { %v515_v42 = vrot.slane %v3775_v62, 5  ;;  %v523_v14 = vsel %vm110_vm1, %v522_v51, %v521_v61  ;;  %v538_v60 = vrot.slane %v3728_v8, 2  ;;  %v500_v9 = vsel %vm122_vm5, %v499_v54, %v498_v40  ;;  %v627_v51 = vld [vmem:[#allocation5 + $0x10] sm:$0xff]  ;;  %v632_v61 = vld [vmem:[#allocation5 + $0x38] sm:$0xff] }
  0xa2   :  { %v514_v18 = vsel %vm122_vm5, %v513_v55, %v512_v16  ;;  %v535_v41 = vsel %vm107_vm0, %v534_v2, %v533_v59  ;;  %v526_v27 = vrot.slane %v3709_v44, 1  ;;  %v549_v6 = vrot.slane %v3707_v12, 6  ;;  %v628_v16 = vld [vmem:[#allocation5 + $0x18] sm:$0xff] }
  0xa3   :  { %1184 = vmatmul.mubr.bf16.gmra.mxu0 %v3902_v15  ;;  %v537_v5 = vsel %vm110_vm1, %v536_v4, %v535_v41  ;;  %v550_v56 = vrot.slane %v3691_v11, 5  ;;  %v3949_v31 = vpack.c.bf16 %v486_v17, %v472_v7  ;;  %v525_v47 = vsel %vm113_vm2, %v524_v1, %v523_v14  ;;  %v631_v7 = vld [vmem:[#allocation5 + $0x30] sm:$0xff] }
  0xa4   :  { %1377 = vmatmul.mubr.bf16.gmra.mxu1 %v3902_v15  ;;  %1193 = vmatprep.mubr.bf16.mxu0 %v4436_v26  ;;  %v540_v20 = vrot.slane %v3738_v30, 1  ;;  %v502_v34 = vsel %vm125_vm6, %v501_v63, %v500_v9  ;;  %v516_v21 = vsel %vm125_vm6, %v515_v42, %v514_v18  ;;  %v539_v36 = vsel %vm113_vm2, %v538_v60, %v537_v5 }
  0xa5   :  { %1386 = vmatprep.mubr.bf16.mxu1 %v4436_v26  ;;  %v552_v46 = vrot.slane %v3699_v43, 4  ;;  %v563_v32 = vrot.slane %v3736_v53, 6  ;;  %v527_v13 = vsel %vm116_vm3, %v526_v27, %v525_v47  ;;  %v551_v49 = vsel %vm107_vm0, %v550_v56, %v549_v6 }
  0xa6   :  { %v564_v3 = vrot.slane %v3720_v23, 5  ;;  %v566_v25 = vrot.slane %v3726_v29, 4  ;;  %v3963_v52 = vpack.c.bf16 %v516_v21, %v502_v34  ;;  %v529_v54 = vrot.slane %v3743_v24, 7 }
  0xa7   :  { %v531_v55 = vrot.slane %v3769_v28, 6  ;;  %v541_v40 = vsel %vm116_vm3, %v540_v20, %v539_v36  ;;  %v543_v59 = vrot.slane %v3753_v38, 7  ;;  %v554_v63 = vrot.slane %v3701_v10, 3 }
  0xa8   :  { %v565_v1 = vsel %vm107_vm0, %v564_v3, %v563_v32  ;;  %v568_v2 = vrot.slane %v3728_v8, 3  ;;  %v528_v4 = vsel %vm119_vm4, %v3718_v45, %v527_v13  ;;  %v553_v17 = vsel %vm110_vm1, %v552_v46, %v551_v49 }
  0xa9   :  { %v567_v42 = vsel %vm110_vm1, %v566_v25, %v565_v1  ;;  %v2757_v14 = vcombine.low %v627_v51, %v631_v7  ;;  %v542_v60 = vsel %vm119_vm4, %v3745_v22, %v541_v40  ;;  %v556_v9 = vrot.slane %v3709_v44, 2 }
  0xaa   :  { %v2758_v18 = vcombine.high %v627_v51, %v631_v7  ;;  %v2759_v41 = vcombine.low %v628_v16, %v632_v61  ;;  %v570_v27 = vrot.slane %v3738_v30, 2  ;;  %v2760_v5 = vcombine.high %v628_v16, %v632_v61 }
  0xab   :  { %1194 = vmatmul.mubr.bf16.gmra.mxu0 %v3949_v31  ;;  %v579_v6 = vrot.slane %v3707_v12, 7  ;;  %v580_v56 = vrot.slane %v3691_v11, 6  ;;  %v530_v47 = vsel %vm122_vm5, %v529_v54, %v528_v4  ;;  %v545_v20 = vrot.slane %v3775_v62, 6 }
  0xac   :  { %1387 = vmatmul.mubr.bf16.gmra.mxu1 %v3949_v31  ;;  %1203 = vmatprep.mubr.bf16.mxu0 %v4436_v26  ;;  %v555_v34 = vsel %vm113_vm2, %v554_v63, %v553_v17  ;;  %v569_v21 = vsel %vm113_vm2, %v568_v2, %v567_v42  ;;  %v544_v36 = vsel %vm122_vm5, %v543_v59, %v542_v60  ;;  %v558_v46 = vrot.slane %v3718_v45, 1 }
  0xad   :  { %1396 = vmatprep.mubr.bf16.mxu1 %v4436_v26  ;;  %1451 = vmatprep.subr.bf16.mxu0 %v2758_v18  ;;  %v582_v32 = vrot.slane %v3699_v43, 5  ;;  %v572_v12 = vrot.slane %v3745_v22, 1  ;;  %v581_v11 = vsel %vm107_vm0, %v580_v56, %v579_v6  ;;  %v593_v13 = vrot.slane %v3736_v53, 7 }
  0xae   :  { %1644 = vmatprep.subr.bf16.mxu1 %v2760_v5  ;;  %1452 = vmatpush1.bf16.msra.mxu0 %v2757_v14  ;;  %v594_v49 = vrot.slane %v3720_v23, 6  ;;  %v532_v3 = vsel %vm125_vm6, %v531_v55, %v530_v47  ;;  %v557_v25 = vsel %vm116_vm3, %v556_v9, %v555_v34  ;;  %v571_v51 = vsel %vm116_vm3, %v570_v27, %v569_v21 }
  0xaf   :  { %1645 = vmatpush1.bf16.msra.mxu1 %v2759_v41  ;;  %v596_v7 = vrot.slane %v3726_v29, 5  ;;  %v546_v43 = vsel %vm125_vm6, %v545_v20, %v544_v36  ;;  %v584_v53 = vrot.slane %v3701_v10, 4  ;;  %v598_v54 = vrot.slane %v3728_v8, 4 }
  0xb0   :  { %v595_v23 = vsel %vm107_vm0, %v594_v49, %v593_v13  ;;  %v583_v55 = vsel %vm110_vm1, %v582_v32, %v581_v11  ;;  %v559_v29 = vsel %vm119_vm4, %v558_v46, %v557_v25  ;;  %v573_v16 = vsel %vm119_vm4, %v572_v12, %v571_v51 }
  0xb1   :  { %v597_v40 = vsel %vm110_vm1, %v596_v7, %v595_v23  ;;  %v4012_v61 = vpack.c.bf16 %v546_v43, %v532_v3  ;;  %v586_v59 = vrot.slane %v3709_v44, 3  ;;  %v600_v10 = vrot.slane %v3738_v30, 3 }
  0xb2   :  { %v561_v63 = vrot.slane %v3769_v28, 7  ;;  %v575_v8 = vrot.slane %v3775_v62, 7  ;;  %v585_v1 = vsel %vm113_vm2, %v584_v53, %v583_v55  ;;  %v599_v2 = vsel %vm113_vm2, %v598_v54, %v597_v40 }
  0xb3   :  { %1204 = vmatmul.mubr.bf16.gmra.mxu0 %v3963_v52  ;;  %v560_v4 = vsel %vm122_vm5, %v3743_v24, %v559_v29  ;;  %v574_v17 = vsel %vm122_vm5, %v3753_v38, %v573_v16  ;;  %v588_v42 = vrot.slane %v3718_v45, 2  ;;  %v602_v44 = vrot.slane %v3745_v22, 2 }
  0xb4   :  { %1397 = vmatmul.mubr.bf16.gmra.mxu1 %v3963_v52  ;;  %1213 = vmatprep.mubr.bf16.mxu0 %v4436_v26  ;;  %v587_v30 = vsel %vm116_vm3, %v586_v59, %v585_v1  ;;  %v601_v14 = vsel %vm116_vm3, %v600_v10, %v599_v2  ;;  %v562_v60 = vsel %vm125_vm6, %v561_v63, %v560_v4  ;;  %v590_v45 = vrot.slane %v3743_v24, 1 }
  0xb5   :  { %1406 = vmatprep.mubr.bf16.mxu1 %v4436_v26  ;;  %v576_v9 = vsel %vm125_vm6, %v575_v8, %v574_v17  ;;  %v604_v22 = vrot.slane %v3753_v38, 1  ;;  %v589_v18 = vsel %vm119_vm4, %v588_v42, %v587_v30  ;;  %v603_v41 = vsel %vm119_vm4, %v602_v44, %v601_v14 }
  0xb6   :  { %v4038_v27 = vpack.c.bf16 %v576_v9, %v562_v60  ;;  %v591_v5 = vsel %vm122_vm5, %v590_v45, %v589_v18 }
  0xb7   :  { %v605_v6 = vsel %vm122_vm5, %v604_v22, %v603_v41  ;;  %v592_v24 = vsel %vm125_vm6, %v3769_v28, %v591_v5 }
  0xb8   :  { %v606_v38 = vsel %vm125_vm6, %v3775_v62, %v605_v6 }
  0xb9   :  { %v4050_v56 = vpack.c.bf16 %v606_v38, %v592_v24 }
  0xbb   :  { %1214 = vmatmul.mubr.bf16.gmra.mxu0 %v4012_v61 }
  0xbc   :  { %1407 = vmatmul.mubr.bf16.gmra.mxu1 %v4012_v61  ;;  %1223 = vmatprep.mubr.bf16.mxu0 %v4436_v26 }
  0xbd   :  { %1416 = vmatprep.mubr.bf16.mxu1 %v4436_v26 }
  0xc3   :  { %1224 = vmatmul.mubr.bf16.gmra.mxu0 %v4038_v27 }
  0xc4   :  { %1417 = vmatmul.mubr.bf16.gmra.mxu1 %v4038_v27  ;;  %1233 = vmatprep.mubr.bf16.mxu0 %v4436_v26 }
  0xc5   :  { %1426 = vmatprep.mubr.bf16.mxu1 %v4436_v26 }
  0xcb   :  { %1234 = vmatmul.mubr.bf16.gmra.mxu0 %v4050_v56 }
  0xcc   :  { %1427 = vmatmul.mubr.bf16.gmra.mxu1 %v4050_v56  ;;  %1469 = vmatprep.mubr.bf16.mxu0 %v4436_v26 }
  0xcd   :  { %1662 = vmatprep.mubr.bf16.mxu1 %v4436_v26 }
  0xd3   :  { %1470 = vmatmul.mubr.bf16.vlgmr.msra.gmra.mxu0 %v3508_v33 }
  0xd4   :  { %1663 = vmatmul.mubr.bf16.vlgmr.msra.gmra.mxu1 %v3508_v33  ;;  %1479 = vmatprep.mubr.bf16.mxu0 %v4436_v26  ;;  %v691_v33 = vlaneseq }
  0xd5   :  { %1672 = vmatprep.mubr.bf16.mxu1 %v4436_v26 }
  0xdb   :  { %1480 = vmatmul.mubr.bf16.gmra.mxu0 %v3516_v37 }
  0xdc   :  { %1673 = vmatmul.mubr.bf16.gmra.mxu1 %v3516_v37  ;;  %1489 = vmatprep.mubr.bf16.mxu0 %v4436_v26  ;;  %v4084_v37 = vshrl.u32 %v691_v33, 7 }
  0xdd   :  { %1682 = vmatprep.mubr.bf16.mxu1 %v4436_v26 }
  0xe3   :  { %1490 = vmatmul.mubr.bf16.gmra.mxu0 %v3588_v39 }
  0xe4   :  { %1683 = vmatmul.mubr.bf16.gmra.mxu1 %v3588_v39  ;;  %1499 = vmatprep.mubr.bf16.mxu0 %v4436_v26  ;;  %v693_v39 = vsub.s32 0, %v4084_v37 }
  0xe5   :  { %1692 = vmatprep.mubr.bf16.mxu1 %v4436_v26 }
  0xeb   :  { %1500 = vmatmul.mubr.bf16.gmra.mxu0 %v3612_v48 }
  0xec   :  { %1693 = vmatmul.mubr.bf16.gmra.mxu1 %v3612_v48  ;;  %1509 = vmatprep.mubr.bf16.mxu0 %v4436_v26  ;;  %v697_v48 = vsub.s32 1, %v4084_v37 }
  0xed   :  { %1702 = vmatprep.mubr.bf16.mxu1 %v4436_v26 }
  0xf3   :  { %1510 = vmatmul.mubr.bf16.gmra.mxu0 %v3663_v50 }
  0xf4   :  { %1703 = vmatmul.mubr.bf16.gmra.mxu1 %v3663_v50  ;;  %1519 = vmatprep.mubr.bf16.mxu0 %v4436_v26  ;;  %v4092_v50 = vld [vmem:[#allocation7] sm:$0xff] }
  0xf5   :  { %1712 = vmatprep.mubr.bf16.mxu1 %v4436_v26  ;;  %v4097_v28 = vrot.slane %v4092_v50, %v693_v39  ;;  %v4100_v62 = vrot.slane %v4092_v50, %v697_v48 }
  0xfb   :  { %1520 = vmatmul.mubr.bf16.gmra.mxu0 %v3680_v58 }
  0xfc   :  { %1713 = vmatmul.mubr.bf16.gmra.mxu1 %v3680_v58  ;;  %1529 = vmatprep.mubr.bf16.mxu0 %v4436_v26  ;;  %v701_v58 = vsub.s32 2, %v4084_v37 }
  0xfd   :  { %1722 = vmatprep.mubr.bf16.mxu1 %v4436_v26 }
  0xfe   :  { %v4103_v47 = vrot.slane %v4092_v50, %v701_v58 }
 0x103   :  { %1530 = vmatmul.mubr.bf16.gmra.mxu0 %v3759_v57 }
 0x104   :  { %1723 = vmatmul.mubr.bf16.gmra.mxu1 %v3759_v57  ;;  %1539 = vmatprep.mubr.bf16.mxu0 %v4436_v26  ;;  %v705_v57 = vsub.s32 3, %v4084_v37 }
 0x105   :  { %1732 = vmatprep.mubr.bf16.mxu1 %v4436_v26 }
 0x106   :  { %v4107_v20 = vrot.slane %v4092_v50, %v705_v57 }
 0x10b   :  { %1540 = vmatmul.mubr.bf16.gmra.mxu0 %v3803_v0 }
 0x10c   :  { %1733 = vmatmul.mubr.bf16.gmra.mxu1 %v3803_v0  ;;  %1549 = vmatprep.mubr.bf16.mxu0 %v4436_v26 }
 0x10d   :  { %1742 = vmatprep.mubr.bf16.mxu1 %v4436_v26 }
 0x113   :  { %v1085_v0 = vpop.f32.mrf.mxu0  ;;  %1550 = vmatmul.mubr.bf16.gmra.mxu0 %v3825_v19 }
 0x114   :  { %v1278_v34 = vpop.f32.mrf.mxu1  ;;  %1743 = vmatmul.mubr.bf16.gmra.mxu1 %v3825_v19  ;;  %1559 = vmatprep.mubr.bf16.mxu0 %v4436_v26  ;;  %v1086_v36 = vadd.f32 %v1085_v0, %v4097_v28 }
 0x115   :  { %v1087_v21 = vpop.f32.mrf.mxu0  ;;  %1752 = vmatprep.mubr.bf16.mxu1 %v4436_v26  ;;  %v1279_v12 = vadd.f32 %v1278_v34, %v4103_v47 }
 0x116   :  { %v1088_v46 = vadd.f32 %v1087_v21, %v4100_v62  ;;  %v1280_v32 = vpop.f32.mrf.mxu1 }
 0x117   :  { %v1281_v11 = vadd.f32 %v1280_v32, %v4107_v20  ;;  %v1089_v13 = vpop.f32.mrf.mxu0 }
 0x118   :  { %v2945_v49 = vpack.c.bf16 %v1088_v46, %v1086_v36  ;;  %v1282_v3 = vpop.f32.mrf.mxu1  ;;  %v1090_v19 = vadd.f32 %v1089_v13, %v4097_v28 }
 0x119   :  { %v2946_v25 = vpack.c.bf16 %v1281_v11, %v1279_v12  ;;  %v1091_v51 = vpop.f32.mrf.mxu0  ;;  %v1283_v53 = vadd.f32 %v1282_v3, %v4103_v47 }
 0x11a   :  { %2207 = vst [vmem:[#allocation8] sm:$0xff] %v2945_v49  ;;  %v1092_v7 = vadd.f32 %v1091_v51, %v4100_v62  ;;  %v1284_v43 = vpop.f32.mrf.mxu1 }
 0x11b   :  { %2208 = vst [vmem:[#allocation8 + $0x8] sm:$0xff] %v2946_v25  ;;  %v1285_v23 = vadd.f32 %v1284_v43, %v4107_v20  ;;  %v1095_v54 = vpop.f32.mrf.mxu0  ;;  %1560 = vmatmul.mubr.bf16.gmra.mxu0 %v3879_v35 }
 0x11c   :  { %v2947_v55 = vpack.c.bf16 %v1092_v7, %v1090_v19  ;;  %v1288_v40 = vpop.f32.mrf.mxu1  ;;  %1753 = vmatmul.mubr.bf16.gmra.mxu1 %v3879_v35  ;;  %1569 = vmatprep.mubr.bf16.mxu0 %v4436_v26  ;;  %v1096_v59 = vadd.f32 %v1095_v54, %v4097_v28 }
 0x11d   :  { %v2948_v29 = vpack.c.bf16 %v1285_v23, %v1283_v53  ;;  %v1097_v16 = vpop.f32.mrf.mxu0  ;;  %1762 = vmatprep.mubr.bf16.mxu1 %v4436_v26  ;;  %v1289_v8 = vadd.f32 %v1288_v40, %v4103_v47 }
 0x11e   :  { %2209 = vst [vmem:[#allocation8 + $0x10] sm:$0xff] %v2947_v55  ;;  %v1098_v10 = vadd.f32 %v1097_v16, %v4100_v62  ;;  %v1290_v63 = vpop.f32.mrf.mxu1 }
 0x11f   :  { %2210 = vst [vmem:[#allocation8 + $0x18] sm:$0xff] %v2948_v29  ;;  %v1291_v1 = vadd.f32 %v1290_v63, %v4107_v20  ;;  %v1099_v2 = vpop.f32.mrf.mxu0 }
 0x120   :  { %v2949_v4 = vpack.c.bf16 %v1098_v10, %v1096_v59  ;;  %v1292_v35 = vpop.f32.mrf.mxu1  ;;  %v1100_v44 = vadd.f32 %v1099_v2, %v4097_v28 }
 0x121   :  { %v2950_v17 = vpack.c.bf16 %v1291_v1, %v1289_v8  ;;  %v1101_v42 = vpop.f32.mrf.mxu0  ;;  %v1293_v60 = vadd.f32 %v1292_v35, %v4103_v47 }
 0x122   :  { %2211 = vst [vmem:[#allocation8 + $0x20] sm:$0xff] %v2949_v4  ;;  %v1102_v30 = vadd.f32 %v1101_v42, %v4100_v62  ;;  %v1294_v14 = vpop.f32.mrf.mxu1 }
 0x123   :  { %2212 = vst [vmem:[#allocation8 + $0x28] sm:$0xff] %v2950_v17  ;;  %v1295_v9 = vadd.f32 %v1294_v14, %v4107_v20  ;;  %v1105_v45 = vpop.f32.mrf.mxu0  ;;  %1570 = vmatmul.mubr.bf16.gmra.mxu0 %v3902_v15 }
 0x124   :  { %v2951_v22 = vpack.c.bf16 %v1102_v30, %v1100_v44  ;;  %v1298_v18 = vpop.f32.mrf.mxu1  ;;  %1763 = vmatmul.mubr.bf16.gmra.mxu1 %v3902_v15  ;;  %1579 = vmatprep.mubr.bf16.mxu0 %v4436_v26  ;;  %v1106_v6 = vadd.f32 %v1105_v45, %v4097_v28 }
 0x125   :  { %v2952_v41 = vpack.c.bf16 %v1295_v9, %v1293_v60  ;;  %v1107_v5 = vpop.f32.mrf.mxu0  ;;  %1772 = vmatprep.mubr.bf16.mxu1 %v4436_v26  ;;  %v1299_v33 = vadd.f32 %v1298_v18, %v4103_v47 }
 0x126   :  { %2213 = vst [vmem:[#allocation8 + $0x30] sm:$0xff] %v2951_v22  ;;  %v1108_v24 = vadd.f32 %v1107_v5, %v4100_v62  ;;  %v1300_v38 = vpop.f32.mrf.mxu1 }
 0x127   :  { %2214 = vst [vmem:[#allocation8 + $0x38] sm:$0xff] %v2952_v41  ;;  %v1301_v39 = vadd.f32 %v1300_v38, %v4107_v20  ;;  %v1109_v48 = vpop.f32.mrf.mxu0 }
 0x128   :  { %v2953_v58 = vpack.c.bf16 %v1108_v24, %v1106_v6  ;;  %v1302_v15 = vpop.f32.mrf.mxu1  ;;  %v1110_v34 = vadd.f32 %v1109_v48, %v4097_v28 }
 0x129   :  { %v2954_v57 = vpack.c.bf16 %v1301_v39, %v1299_v33  ;;  %v1111_v0 = vpop.f32.mrf.mxu0  ;;  %v1303_v46 = vadd.f32 %v1302_v15, %v4103_v47 }
 0x12a   :  { %2215 = vst [vmem:[#allocation8 + $0x40] sm:$0xff] %v2953_v58  ;;  %v1112_v21 = vadd.f32 %v1111_v0, %v4100_v62  ;;  %v1304_v36 = vpop.f32.mrf.mxu1 }
 0x12b   :  { %2216 = vst [vmem:[#allocation8 + $0x48] sm:$0xff] %v2954_v57  ;;  %v1305_v32 = vadd.f32 %v1304_v36, %v4107_v20  ;;  %v1115_v12 = vpop.f32.mrf.mxu0  ;;  %1580 = vmatmul.mubr.bf16.gmra.mxu0 %v3949_v31 }
 0x12c   :  { %v2955_v11 = vpack.c.bf16 %v1112_v21, %v1110_v34  ;;  %v1308_v13 = vpop.f32.mrf.mxu1  ;;  %1773 = vmatmul.mubr.bf16.gmra.mxu1 %v3949_v31  ;;  %1589 = vmatprep.mubr.bf16.mxu0 %v4436_v26  ;;  %v1116_v25 = vadd.f32 %v1115_v12, %v4097_v28 }
 0x12d   :  { %v2956_v49 = vpack.c.bf16 %v1305_v32, %v1303_v46  ;;  %v1117_v3 = vpop.f32.mrf.mxu0  ;;  %1782 = vmatprep.mubr.bf16.mxu1 %v4436_v26  ;;  %v1309_v7 = vadd.f32 %v1308_v13, %v4103_v47 }
 0x12e   :  { %2217 = vst [vmem:[#allocation8 + $0x50] sm:$0xff] %v2955_v11  ;;  %v1118_v51 = vadd.f32 %v1117_v3, %v4100_v62  ;;  %v1310_v19 = vpop.f32.mrf.mxu1 }
 0x12f   :  { %2218 = vst [vmem:[#allocation8 + $0x58] sm:$0xff] %v2956_v49  ;;  %v1311_v43 = vadd.f32 %v1310_v19, %v4107_v20  ;;  %v1119_v53 = vpop.f32.mrf.mxu0 }
 0x130   :  { %v2957_v23 = vpack.c.bf16 %v1118_v51, %v1116_v25  ;;  %v1312_v31 = vpop.f32.mrf.mxu1  ;;  %v1120_v40 = vadd.f32 %v1119_v53, %v4097_v28 }
 0x131   :  { %v2958_v54 = vpack.c.bf16 %v1311_v43, %v1309_v7  ;;  %v1121_v55 = vpop.f32.mrf.mxu0  ;;  %v1313_v59 = vadd.f32 %v1312_v31, %v4103_v47 }
 0x132   :  { %2219 = vst [vmem:[#allocation8 + $0x60] sm:$0xff] %v2957_v23  ;;  %v1122_v29 = vadd.f32 %v1121_v55, %v4100_v62  ;;  %v1314_v16 = vpop.f32.mrf.mxu1 }
 0x133   :  { %2220 = vst [vmem:[#allocation8 + $0x68] sm:$0xff] %v2958_v54  ;;  %v1315_v10 = vadd.f32 %v1314_v16, %v4107_v20  ;;  %v1125_v63 = vpop.f32.mrf.mxu0  ;;  %1590 = vmatmul.mubr.bf16.gmra.mxu0 %v3963_v52 }
 0x134   :  { %v2959_v8 = vpack.c.bf16 %v1122_v29, %v1120_v40  ;;  %v1318_v1 = vpop.f32.mrf.mxu1  ;;  %1783 = vmatmul.mubr.bf16.gmra.mxu1 %v3963_v52  ;;  %1599 = vmatprep.mubr.bf16.mxu0 %v4436_v26  ;;  %v1126_v35 = vadd.f32 %v1125_v63, %v4097_v28 }
 0x135   :  { %v2960_v2 = vpack.c.bf16 %v1315_v10, %v1313_v59  ;;  %v1127_v4 = vpop.f32.mrf.mxu0  ;;  %1792 = vmatprep.mubr.bf16.mxu1 %v4436_v26  ;;  %v1319_v44 = vadd.f32 %v1318_v1, %v4103_v47 }
 0x136   :  { %2221 = vst [vmem:[#allocation8 + $0x70] sm:$0xff] %v2959_v8  ;;  %v1128_v17 = vadd.f32 %v1127_v4, %v4100_v62  ;;  %v1320_v42 = vpop.f32.mrf.mxu1 }
 0x137   :  { %2222 = vst [vmem:[#allocation8 + $0x78] sm:$0xff] %v2960_v2  ;;  %v1321_v30 = vadd.f32 %v1320_v42, %v4107_v20  ;;  %v1129_v14 = vpop.f32.mrf.mxu0 }
 0x138   :  { %v2961_v60 = vpack.c.bf16 %v1128_v17, %v1126_v35  ;;  %v1322_v52 = vpop.f32.mrf.mxu1  ;;  %v1130_v22 = vadd.f32 %v1129_v14, %v4097_v28 }
 0x139   :  { %v2962_v9 = vpack.c.bf16 %v1321_v30, %v1319_v44  ;;  %v1131_v45 = vpop.f32.mrf.mxu0  ;;  %v1323_v5 = vadd.f32 %v1322_v52, %v4103_v47 }
 0x13a   :  { %2223 = vst [vmem:[#allocation8 + $0x80] sm:$0xff] %v2961_v60  ;;  %v1132_v18 = vadd.f32 %v1131_v45, %v4100_v62  ;;  %v1324_v41 = vpop.f32.mrf.mxu1 }
 0x13b   :  { %2224 = vst [vmem:[#allocation8 + $0x88] sm:$0xff] %v2962_v9  ;;  %v1325_v6 = vadd.f32 %v1324_v41, %v4107_v20  ;;  %v1135_v24 = vpop.f32.mrf.mxu0  ;;  %1600 = vmatmul.mubr.bf16.gmra.mxu0 %v4012_v61 }
 0x13c   :  { %v2963_v38 = vpack.c.bf16 %v1132_v18, %v1130_v22  ;;  %v1328_v33 = vpop.f32.mrf.mxu1  ;;  %1793 = vmatmul.mubr.bf16.gmra.mxu1 %v4012_v61  ;;  %1609 = vmatprep.mubr.bf16.mxu0 %v4436_v26  ;;  %v1136_v58 = vadd.f32 %v1135_v24, %v4097_v28 }
 0x13d   :  { %v2964_v39 = vpack.c.bf16 %v1325_v6, %v1323_v5  ;;  %v1137_v48 = vpop.f32.mrf.mxu0  ;;  %1802 = vmatprep.mubr.bf16.mxu1 %v4436_v26  ;;  %v1329_v0 = vadd.f32 %v1328_v33, %v4103_v47 }
 0x13e   :  { %2225 = vst [vmem:[#allocation8 + $0x90] sm:$0xff] %v2963_v38  ;;  %v1138_v15 = vadd.f32 %v1137_v48, %v4100_v62  ;;  %v1330_v57 = vpop.f32.mrf.mxu1 }
 0x13f   :  { %2226 = vst [vmem:[#allocation8 + $0x98] sm:$0xff] %v2964_v39  ;;  %v1331_v34 = vadd.f32 %v1330_v57, %v4107_v20  ;;  %v1139_v21 = vpop.f32.mrf.mxu0 }
 0x140   :  { %v2965_v36 = vpack.c.bf16 %v1138_v15, %v1136_v58  ;;  %v1332_v61 = vpop.f32.mrf.mxu1  ;;  %v1140_v12 = vadd.f32 %v1139_v21, %v4097_v28 }
 0x141   :  { %v2966_v46 = vpack.c.bf16 %v1331_v34, %v1329_v0  ;;  %v1141_v32 = vpop.f32.mrf.mxu0  ;;  %v1333_v49 = vadd.f32 %v1332_v61, %v4103_v47 }
 0x142   :  { %2227 = vst [vmem:[#allocation8 + $0xa0] sm:$0xff] %v2965_v36  ;;  %v1142_v11 = vadd.f32 %v1141_v32, %v4100_v62  ;;  %v1334_v13 = vpop.f32.mrf.mxu1 }
 0x143   :  { %2228 = vst [vmem:[#allocation8 + $0xa8] sm:$0xff] %v2966_v46  ;;  %v1335_v3 = vadd.f32 %v1334_v13, %v4107_v20  ;;  %v1145_v25 = vpop.f32.mrf.mxu0  ;;  %1610 = vmatmul.mubr.bf16.gmra.mxu0 %v4038_v27 }
 0x144   :  { %v2967_v51 = vpack.c.bf16 %v1142_v11, %v1140_v12  ;;  %v1338_v19 = vpop.f32.mrf.mxu1  ;;  %1803 = vmatmul.mubr.bf16.gmra.mxu1 %v4038_v27  ;;  %1619 = vmatprep.mubr.bf16.mxu0 %v4436_v26  ;;  %v1146_v53 = vadd.f32 %v1145_v25, %v4097_v28 }
 0x145   :  { %v2968_v7 = vpack.c.bf16 %v1335_v3, %v1333_v49  ;;  %v1147_v43 = vpop.f32.mrf.mxu0  ;;  %1812 = vmatprep.mubr.bf16.mxu1 %v4436_v26  ;;  %v1339_v54 = vadd.f32 %v1338_v19, %v4103_v47 }
 0x146   :  { %2229 = vst [vmem:[#allocation8 + $0xb0] sm:$0xff] %v2967_v51  ;;  %v1148_v23 = vadd.f32 %v1147_v43, %v4100_v62  ;;  %v1340_v31 = vpop.f32.mrf.mxu1 }
 0x147   :  { %2230 = vst [vmem:[#allocation8 + $0xb8] sm:$0xff] %v2968_v7  ;;  %v1341_v55 = vadd.f32 %v1340_v31, %v4107_v20  ;;  %v1149_v40 = vpop.f32.mrf.mxu0 }
 0x148   :  { %v2969_v29 = vpack.c.bf16 %v1148_v23, %v1146_v53  ;;  %v1342_v27 = vpop.f32.mrf.mxu1  ;;  %v1150_v10 = vadd.f32 %v1149_v40, %v4097_v28 }
 0x149   :  { %v2970_v16 = vpack.c.bf16 %v1341_v55, %v1339_v54  ;;  %v1151_v59 = vpop.f32.mrf.mxu0  ;;  %v1343_v8 = vadd.f32 %v1342_v27, %v4103_v47 }
 0x14a   :  { %2231 = vst [vmem:[#allocation8 + $0xc0] sm:$0xff] %v2969_v29  ;;  %v1152_v26 = vadd.f32 %v1151_v59, %v4100_v62  ;;  %v1344_v63 = vpop.f32.mrf.mxu1 }
 0x14b   :  { %2232 = vst [vmem:[#allocation8 + $0xc8] sm:$0xff] %v2970_v16  ;;  %v1345_v1 = vadd.f32 %v1344_v63, %v4107_v20  ;;  %v1155_v2 = vpop.f32.mrf.mxu0  ;;  %1620 = vmatmul.mubr.bf16.gmra.mxu0 %v4050_v56 }
 0x14c   :  { %v2971_v4 = vpack.c.bf16 %v1152_v26, %v1150_v10  ;;  %v1348_v35 = vpop.f32.mrf.mxu1  ;;  %1813 = vmatmul.mubr.bf16.gmra.mxu1 %v4050_v56  ;;  %v1156_v44 = vadd.f32 %v1155_v2, %v4097_v28 }
 0x14d   :  { %v2972_v17 = vpack.c.bf16 %v1345_v1, %v1343_v8  ;;  %v1157_v42 = vpop.f32.mrf.mxu0  ;;  %v1349_v60 = vadd.f32 %v1348_v35, %v4103_v47 }
 0x14e   :  { %2233 = vst [vmem:[#allocation8 + $0xd0] sm:$0xff] %v2971_v4  ;;  %v1158_v30 = vadd.f32 %v1157_v42, %v4100_v62  ;;  %v1350_v14 = vpop.f32.mrf.mxu1 }
 0x14f   :  { %2234 = vst [vmem:[#allocation8 + $0xd8] sm:$0xff] %v2972_v17  ;;  %v1351_v52 = vadd.f32 %v1350_v14, %v4107_v20  ;;  %v1159_v9 = vpop.f32.mrf.mxu0 }
 0x150   :  { %v2973_v45 = vpack.c.bf16 %v1158_v30, %v1156_v44  ;;  %v1352_v22 = vpop.f32.mrf.mxu1  ;;  %v1160_v56 = vadd.f32 %v1159_v9, %v4097_v28 }
 0x151   :  { %v2974_v18 = vpack.c.bf16 %v1351_v52, %v1349_v60  ;;  %v1161_v41 = vpop.f32.mrf.mxu0  ;;  %v1353_v24 = vadd.f32 %v1352_v22, %v4103_v47 }
 0x152   :  { %2235 = vst [vmem:[#allocation8 + $0xe0] sm:$0xff] %v2973_v45  ;;  %v1162_v5 = vadd.f32 %v1161_v41, %v4100_v62  ;;  %v1354_v6 = vpop.f32.mrf.mxu1 }
 0x153   :  { %2236 = vst [vmem:[#allocation8 + $0xe8] sm:$0xff] %v2974_v18  ;;  %v1355_v38 = vadd.f32 %v1354_v6, %v4107_v20  ;;  %v1165_v33 = vpop.f32.mrf.mxu0 }
 0x154   :  { %v2975_v39 = vpack.c.bf16 %v1162_v5, %v1160_v56  ;;  %v1358_v48 = vpop.f32.mrf.mxu1  ;;  %v1166_v57 = vadd.f32 %v1165_v33, %v4097_v28 }
 0x155   :  { %v2976_v58 = vpack.c.bf16 %v1355_v38, %v1353_v24  ;;  %v1167_v15 = vpop.f32.mrf.mxu0  ;;  %v1359_v21 = vadd.f32 %v1358_v48, %v4103_v47 }
 0x156   :  { %2237 = vst [vmem:[#allocation8 + $0xf0] sm:$0xff] %v2975_v39  ;;  %v1168_v0 = vadd.f32 %v1167_v15, %v4100_v62  ;;  %v1360_v34 = vpop.f32.mrf.mxu1 }
 0x157   :  { %2238 = vst [vmem:[#allocation8 + $0xf8] sm:$0xff] %v2976_v58  ;;  %v1361_v36 = vadd.f32 %v1360_v34, %v4107_v20  ;;  %v1169_v61 = vpop.f32.mrf.mxu0 }
 0x158   :  { %v2977_v46 = vpack.c.bf16 %v1168_v0, %v1166_v57  ;;  %v1362_v32 = vpop.f32.mrf.mxu1  ;;  %v1170_v13 = vadd.f32 %v1169_v61, %v4097_v28 }
 0x159   :  { %v2978_v12 = vpack.c.bf16 %v1361_v36, %v1359_v21  ;;  %v1171_v11 = vpop.f32.mrf.mxu0  ;;  %v1363_v25 = vadd.f32 %v1362_v32, %v4103_v47 }
 0x15a   :  { %2239 = vst [vmem:[#allocation8 + $0x100] sm:$0xff] %v2977_v46  ;;  %v1172_v49 = vadd.f32 %v1171_v11, %v4100_v62  ;;  %v1364_v3 = vpop.f32.mrf.mxu1 }
 0x15b   :  { %2240 = vst [vmem:[#allocation8 + $0x108] sm:$0xff] %v2978_v12  ;;  %v1365_v51 = vadd.f32 %v1364_v3, %v4107_v20  ;;  %v1175_v19 = vpop.f32.mrf.mxu0 }
 0x15c   :  { %v2979_v7 = vpack.c.bf16 %v1172_v49, %v1170_v13  ;;  %v1368_v43 = vpop.f32.mrf.mxu1  ;;  %v1176_v31 = vadd.f32 %v1175_v19, %v4097_v28 }
 0x15d   :  { %v2980_v53 = vpack.c.bf16 %v1365_v51, %v1363_v25  ;;  %v1177_v23 = vpop.f32.mrf.mxu0  ;;  %v1369_v40 = vadd.f32 %v1368_v43, %v4103_v47 }
 0x15e   :  { %2241 = vst [vmem:[#allocation8 + $0x110] sm:$0xff] %v2979_v7  ;;  %v1178_v54 = vadd.f32 %v1177_v23, %v4100_v62  ;;  %v1370_v55 = vpop.f32.mrf.mxu1 }
 0x15f   :  { %2242 = vst [vmem:[#allocation8 + $0x118] sm:$0xff] %v2980_v53  ;;  %v1371_v29 = vadd.f32 %v1370_v55, %v4107_v20  ;;  %v1179_v27 = vpop.f32.mrf.mxu0 }
 0x160   :  { %v2981_v16 = vpack.c.bf16 %v1178_v54, %v1176_v31  ;;  %v1372_v59 = vpop.f32.mrf.mxu1  ;;  %v1180_v63 = vadd.f32 %v1179_v27, %v4097_v28 }
 0x161   :  { %v2982_v10 = vpack.c.bf16 %v1371_v29, %v1369_v40  ;;  %v1181_v26 = vpop.f32.mrf.mxu0  ;;  %v1373_v2 = vadd.f32 %v1372_v59, %v4103_v47 }
 0x162   :  { %2243 = vst [vmem:[#allocation8 + $0x120] sm:$0xff] %v2981_v16  ;;  %v1182_v8 = vadd.f32 %v1181_v26, %v4100_v62  ;;  %v1374_v1 = vpop.f32.mrf.mxu1 }
 0x163   :  { %2244 = vst [vmem:[#allocation8 + $0x128] sm:$0xff] %v2982_v10  ;;  %v1375_v4 = vadd.f32 %v1374_v1, %v4107_v20  ;;  %v1185_v35 = vpop.f32.mrf.mxu0 }
 0x164   :  { %v2983_v17 = vpack.c.bf16 %v1182_v8, %v1180_v63  ;;  %v1378_v42 = vpop.f32.mrf.mxu1  ;;  %v1186_v14 = vadd.f32 %v1185_v35, %v4097_v28 }
 0x165   :  { %v2984_v44 = vpack.c.bf16 %v1375_v4, %v1373_v2  ;;  %v1187_v30 = vpop.f32.mrf.mxu0  ;;  %v1379_v9 = vadd.f32 %v1378_v42, %v4103_v47 }
 0x166   :  { %2245 = vst [vmem:[#allocation8 + $0x130] sm:$0xff] %v2983_v17  ;;  %v1188_v60 = vadd.f32 %v1187_v30, %v4100_v62  ;;  %v1380_v52 = vpop.f32.mrf.mxu1 }
 0x167   :  { %2246 = vst [vmem:[#allocation8 + $0x138] sm:$0xff] %v2984_v44  ;;  %v1381_v45 = vadd.f32 %v1380_v52, %v4107_v20  ;;  %v1189_v22 = vpop.f32.mrf.mxu0 }
 0x168   :  { %v2985_v18 = vpack.c.bf16 %v1188_v60, %v1186_v14  ;;  %v1382_v41 = vpop.f32.mrf.mxu1  ;;  %v1190_v6 = vadd.f32 %v1189_v22, %v4097_v28 }
 0x169   :  { %v2986_v56 = vpack.c.bf16 %v1381_v45, %v1379_v9  ;;  %v1191_v5 = vpop.f32.mrf.mxu0  ;;  %v1383_v33 = vadd.f32 %v1382_v41, %v4103_v47 }
 0x16a   :  { %2247 = vst [vmem:[#allocation8 + $0x140] sm:$0xff] %v2985_v18  ;;  %v1192_v24 = vadd.f32 %v1191_v5, %v4100_v62  ;;  %v1384_v38 = vpop.f32.mrf.mxu1 }
 0x16b   :  { %2248 = vst [vmem:[#allocation8 + $0x148] sm:$0xff] %v2986_v56  ;;  %v1385_v39 = vadd.f32 %v1384_v38, %v4107_v20  ;;  %v1195_v48 = vpop.f32.mrf.mxu0 }
 0x16c   :  { %v2987_v58 = vpack.c.bf16 %v1192_v24, %v1190_v6  ;;  %v1388_v15 = vpop.f32.mrf.mxu1  ;;  %v1196_v34 = vadd.f32 %v1195_v48, %v4097_v28 }
 0x16d   :  { %v2988_v57 = vpack.c.bf16 %v1385_v39, %v1383_v33  ;;  %v1197_v0 = vpop.f32.mrf.mxu0  ;;  %v1389_v61 = vadd.f32 %v1388_v15, %v4103_v47 }
 0x16e   :  { %2249 = vst [vmem:[#allocation8 + $0x150] sm:$0xff] %v2987_v58  ;;  %v1198_v21 = vadd.f32 %v1197_v0, %v4100_v62  ;;  %v1390_v36 = vpop.f32.mrf.mxu1 }
 0x16f   :  { %2250 = vst [vmem:[#allocation8 + $0x158] sm:$0xff] %v2988_v57  ;;  %v1391_v46 = vadd.f32 %v1390_v36, %v4107_v20  ;;  %v1199_v32 = vpop.f32.mrf.mxu0 }
 0x170   :  { %v2989_v12 = vpack.c.bf16 %v1198_v21, %v1196_v34  ;;  %v1392_v11 = vpop.f32.mrf.mxu1  ;;  %v1200_v3 = vadd.f32 %v1199_v32, %v4097_v28 }
 0x171   :  { %v2990_v13 = vpack.c.bf16 %v1391_v46, %v1389_v61  ;;  %v1201_v49 = vpop.f32.mrf.mxu0  ;;  %v1393_v19 = vadd.f32 %v1392_v11, %v4103_v47 }
 0x172   :  { %2251 = vst [vmem:[#allocation8 + $0x160] sm:$0xff] %v2989_v12  ;;  %v1202_v25 = vadd.f32 %v1201_v49, %v4100_v62  ;;  %v1394_v51 = vpop.f32.mrf.mxu1 }
 0x173   :  { %2252 = vst [vmem:[#allocation8 + $0x168] sm:$0xff] %v2990_v13  ;;  %v1395_v7 = vadd.f32 %v1394_v51, %v4107_v20  ;;  %v1205_v43 = vpop.f32.mrf.mxu0 }
 0x174   :  { %v2991_v53 = vpack.c.bf16 %v1202_v25, %v1200_v3  ;;  %v1398_v23 = vpop.f32.mrf.mxu1  ;;  %v1206_v55 = vadd.f32 %v1205_v43, %v4097_v28 }
 0x175   :  { %v2992_v31 = vpack.c.bf16 %v1395_v7, %v1393_v19  ;;  %v1207_v54 = vpop.f32.mrf.mxu0  ;;  %v1399_v27 = vadd.f32 %v1398_v23, %v4103_v47 }
 0x176   :  { %2253 = vst [vmem:[#allocation8 + $0x170] sm:$0xff] %v2991_v53  ;;  %v1208_v40 = vadd.f32 %v1207_v54, %v4100_v62  ;;  %v1400_v29 = vpop.f32.mrf.mxu1 }
 0x177   :  { %2254 = vst [vmem:[#allocation8 + $0x178] sm:$0xff] %v2992_v31  ;;  %v1401_v16 = vadd.f32 %v1400_v29, %v4107_v20  ;;  %v1209_v59 = vpop.f32.mrf.mxu0 }
 0x178   :  { %v2993_v10 = vpack.c.bf16 %v1208_v40, %v1206_v55  ;;  %v1402_v26 = vpop.f32.mrf.mxu1  ;;  %v1210_v1 = vadd.f32 %v1209_v59, %v4097_v28  ;;  %v709_v59 = vsub.s32 4, %v4084_v37 }
 0x179   :  { %v2994_v63 = vpack.c.bf16 %v1401_v16, %v1399_v27  ;;  %v1211_v8 = vpop.f32.mrf.mxu0  ;;  %v1403_v35 = vadd.f32 %v1402_v26, %v4103_v47 }
 0x17a   :  { %2255 = vst [vmem:[#allocation8 + $0x180] sm:$0xff] %v2993_v10  ;;  %v1212_v2 = vadd.f32 %v1211_v8, %v4100_v62  ;;  %v1404_v4 = vpop.f32.mrf.mxu1  ;;  %v713_v10 = vsub.s32 5, %v4084_v37 }
 0x17b   :  { %2256 = vst [vmem:[#allocation8 + $0x188] sm:$0xff] %v2994_v63  ;;  %v1405_v17 = vadd.f32 %v1404_v4, %v4107_v20  ;;  %v1215_v42 = vpop.f32.mrf.mxu0 }
 0x17c   :  { %v2995_v44 = vpack.c.bf16 %v1212_v2, %v1210_v1  ;;  %v1408_v30 = vpop.f32.mrf.mxu1  ;;  %v1216_v52 = vadd.f32 %v1215_v42, %v4097_v28  ;;  %v717_v1 = vsub.s32 6, %v4084_v37  ;;  %v721_v2 = vsub.s32 7, %v4084_v37 }
 0x17d   :  { %v2996_v14 = vpack.c.bf16 %v1405_v17, %v1403_v35  ;;  %v1217_v60 = vpop.f32.mrf.mxu0  ;;  %v1409_v22 = vadd.f32 %v1408_v30, %v4103_v47 }
 0x17e   :  { %2257 = vst [vmem:[#allocation8 + $0x190] sm:$0xff] %v2995_v44  ;;  %v1218_v9 = vadd.f32 %v1217_v60, %v4100_v62  ;;  %v1410_v45 = vpop.f32.mrf.mxu1  ;;  %v4269_v60 = vrot.slane %v4092_v50, %v709_v59 }
 0x17f   :  { %2258 = vst [vmem:[#allocation8 + $0x198] sm:$0xff] %v2996_v14  ;;  %v1411_v18 = vadd.f32 %v1410_v45, %v4107_v20  ;;  %v1219_v41 = vpop.f32.mrf.mxu0 }
 0x180   :  { %v2997_v56 = vpack.c.bf16 %v1218_v9, %v1216_v52  ;;  %v1412_v5 = vpop.f32.mrf.mxu1  ;;  %v1220_v38 = vadd.f32 %v1219_v41, %v4097_v28  ;;  %v4272_v52 = vrot.slane %v4092_v50, %v713_v10 }
 0x181   :  { %v2998_v6 = vpack.c.bf16 %v1411_v18, %v1409_v22  ;;  %v1221_v24 = vpop.f32.mrf.mxu0  ;;  %v1413_v48 = vadd.f32 %v1412_v5, %v4103_v47  ;;  %v4277_v22 = vrot.slane %v4092_v50, %v717_v1 }
 0x182   :  { %2259 = vst [vmem:[#allocation8 + $0x1a0] sm:$0xff] %v2997_v56  ;;  %v1222_v33 = vadd.f32 %v1221_v24, %v4100_v62  ;;  %v1414_v39 = vpop.f32.mrf.mxu1 }
 0x183   :  { %2260 = vst [vmem:[#allocation8 + $0x1a8] sm:$0xff] %v2998_v6  ;;  %v1415_v58 = vadd.f32 %v1414_v39, %v4107_v20  ;;  %v1225_v15 = vpop.f32.mrf.mxu0 }
 0x184   :  { %v2999_v57 = vpack.c.bf16 %v1222_v33, %v1220_v38  ;;  %v1418_v0 = vpop.f32.mrf.mxu1  ;;  %v1226_v36 = vadd.f32 %v1225_v15, %v4097_v28 }
 0x185   :  { %v3000_v34 = vpack.c.bf16 %v1415_v58, %v1413_v48  ;;  %v1227_v21 = vpop.f32.mrf.mxu0  ;;  %v1419_v32 = vadd.f32 %v1418_v0, %v4103_v47 }
 0x186   :  { %2261 = vst [vmem:[#allocation8 + $0x1b0] sm:$0xff] %v2999_v57  ;;  %v1228_v61 = vadd.f32 %v1227_v21, %v4100_v62  ;;  %v1420_v46 = vpop.f32.mrf.mxu1 }
 0x187   :  { %2262 = vst [vmem:[#allocation8 + $0x1b8] sm:$0xff] %v3000_v34  ;;  %v1421_v12 = vadd.f32 %v1420_v46, %v4107_v20  ;;  %v1229_v11 = vpop.f32.mrf.mxu0 }
 0x188   :  { %v3001_v13 = vpack.c.bf16 %v1228_v61, %v1226_v36  ;;  %v1422_v49 = vpop.f32.mrf.mxu1  ;;  %v1230_v51 = vadd.f32 %v1229_v11, %v4097_v28 }
 0x189   :  { %v3002_v3 = vpack.c.bf16 %v1421_v12, %v1419_v32  ;;  %v1231_v25 = vpop.f32.mrf.mxu0  ;;  %v1423_v43 = vadd.f32 %v1422_v49, %v4103_v47 }
 0x18a   :  { %2263 = vst [vmem:[#allocation8 + $0x1c0] sm:$0xff] %v3001_v13  ;;  %v1232_v19 = vadd.f32 %v1231_v25, %v4100_v62  ;;  %v1424_v7 = vpop.f32.mrf.mxu1 }
 0x18b   :  { %2264 = vst [vmem:[#allocation8 + $0x1c8] sm:$0xff] %v3002_v3  ;;  %v1425_v53 = vadd.f32 %v1424_v7, %v4107_v20  ;;  %v1235_v23 = vpop.f32.mrf.mxu0 }
 0x18c   :  { %v3003_v31 = vpack.c.bf16 %v1232_v19, %v1230_v51  ;;  %v1428_v54 = vpop.f32.mrf.mxu1  ;;  %v1236_v29 = vadd.f32 %v1235_v23, %v4097_v28 }
 0x18d   :  { %v3004_v55 = vpack.c.bf16 %v1425_v53, %v1423_v43  ;;  %v1237_v40 = vpop.f32.mrf.mxu0  ;;  %v1429_v26 = vadd.f32 %v1428_v54, %v4103_v47 }
 0x18e   :  { %2265 = vst [vmem:[#allocation8 + $0x1d0] sm:$0xff] %v3003_v31  ;;  %v1238_v27 = vadd.f32 %v1237_v40, %v4100_v62  ;;  %v1430_v16 = vpop.f32.mrf.mxu1 }
 0x18f   :  { %2266 = vst [vmem:[#allocation8 + $0x1d8] sm:$0xff] %v3004_v55  ;;  %v1431_v63 = vadd.f32 %v1430_v16, %v4107_v20  ;;  %v1239_v8 = vpop.f32.mrf.mxu0 }
 0x190   :  { %v3005_v4 = vpack.c.bf16 %v1238_v27, %v1236_v29  ;;  %v1432_v35 = vpop.f32.mrf.mxu1  ;;  %v1240_v44 = vadd.f32 %v1239_v8, %v4097_v28  ;;  %v4280_v28 = vrot.slane %v4092_v50, %v721_v2 }
 0x191   :  { %v3006_v17 = vpack.c.bf16 %v1431_v63, %v1429_v26  ;;  %v1241_v42 = vpop.f32.mrf.mxu0  ;;  %v1433_v9 = vadd.f32 %v1432_v35, %v4103_v47 }
 0x192   :  { %2267 = vst [vmem:[#allocation8 + $0x1e0] sm:$0xff] %v3005_v4  ;;  %v1242_v30 = vadd.f32 %v1241_v42, %v4100_v62  ;;  %v1434_v14 = vpop.f32.mrf.mxu1 }
 0x193   :  { %2268 = vst [vmem:[#allocation8 + $0x1e8] sm:$0xff] %v3006_v17  ;;  %v1435_v37 = vadd.f32 %v1434_v14, %v4107_v20  ;;  %v1471_v45 = vpop.f32.mrf.mxu0 }
 0x194   :  { %v3007_v62 = vpack.c.bf16 %v1242_v30, %v1240_v44  ;;  %v1664_v18 = vpop.f32.mrf.mxu1  ;;  %v1472_v5 = vadd.f32 %v1471_v45, %v4269_v60 }
 0x195   :  { %v3008_v41 = vpack.c.bf16 %v1435_v37, %v1433_v9  ;;  %v1473_v56 = vpop.f32.mrf.mxu0  ;;  %v1665_v47 = vadd.f32 %v1664_v18, %v4277_v22 }
 0x196   :  { %2269 = vst [vmem:[#allocation8 + $0x1f0] sm:$0xff] %v3007_v62  ;;  %v1474_v6 = vadd.f32 %v1473_v56, %v4272_v52  ;;  %v1666_v24 = vpop.f32.mrf.mxu1 }
 0x197   :  { %2270 = vst [vmem:[#allocation8 + $0x1f8] sm:$0xff] %v3008_v41  ;;  %v1667_v20 = vadd.f32 %v1666_v24, %v4280_v28  ;;  %v1475_v38 = vpop.f32.mrf.mxu0 }
 0x198   :  { %v3009_v50 = vpack.c.bf16 %v1474_v6, %v1472_v5  ;;  %v1668_v33 = vpop.f32.mrf.mxu1 }
 0x199   :  { %v3010_v39 = vpack.c.bf16 %v1667_v20, %v1665_v47  ;;  %v1477_v48 = vpop.f32.mrf.mxu0 }
 0x19a   :  { %3156 = shalt.err (!%p3153_p5)
}
 0x19b   :  { %s3202_s8 = smov 256   ;;  %s3203_s9 = smov 16   ;;  %2655 = vst [vmem:[#allocation9] sm:$0xff] %v3009_v50  ;;  %v1476_v58 = vadd.f32 %v1475_v38, %v4269_v60  ;;  %v1478_v15 = vadd.f32 %v1477_v48, %v4272_v52  ;;  %v1670_v57 = vpop.f32.mrf.mxu1  ;;  %2656 = vst [vmem:[#allocation9 + $0x8] sm:$0xff] %v3010_v39  ;;  %v1669_v0 = vadd.f32 %v1668_v33, %v4277_v22  ;;  %v1481_v21 = vpop.f32.mrf.mxu0 }
 0x19c   :  { %2730 = dma.vmem_to_hbm [thread:$0]  %s2725_s2, 8192, %s4425_s3, [#allocation4], %s3202_s8, %s3202_s8, %s3203_s9   ;;  %v1671_v34 = vadd.f32 %v1670_v57, %v4280_v28  ;;  %v1482_v12 = vadd.f32 %v1481_v21, %v4269_v60 }
 0x19d   :  { %v3011_v36 = vpack.c.bf16 %v1478_v15, %v1476_v58  ;;  %v1674_v61 = vpop.f32.mrf.mxu1  ;;  %v1483_v32 = vpop.f32.mrf.mxu0  ;;  %s3204_s3 = smov [#allocation9]  }
 0x19e   :  { %v3012_v46 = vpack.c.bf16 %v1671_v34, %v1669_v0  ;;  %v1484_v11 = vadd.f32 %v1483_v32, %v4272_v52  ;;  %v1675_v49 = vadd.f32 %v1674_v61, %v4277_v22  ;;  %s2736_s12 = sshll.u32 %s3204_s3, 4  ;;  %s2737_s12 = int_to_ptr.vmem [resolvable:$true] %s2736_s12 }
 0x19f   :  { %2657 = vst [vmem:[#allocation9 + $0x10] sm:$0xff] %v3011_v36  ;;  %v1676_v13 = vpop.f32.mrf.mxu1  ;;  %v1485_v25 = vpop.f32.mrf.mxu0  ;;  %s3165_s13 = scalar_lea.vmem %s2737_s12, 8192  ;;  %p3170_p7 = scmp.lt.s32.totalorder %s2737_s12, %s2737_s12 }
 0x1a0   :  { %2658 = vst [vmem:[#allocation9 + $0x18] sm:$0xff] %v3012_v46  ;;  %v1677_v3 = vadd.f32 %v1676_v13, %v4280_v28  ;;  %v3013_v51 = vpack.c.bf16 %v1484_v11, %v1482_v12  ;;  %v1486_v53 = vadd.f32 %v1485_v25, %v4269_v60  ;;  %p3166_p6 = scmp.ne.s32.totalorder %s2737_s12, %s3165_s13  ;;  %p3171_p8 = scmp.lt.s32.totalorder %s3165_s13, %s3165_s13 }
 0x1a1   :  { %v1678_v19 = vpop.f32.mrf.mxu1  ;;  %v1487_v43 = vpop.f32.mrf.mxu0 }
 0x1a2   :  { %v3014_v7 = vpack.c.bf16 %v1677_v3, %v1675_v49  ;;  %2659 = vst [vmem:[#allocation9 + $0x20] sm:$0xff] %v3013_v51  ;;  %v1488_v23 = vadd.f32 %v1487_v43, %v4272_v52  ;;  %v1679_v54 = vadd.f32 %v1678_v19, %v4277_v22  ;;  %p3172_p9 = por %p3171_p8, %p3170_p7 }
 0x1a3   :  { %v1680_v31 = vpop.f32.mrf.mxu1  ;;  %v1491_v40 = vpop.f32.mrf.mxu0 }
 0x1a4   :  { %2660 = vst [vmem:[#allocation9 + $0x28] sm:$0xff] %v3014_v7  ;;  %v1681_v55 = vadd.f32 %v1680_v31, %v4280_v28  ;;  %v3015_v29 = vpack.c.bf16 %v1488_v23, %v1486_v53  ;;  %v1492_v10 = vadd.f32 %v1491_v40, %v4269_v60  ;;  %p3173_p10 = pnand %p3172_p9, %p3166_p6 }
 0x1a5   :  { %v1684_v27 = vpop.f32.mrf.mxu1  ;;  %v1493_v59 = vpop.f32.mrf.mxu0 }
 0x1a6   :  { %v3016_v16 = vpack.c.bf16 %v1681_v55, %v1679_v54  ;;  %2661 = vst [vmem:[#allocation9 + $0x30] sm:$0xff] %v3015_v29  ;;  %v1494_v26 = vadd.f32 %v1493_v59, %v4272_v52  ;;  %v1685_v8 = vadd.f32 %v1684_v27, %v4277_v22 }
 0x1a7   :  { %v1686_v63 = vpop.f32.mrf.mxu1  ;;  %v1495_v2 = vpop.f32.mrf.mxu0 }
 0x1a8   :  { %2662 = vst [vmem:[#allocation9 + $0x38] sm:$0xff] %v3016_v16  ;;  %v1687_v1 = vadd.f32 %v1686_v63, %v4280_v28  ;;  %v3017_v4 = vpack.c.bf16 %v1494_v26, %v1492_v10  ;;  %v1496_v44 = vadd.f32 %v1495_v2, %v4269_v60 }
 0x1a9   :  { %v1688_v35 = vpop.f32.mrf.mxu1  ;;  %v1497_v42 = vpop.f32.mrf.mxu0 }
 0x1aa   :  { %v3018_v17 = vpack.c.bf16 %v1687_v1, %v1685_v8  ;;  %2663 = vst [vmem:[#allocation9 + $0x40] sm:$0xff] %v3017_v4  ;;  %v1498_v30 = vadd.f32 %v1497_v42, %v4272_v52  ;;  %v1689_v9 = vadd.f32 %v1688_v35, %v4277_v22 }
 0x1ab   :  { %v1690_v14 = vpop.f32.mrf.mxu1  ;;  %v1501_v45 = vpop.f32.mrf.mxu0 }
 0x1ac   :  { %2664 = vst [vmem:[#allocation9 + $0x48] sm:$0xff] %v3018_v17  ;;  %v1691_v37 = vadd.f32 %v1690_v14, %v4280_v28  ;;  %v3019_v62 = vpack.c.bf16 %v1498_v30, %v1496_v44  ;;  %v1502_v5 = vadd.f32 %v1501_v45, %v4269_v60 }
 0x1ad   :  { %v1694_v18 = vpop.f32.mrf.mxu1  ;;  %v1503_v56 = vpop.f32.mrf.mxu0 }
 0x1ae   :  { %v3020_v41 = vpack.c.bf16 %v1691_v37, %v1689_v9  ;;  %2665 = vst [vmem:[#allocation9 + $0x50] sm:$0xff] %v3019_v62  ;;  %v1504_v6 = vadd.f32 %v1503_v56, %v4272_v52  ;;  %v1695_v47 = vadd.f32 %v1694_v18, %v4277_v22 }
 0x1af   :  { %v1696_v24 = vpop.f32.mrf.mxu1  ;;  %v1505_v38 = vpop.f32.mrf.mxu0 }
 0x1b0   :  { %2666 = vst [vmem:[#allocation9 + $0x58] sm:$0xff] %v3020_v41  ;;  %v1697_v20 = vadd.f32 %v1696_v24, %v4280_v28  ;;  %v3021_v50 = vpack.c.bf16 %v1504_v6, %v1502_v5  ;;  %v1506_v58 = vadd.f32 %v1505_v38, %v4269_v60 }
 0x1b1   :  { %v1698_v33 = vpop.f32.mrf.mxu1  ;;  %v1507_v48 = vpop.f32.mrf.mxu0 }
 0x1b2   :  { %v3022_v39 = vpack.c.bf16 %v1697_v20, %v1695_v47  ;;  %2667 = vst [vmem:[#allocation9 + $0x60] sm:$0xff] %v3021_v50  ;;  %v1508_v15 = vadd.f32 %v1507_v48, %v4272_v52  ;;  %v1699_v0 = vadd.f32 %v1698_v33, %v4277_v22 }
 0x1b3   :  { %v1700_v57 = vpop.f32.mrf.mxu1  ;;  %v1511_v21 = vpop.f32.mrf.mxu0 }
 0x1b4   :  { %2668 = vst [vmem:[#allocation9 + $0x68] sm:$0xff] %v3022_v39  ;;  %v1701_v34 = vadd.f32 %v1700_v57, %v4280_v28  ;;  %v3023_v36 = vpack.c.bf16 %v1508_v15, %v1506_v58  ;;  %v1512_v12 = vadd.f32 %v1511_v21, %v4269_v60 }
 0x1b5   :  { %v1704_v61 = vpop.f32.mrf.mxu1  ;;  %v1513_v32 = vpop.f32.mrf.mxu0 }
 0x1b6   :  { %v3024_v46 = vpack.c.bf16 %v1701_v34, %v1699_v0  ;;  %2669 = vst [vmem:[#allocation9 + $0x70] sm:$0xff] %v3023_v36  ;;  %v1514_v11 = vadd.f32 %v1513_v32, %v4272_v52  ;;  %v1705_v49 = vadd.f32 %v1704_v61, %v4277_v22 }
 0x1b7   :  { %v1706_v13 = vpop.f32.mrf.mxu1  ;;  %v1515_v25 = vpop.f32.mrf.mxu0 }
 0x1b8   :  { %2670 = vst [vmem:[#allocation9 + $0x78] sm:$0xff] %v3024_v46  ;;  %v1707_v3 = vadd.f32 %v1706_v13, %v4280_v28  ;;  %v3025_v51 = vpack.c.bf16 %v1514_v11, %v1512_v12  ;;  %v1516_v53 = vadd.f32 %v1515_v25, %v4269_v60 }
 0x1b9   :  { %v1708_v19 = vpop.f32.mrf.mxu1  ;;  %v1517_v43 = vpop.f32.mrf.mxu0 }
 0x1ba   :  { %v3026_v7 = vpack.c.bf16 %v1707_v3, %v1705_v49  ;;  %2671 = vst [vmem:[#allocation9 + $0x80] sm:$0xff] %v3025_v51  ;;  %v1518_v23 = vadd.f32 %v1517_v43, %v4272_v52  ;;  %v1709_v54 = vadd.f32 %v1708_v19, %v4277_v22 }
 0x1bb   :  { %v1710_v31 = vpop.f32.mrf.mxu1  ;;  %v1521_v40 = vpop.f32.mrf.mxu0 }
 0x1bc   :  { %2672 = vst [vmem:[#allocation9 + $0x88] sm:$0xff] %v3026_v7  ;;  %v1711_v55 = vadd.f32 %v1710_v31, %v4280_v28  ;;  %v3027_v29 = vpack.c.bf16 %v1518_v23, %v1516_v53  ;;  %v1522_v10 = vadd.f32 %v1521_v40, %v4269_v60 }
 0x1bd   :  { %v1714_v27 = vpop.f32.mrf.mxu1  ;;  %v1523_v59 = vpop.f32.mrf.mxu0 }
 0x1be   :  { %v3028_v16 = vpack.c.bf16 %v1711_v55, %v1709_v54  ;;  %2673 = vst [vmem:[#allocation9 + $0x90] sm:$0xff] %v3027_v29  ;;  %v1524_v26 = vadd.f32 %v1523_v59, %v4272_v52  ;;  %v1715_v8 = vadd.f32 %v1714_v27, %v4277_v22 }
 0x1bf   :  { %v1716_v63 = vpop.f32.mrf.mxu1  ;;  %v1525_v2 = vpop.f32.mrf.mxu0 }
 0x1c0   :  { %2674 = vst [vmem:[#allocation9 + $0x98] sm:$0xff] %v3028_v16  ;;  %v1717_v1 = vadd.f32 %v1716_v63, %v4280_v28  ;;  %v3029_v4 = vpack.c.bf16 %v1524_v26, %v1522_v10  ;;  %v1526_v44 = vadd.f32 %v1525_v2, %v4269_v60 }
 0x1c1   :  { %v1718_v35 = vpop.f32.mrf.mxu1  ;;  %v1527_v42 = vpop.f32.mrf.mxu0 }
 0x1c2   :  { %v3030_v17 = vpack.c.bf16 %v1717_v1, %v1715_v8  ;;  %2675 = vst [vmem:[#allocation9 + $0xa0] sm:$0xff] %v3029_v4  ;;  %v1528_v30 = vadd.f32 %v1527_v42, %v4272_v52  ;;  %v1719_v9 = vadd.f32 %v1718_v35, %v4277_v22 }
 0x1c3   :  { %v1720_v14 = vpop.f32.mrf.mxu1  ;;  %v1531_v45 = vpop.f32.mrf.mxu0 }
 0x1c4   :  { %2676 = vst [vmem:[#allocation9 + $0xa8] sm:$0xff] %v3030_v17  ;;  %v1721_v37 = vadd.f32 %v1720_v14, %v4280_v28  ;;  %v3031_v62 = vpack.c.bf16 %v1528_v30, %v1526_v44  ;;  %v1532_v5 = vadd.f32 %v1531_v45, %v4269_v60 }
 0x1c5   :  { %v1724_v18 = vpop.f32.mrf.mxu1  ;;  %v1533_v56 = vpop.f32.mrf.mxu0 }
 0x1c6   :  { %v3032_v41 = vpack.c.bf16 %v1721_v37, %v1719_v9  ;;  %2677 = vst [vmem:[#allocation9 + $0xb0] sm:$0xff] %v3031_v62  ;;  %v1534_v6 = vadd.f32 %v1533_v56, %v4272_v52  ;;  %v1725_v47 = vadd.f32 %v1724_v18, %v4277_v22 }
 0x1c7   :  { %v1726_v24 = vpop.f32.mrf.mxu1  ;;  %v1535_v38 = vpop.f32.mrf.mxu0 }
 0x1c8   :  { %2678 = vst [vmem:[#allocation9 + $0xb8] sm:$0xff] %v3032_v41  ;;  %v1727_v20 = vadd.f32 %v1726_v24, %v4280_v28  ;;  %v3033_v50 = vpack.c.bf16 %v1534_v6, %v1532_v5  ;;  %v1536_v58 = vadd.f32 %v1535_v38, %v4269_v60 }
 0x1c9   :  { %v1728_v33 = vpop.f32.mrf.mxu1  ;;  %v1537_v48 = vpop.f32.mrf.mxu0 }
 0x1ca   :  { %v3034_v39 = vpack.c.bf16 %v1727_v20, %v1725_v47  ;;  %2679 = vst [vmem:[#allocation9 + $0xc0] sm:$0xff] %v3033_v50  ;;  %v1538_v15 = vadd.f32 %v1537_v48, %v4272_v52  ;;  %v1729_v0 = vadd.f32 %v1728_v33, %v4277_v22 }
 0x1cb   :  { %v1730_v57 = vpop.f32.mrf.mxu1  ;;  %v1541_v21 = vpop.f32.mrf.mxu0 }
 0x1cc   :  { %2680 = vst [vmem:[#allocation9 + $0xc8] sm:$0xff] %v3034_v39  ;;  %v1731_v34 = vadd.f32 %v1730_v57, %v4280_v28  ;;  %v3035_v36 = vpack.c.bf16 %v1538_v15, %v1536_v58  ;;  %v1542_v12 = vadd.f32 %v1541_v21, %v4269_v60 }
 0x1cd   :  { %v1734_v61 = vpop.f32.mrf.mxu1  ;;  %v1543_v32 = vpop.f32.mrf.mxu0 }
 0x1ce   :  { %v3036_v46 = vpack.c.bf16 %v1731_v34, %v1729_v0  ;;  %2681 = vst [vmem:[#allocation9 + $0xd0] sm:$0xff] %v3035_v36  ;;  %v1544_v11 = vadd.f32 %v1543_v32, %v4272_v52  ;;  %v1735_v49 = vadd.f32 %v1734_v61, %v4277_v22 }
 0x1cf   :  { %v1736_v13 = vpop.f32.mrf.mxu1  ;;  %v1545_v25 = vpop.f32.mrf.mxu0 }
 0x1d0   :  { %2682 = vst [vmem:[#allocation9 + $0xd8] sm:$0xff] %v3036_v46  ;;  %v1737_v3 = vadd.f32 %v1736_v13, %v4280_v28  ;;  %v3037_v51 = vpack.c.bf16 %v1544_v11, %v1542_v12  ;;  %v1546_v53 = vadd.f32 %v1545_v25, %v4269_v60 }
 0x1d1   :  { %v1738_v19 = vpop.f32.mrf.mxu1  ;;  %v1547_v43 = vpop.f32.mrf.mxu0 }
 0x1d2   :  { %v3038_v7 = vpack.c.bf16 %v1737_v3, %v1735_v49  ;;  %2683 = vst [vmem:[#allocation9 + $0xe0] sm:$0xff] %v3037_v51  ;;  %v1548_v23 = vadd.f32 %v1547_v43, %v4272_v52  ;;  %v1739_v54 = vadd.f32 %v1738_v19, %v4277_v22 }
 0x1d3   :  { %v1740_v31 = vpop.f32.mrf.mxu1  ;;  %v1551_v40 = vpop.f32.mrf.mxu0 }
 0x1d4   :  { %2684 = vst [vmem:[#allocation9 + $0xe8] sm:$0xff] %v3038_v7  ;;  %v1741_v55 = vadd.f32 %v1740_v31, %v4280_v28  ;;  %v3039_v29 = vpack.c.bf16 %v1548_v23, %v1546_v53  ;;  %v1552_v10 = vadd.f32 %v1551_v40, %v4269_v60 }
 0x1d5   :  { %v1744_v27 = vpop.f32.mrf.mxu1  ;;  %v1553_v59 = vpop.f32.mrf.mxu0 }
 0x1d6   :  { %v3040_v16 = vpack.c.bf16 %v1741_v55, %v1739_v54  ;;  %2685 = vst [vmem:[#allocation9 + $0xf0] sm:$0xff] %v3039_v29  ;;  %v1554_v26 = vadd.f32 %v1553_v59, %v4272_v52  ;;  %v1745_v8 = vadd.f32 %v1744_v27, %v4277_v22 }
 0x1d7   :  { %v1746_v63 = vpop.f32.mrf.mxu1  ;;  %v1555_v2 = vpop.f32.mrf.mxu0 }
 0x1d8   :  { %2686 = vst [vmem:[#allocation9 + $0xf8] sm:$0xff] %v3040_v16  ;;  %v1747_v1 = vadd.f32 %v1746_v63, %v4280_v28  ;;  %v3041_v4 = vpack.c.bf16 %v1554_v26, %v1552_v10  ;;  %v1556_v44 = vadd.f32 %v1555_v2, %v4269_v60 }
 0x1d9   :  { %v1748_v35 = vpop.f32.mrf.mxu1  ;;  %v1557_v42 = vpop.f32.mrf.mxu0 }
 0x1da   :  { %v3042_v17 = vpack.c.bf16 %v1747_v1, %v1745_v8  ;;  %2687 = vst [vmem:[#allocation9 + $0x100] sm:$0xff] %v3041_v4  ;;  %v1558_v30 = vadd.f32 %v1557_v42, %v4272_v52  ;;  %v1749_v9 = vadd.f32 %v1748_v35, %v4277_v22 }
 0x1db   :  { %v1750_v14 = vpop.f32.mrf.mxu1  ;;  %v1561_v45 = vpop.f32.mrf.mxu0 }
 0x1dc   :  { %2688 = vst [vmem:[#allocation9 + $0x108] sm:$0xff] %v3042_v17  ;;  %v1751_v37 = vadd.f32 %v1750_v14, %v4280_v28  ;;  %v3043_v62 = vpack.c.bf16 %v1558_v30, %v1556_v44  ;;  %v1562_v5 = vadd.f32 %v1561_v45, %v4269_v60 }
 0x1dd   :  { %v1754_v18 = vpop.f32.mrf.mxu1  ;;  %v1563_v56 = vpop.f32.mrf.mxu0 }
 0x1de   :  { %v3044_v41 = vpack.c.bf16 %v1751_v37, %v1749_v9  ;;  %2689 = vst [vmem:[#allocation9 + $0x110] sm:$0xff] %v3043_v62  ;;  %v1564_v6 = vadd.f32 %v1563_v56, %v4272_v52  ;;  %v1755_v47 = vadd.f32 %v1754_v18, %v4277_v22 }
 0x1df   :  { %v1756_v24 = vpop.f32.mrf.mxu1  ;;  %v1565_v38 = vpop.f32.mrf.mxu0 }
 0x1e0   :  { %2690 = vst [vmem:[#allocation9 + $0x118] sm:$0xff] %v3044_v41  ;;  %v1757_v20 = vadd.f32 %v1756_v24, %v4280_v28  ;;  %v3045_v50 = vpack.c.bf16 %v1564_v6, %v1562_v5  ;;  %v1566_v58 = vadd.f32 %v1565_v38, %v4269_v60 }
 0x1e1   :  { %v1758_v33 = vpop.f32.mrf.mxu1  ;;  %v1567_v48 = vpop.f32.mrf.mxu0 }
 0x1e2   :  { %v3046_v39 = vpack.c.bf16 %v1757_v20, %v1755_v47  ;;  %2691 = vst [vmem:[#allocation9 + $0x120] sm:$0xff] %v3045_v50  ;;  %v1568_v15 = vadd.f32 %v1567_v48, %v4272_v52  ;;  %v1759_v0 = vadd.f32 %v1758_v33, %v4277_v22 }
 0x1e3   :  { %v1760_v57 = vpop.f32.mrf.mxu1  ;;  %v1571_v21 = vpop.f32.mrf.mxu0 }
 0x1e4   :  { %2692 = vst [vmem:[#allocation9 + $0x128] sm:$0xff] %v3046_v39  ;;  %v1761_v34 = vadd.f32 %v1760_v57, %v4280_v28  ;;  %v3047_v36 = vpack.c.bf16 %v1568_v15, %v1566_v58  ;;  %v1572_v12 = vadd.f32 %v1571_v21, %v4269_v60 }
 0x1e5   :  { %v1764_v61 = vpop.f32.mrf.mxu1  ;;  %v1573_v32 = vpop.f32.mrf.mxu0 }
 0x1e6   :  { %v3048_v46 = vpack.c.bf16 %v1761_v34, %v1759_v0  ;;  %2693 = vst [vmem:[#allocation9 + $0x130] sm:$0xff] %v3047_v36  ;;  %v1574_v11 = vadd.f32 %v1573_v32, %v4272_v52  ;;  %v1765_v49 = vadd.f32 %v1764_v61, %v4277_v22 }
 0x1e7   :  { %v1766_v13 = vpop.f32.mrf.mxu1  ;;  %v1575_v25 = vpop.f32.mrf.mxu0 }
 0x1e8   :  { %2694 = vst [vmem:[#allocation9 + $0x138] sm:$0xff] %v3048_v46  ;;  %v1767_v3 = vadd.f32 %v1766_v13, %v4280_v28  ;;  %v3049_v51 = vpack.c.bf16 %v1574_v11, %v1572_v12  ;;  %v1576_v53 = vadd.f32 %v1575_v25, %v4269_v60 }
 0x1e9   :  { %v1768_v19 = vpop.f32.mrf.mxu1  ;;  %v1577_v43 = vpop.f32.mrf.mxu0 }
 0x1ea   :  { %v3050_v7 = vpack.c.bf16 %v1767_v3, %v1765_v49  ;;  %2695 = vst [vmem:[#allocation9 + $0x140] sm:$0xff] %v3049_v51  ;;  %v1578_v23 = vadd.f32 %v1577_v43, %v4272_v52  ;;  %v1769_v54 = vadd.f32 %v1768_v19, %v4277_v22 }
 0x1eb   :  { %v1770_v31 = vpop.f32.mrf.mxu1  ;;  %v1581_v40 = vpop.f32.mrf.mxu0 }
 0x1ec   :  { %2696 = vst [vmem:[#allocation9 + $0x148] sm:$0xff] %v3050_v7  ;;  %v1771_v55 = vadd.f32 %v1770_v31, %v4280_v28  ;;  %v3051_v29 = vpack.c.bf16 %v1578_v23, %v1576_v53  ;;  %v1582_v10 = vadd.f32 %v1581_v40, %v4269_v60 }
 0x1ed   :  { %v1774_v27 = vpop.f32.mrf.mxu1  ;;  %v1583_v59 = vpop.f32.mrf.mxu0 }
 0x1ee   :  { %v3052_v16 = vpack.c.bf16 %v1771_v55, %v1769_v54  ;;  %2697 = vst [vmem:[#allocation9 + $0x150] sm:$0xff] %v3051_v29  ;;  %v1584_v26 = vadd.f32 %v1583_v59, %v4272_v52  ;;  %v1775_v8 = vadd.f32 %v1774_v27, %v4277_v22 }
 0x1ef   :  { %v1776_v63 = vpop.f32.mrf.mxu1  ;;  %v1585_v2 = vpop.f32.mrf.mxu0 }
 0x1f0   :  { %2698 = vst [vmem:[#allocation9 + $0x158] sm:$0xff] %v3052_v16  ;;  %v1777_v1 = vadd.f32 %v1776_v63, %v4280_v28  ;;  %v3053_v4 = vpack.c.bf16 %v1584_v26, %v1582_v10  ;;  %v1586_v44 = vadd.f32 %v1585_v2, %v4269_v60 }
 0x1f1   :  { %v1778_v35 = vpop.f32.mrf.mxu1  ;;  %v1587_v42 = vpop.f32.mrf.mxu0 }
 0x1f2   :  { %v3054_v17 = vpack.c.bf16 %v1777_v1, %v1775_v8  ;;  %2699 = vst [vmem:[#allocation9 + $0x160] sm:$0xff] %v3053_v4  ;;  %v1588_v30 = vadd.f32 %v1587_v42, %v4272_v52  ;;  %v1779_v9 = vadd.f32 %v1778_v35, %v4277_v22 }
 0x1f3   :  { %v1780_v14 = vpop.f32.mrf.mxu1  ;;  %v1591_v45 = vpop.f32.mrf.mxu0 }
 0x1f4   :  { %2700 = vst [vmem:[#allocation9 + $0x168] sm:$0xff] %v3054_v17  ;;  %v1781_v37 = vadd.f32 %v1780_v14, %v4280_v28  ;;  %v3055_v62 = vpack.c.bf16 %v1588_v30, %v1586_v44  ;;  %v1592_v5 = vadd.f32 %v1591_v45, %v4269_v60 }
 0x1f5   :  { %v1784_v18 = vpop.f32.mrf.mxu1  ;;  %v1593_v56 = vpop.f32.mrf.mxu0 }
 0x1f6   :  { %v3056_v41 = vpack.c.bf16 %v1781_v37, %v1779_v9  ;;  %2701 = vst [vmem:[#allocation9 + $0x170] sm:$0xff] %v3055_v62  ;;  %v1594_v6 = vadd.f32 %v1593_v56, %v4272_v52  ;;  %v1785_v47 = vadd.f32 %v1784_v18, %v4277_v22 }
 0x1f7   :  { %v1786_v24 = vpop.f32.mrf.mxu1  ;;  %v1595_v38 = vpop.f32.mrf.mxu0 }
 0x1f8   :  { %2702 = vst [vmem:[#allocation9 + $0x178] sm:$0xff] %v3056_v41  ;;  %v1787_v20 = vadd.f32 %v1786_v24, %v4280_v28  ;;  %v3057_v50 = vpack.c.bf16 %v1594_v6, %v1592_v5  ;;  %v1596_v58 = vadd.f32 %v1595_v38, %v4269_v60 }
 0x1f9   :  { %v1788_v33 = vpop.f32.mrf.mxu1  ;;  %v1597_v48 = vpop.f32.mrf.mxu0 }
 0x1fa   :  { %v3058_v39 = vpack.c.bf16 %v1787_v20, %v1785_v47  ;;  %2703 = vst [vmem:[#allocation9 + $0x180] sm:$0xff] %v3057_v50  ;;  %v1598_v15 = vadd.f32 %v1597_v48, %v4272_v52  ;;  %v1789_v0 = vadd.f32 %v1788_v33, %v4277_v22 }
 0x1fb   :  { %v1790_v57 = vpop.f32.mrf.mxu1  ;;  %v1601_v21 = vpop.f32.mrf.mxu0 }
 0x1fc   :  { %2704 = vst [vmem:[#allocation9 + $0x188] sm:$0xff] %v3058_v39  ;;  %v1791_v34 = vadd.f32 %v1790_v57, %v4280_v28  ;;  %v3059_v36 = vpack.c.bf16 %v1598_v15, %v1596_v58  ;;  %v1602_v12 = vadd.f32 %v1601_v21, %v4269_v60 }
 0x1fd   :  { %v1794_v61 = vpop.f32.mrf.mxu1  ;;  %v1603_v32 = vpop.f32.mrf.mxu0 }
 0x1fe   :  { %v3060_v46 = vpack.c.bf16 %v1791_v34, %v1789_v0  ;;  %2705 = vst [vmem:[#allocation9 + $0x190] sm:$0xff] %v3059_v36  ;;  %v1604_v11 = vadd.f32 %v1603_v32, %v4272_v52  ;;  %v1795_v49 = vadd.f32 %v1794_v61, %v4277_v22 }
 0x1ff   :  { %v1796_v13 = vpop.f32.mrf.mxu1  ;;  %v1605_v25 = vpop.f32.mrf.mxu0 }
 0x200   :  { %2706 = vst [vmem:[#allocation9 + $0x198] sm:$0xff] %v3060_v46  ;;  %v1797_v3 = vadd.f32 %v1796_v13, %v4280_v28  ;;  %v3061_v51 = vpack.c.bf16 %v1604_v11, %v1602_v12  ;;  %v1606_v53 = vadd.f32 %v1605_v25, %v4269_v60 }
 0x201   :  { %v1798_v19 = vpop.f32.mrf.mxu1  ;;  %v1607_v43 = vpop.f32.mrf.mxu0 }
 0x202   :  { %v3062_v7 = vpack.c.bf16 %v1797_v3, %v1795_v49  ;;  %2707 = vst [vmem:[#allocation9 + $0x1a0] sm:$0xff] %v3061_v51  ;;  %v1608_v23 = vadd.f32 %v1607_v43, %v4272_v52  ;;  %v1799_v54 = vadd.f32 %v1798_v19, %v4277_v22 }
 0x203   :  { %v1800_v31 = vpop.f32.mrf.mxu1  ;;  %v1611_v40 = vpop.f32.mrf.mxu0 }
 0x204   :  { %2708 = vst [vmem:[#allocation9 + $0x1a8] sm:$0xff] %v3062_v7  ;;  %v1801_v55 = vadd.f32 %v1800_v31, %v4280_v28  ;;  %v3063_v29 = vpack.c.bf16 %v1608_v23, %v1606_v53  ;;  %v1612_v10 = vadd.f32 %v1611_v40, %v4269_v60 }
 0x205   :  { %v1804_v27 = vpop.f32.mrf.mxu1  ;;  %v1613_v59 = vpop.f32.mrf.mxu0 }
 0x206   :  { %v3064_v16 = vpack.c.bf16 %v1801_v55, %v1799_v54  ;;  %2709 = vst [vmem:[#allocation9 + $0x1b0] sm:$0xff] %v3063_v29  ;;  %v1614_v26 = vadd.f32 %v1613_v59, %v4272_v52  ;;  %v1805_v8 = vadd.f32 %v1804_v27, %v4277_v22 }
 0x207   :  { %v1806_v63 = vpop.f32.mrf.mxu1  ;;  %v1615_v2 = vpop.f32.mrf.mxu0 }
 0x208   :  { %2710 = vst [vmem:[#allocation9 + $0x1b8] sm:$0xff] %v3064_v16  ;;  %v1807_v1 = vadd.f32 %v1806_v63, %v4280_v28  ;;  %v3065_v4 = vpack.c.bf16 %v1614_v26, %v1612_v10  ;;  %v1616_v44 = vadd.f32 %v1615_v2, %v4269_v60 }
 0x209   :  { %v1808_v35 = vpop.f32.mrf.mxu1  ;;  %v1617_v42 = vpop.f32.mrf.mxu0 }
 0x20a   :  { %v3066_v17 = vpack.c.bf16 %v1807_v1, %v1805_v8  ;;  %2711 = vst [vmem:[#allocation9 + $0x1c0] sm:$0xff] %v3065_v4  ;;  %v1618_v30 = vadd.f32 %v1617_v42, %v4272_v52  ;;  %v1809_v9 = vadd.f32 %v1808_v35, %v4277_v22 }
 0x20b   :  { %v1810_v14 = vpop.f32.mrf.mxu1  ;;  %v1621_v45 = vpop.f32.mrf.mxu0 }
 0x20c   :  { %2712 = vst [vmem:[#allocation9 + $0x1c8] sm:$0xff] %v3066_v17  ;;  %v1811_v37 = vadd.f32 %v1810_v14, %v4280_v28  ;;  %v3067_v62 = vpack.c.bf16 %v1618_v30, %v1616_v44  ;;  %v1622_v5 = vadd.f32 %v1621_v45, %v4269_v60 }
 0x20d   :  { %v1814_v18 = vpop.f32.mrf.mxu1  ;;  %v1623_v56 = vpop.f32.mrf.mxu0 }
 0x20e   :  { %v3068_v41 = vpack.c.bf16 %v1811_v37, %v1809_v9  ;;  %2713 = vst [vmem:[#allocation9 + $0x1d0] sm:$0xff] %v3067_v62  ;;  %v1624_v6 = vadd.f32 %v1623_v56, %v4272_v52  ;;  %v1815_v47 = vadd.f32 %v1814_v18, %v4277_v22 }
 0x20f   :  { %v1816_v24 = vpop.f32.mrf.mxu1  ;;  %v1625_v38 = vpop.f32.mrf.mxu0 }
 0x210   :  { %2714 = vst [vmem:[#allocation9 + $0x1d8] sm:$0xff] %v3068_v41  ;;  %v1817_v20 = vadd.f32 %v1816_v24, %v4280_v28  ;;  %v3069_v50 = vpack.c.bf16 %v1624_v6, %v1622_v5  ;;  %v1626_v58 = vadd.f32 %v1625_v38, %v4269_v60 }
 0x211   :  { %v1818_v33 = vpop.f32.mrf.mxu1  ;;  %v1627_v48 = vpop.f32.mrf.mxu0 }
 0x212   :  { %v3070_v39 = vpack.c.bf16 %v1817_v20, %v1815_v47  ;;  %2715 = vst [vmem:[#allocation9 + $0x1e0] sm:$0xff] %v3069_v50  ;;  %v1628_v15 = vadd.f32 %v1627_v48, %v4272_v52  ;;  %v1819_v0 = vadd.f32 %v1818_v33, %v4277_v22 }
 0x213   :  { %v1820_v57 = vpop.f32.mrf.mxu1 }
 0x214   :  { %2716 = vst [vmem:[#allocation9 + $0x1e8] sm:$0xff] %v3070_v39  ;;  %v1821_v34 = vadd.f32 %v1820_v57, %v4280_v28  ;;  %v3071_v21 = vpack.c.bf16 %v1628_v15, %v1626_v58 }
 0x216   :  { %v3072_v36 = vpack.c.bf16 %v1821_v34, %v1819_v0  ;;  %2717 = vst [vmem:[#allocation9 + $0x1f0] sm:$0xff] %v3071_v21 }
 0x218   :  { %2718 = vst [vmem:[#allocation9 + $0x1f8] sm:$0xff] %v3072_v36 }
 0x219   :  { %3176 = shalt.err (!%p3173_p10)
}
 0x21a   :  { %2742 = dma.vmem_to_hbm [thread:$0]  %s2737_s12, 8192, %s4426_s4, [#allocation10], %s3202_s8, %s3202_s8, %s3203_s9  }
 0x21b   :  { %3189 = dma.done.wait [#allocation4], 8192  }
 0x21c   :  { %3190 = vsyncadd [#allocation4], 4294959104 }
 0x21d   :  { %3191 = dma.done.wait [#allocation10], 8192  }
 0x21e   :  { %3192 = vsyncadd [#allocation10], 4294959104 }
 0x21f   :  { %2749 = vsyncpa [#allocation3], 1 }
 0x220   :  { %2750 = vsyncpa [#allocation6], 1 }
 0x221   :  { %2751 = vsyncpa [#allocation4], 1 }
 0x222   :  { %2752 = vsyncpa [#allocation10], 1 }

// kernel: tpu_custom_call.1
= control target key start
LH: loop header
LB: loop body
LE: loop exit
PB: predicated region body
PF: predicated region fallthrough
CT: control target
= control target key end

     0   :  { %10 = vsyncpa [#allocation3], 0  ;;  %s4422_s0 = inlined_call_operand.hbm [shape: f32[16,16,128], index: 0, kind: input, shape index: {}]   ;;  %s4423_s1 = inlined_call_operand.hbm [shape: bf16[128,1024], index: 1, kind: input, shape index: {}]   ;;  %s4424_s2 = inlined_call_operand.hbm [shape: f32[1,1024], index: 2, kind: input, shape index: {}]   ;;  %s4425_s3 = inlined_call_operand.hbm [shape: bf16[16,16,512], index: 3, kind: output, shape index: {0}]   ;;  %s4426_s4 = inlined_call_operand.hbm [shape: bf16[16,16,512], index: 4, kind: output, shape index: {1}]  }
   0x1   :  { %11 = vsyncpa [#allocation6], 0 }
   0x2   :  { %12 = vsyncpa [#allocation4], 0 }
   0x3   :  { %13 = vsyncpa [#allocation10], 0  ;;  %s3193_s15 = smov [#allocation5]  }
   0x4   :  { %s31_s16 = sshll.u32 %s3193_s15, 4  ;;  %s32_s16 = int_to_ptr.vmem [resolvable:$true] %s31_s16 }
   0x5   :  { %s3093_s17 = scalar_lea.vmem %s32_s16, 8192  ;;  %p3098_p1 = scmp.lt.s32.totalorder %s32_s16, %s32_s16 }
   0x6   :  { %p3094_p0 = scmp.ne.s32.totalorder %s32_s16, %s3093_s17  ;;  %p3099_p2 = scmp.lt.s32.totalorder %s3093_s17, %s3093_s17 }
   0x8   :  { %p3100_p3 = por %p3099_p2, %p3098_p1 }
   0xa   :  { %p3101_p4 = pnand %p3100_p3, %p3094_p0 }
   0xc   :  { %3104 = shalt.err (!%p3101_p4)
}
   0xd   :  { %s3194_s18 = smov 512   ;;  %s3195_s19 = smov 32  }
   0xe   :  { %37 = dma.hbm_to_vmem [thread:$0]  %s4423_s1, 8192, %s32_s16, [#allocation6], %s3194_s18, %s3194_s18, %s3195_s19  }
   0xf   :  { %s3196_s22 = smov [#allocation2]  }
  0x10   :  { %s19_s23 = sshll.u32 %s3196_s22, 4  ;;  %s20_s23 = int_to_ptr.vmem [resolvable:$true] %s19_s23 }
  0x11   :  { %s3113_s24 = scalar_lea.vmem %s20_s23, 4096  ;;  %p3118_p6 = scmp.lt.s32.totalorder %s20_s23, %s20_s23 }
  0x12   :  { %p3114_p5 = scmp.ne.s32.totalorder %s20_s23, %s3113_s24  ;;  %p3119_p7 = scmp.lt.s32.totalorder %s3113_s24, %s3113_s24 }
  0x14   :  { %p3120_p8 = por %p3119_p7, %p3118_p6 }
  0x16   :  { %p3121_p9 = pnand %p3120_p8, %p3114_p5 }
  0x18   :  { %3124 = shalt.err (!%p3121_p9)
}
  0x19   :  { %s3197_s25 = smov 128   ;;  %s3198_s26 = smov 8  }
  0x1a   :  { %25 = dma.hbm_to_vmem [thread:$0]  %s4422_s0, 4096, %s20_s23, [#allocation3], %s3197_s25, %s3197_s25, %s3198_s26  }
  0x1b   :  { %s3199_s29 = smov [#allocation7]  }
  0x1c   :  { %s44_s30 = sshll.u32 %s3199_s29, 4  ;;  %s45_s30 = int_to_ptr.vmem [resolvable:$true] %s44_s30 }
  0x1d   :  { %s3133_s1 = scalar_lea.vmem %s45_s30, 128  ;;  %p3138_p11 = scmp.lt.s32.totalorder %s45_s30, %s45_s30 }
  0x1e   :  { %p3134_p10 = scmp.ne.s32.totalorder %s45_s30, %s3133_s1  ;;  %p3139_p12 = scmp.lt.s32.totalorder %s3133_s1, %s3133_s1 }
  0x20   :  { %p3140_p13 = por %p3139_p12, %p3138_p11 }
  0x22   :  { %p3141_p0 = pnand %p3140_p13, %p3134_p10 }
  0x24   :  { %3144 = shalt.err (!%p3141_p0)
}
  0x25   :  { %47 = dma.hbm_to_vmem [thread:$0]  %s4424_s2, 128, %s45_s30, [#allocation6]  }
  0x26   :  { %3185 = dma.done.wait [#allocation3], 4096  }
  0x27   :  { %3186 = vsyncadd [#allocation3], 4294963200 }
  0x28   :  { %3187 = dma.done.wait [#allocation6], 8320  }
  0x29   :  { %3188 = vsyncadd [#allocation6], 4294958976  ;;  %v4427_v0 = vmov 0   ;;  %v681_v1 = vld [vmem:[#allocation5 + $0x1c0] sm:$0xff]  ;;  %v682_v3 = vld [vmem:[#allocation5 + $0x1c8] sm:$0xff]  ;;  %vm107_vm0 = vcmask 1041409  }
  0x2a   :  { %1083 = vmatprep.mubr.bf16.mxu0 %v4427_v0  ;;  %1276 = vmatprep.mubr.bf16.mxu1 %v4427_v0  ;;  %v685_v2 = vld [vmem:[#allocation5 + $0x1e0] sm:$0xff]  ;;  %v686_v5 = vld [vmem:[#allocation5 + $0x1e8] sm:$0xff]  ;;  %vm110_vm1 = vcmask 1042434   ;;  %vm113_vm2 = vcmask 1043459   ;;  %vm116_vm3 = vcmask 1044484   ;;  %vm119_vm4 = vcmask 1045509  }
  0x2b   :  { %v2810_v4 = vcombine.high %v681_v1, %v685_v2  ;;  %v2809_v6 = vcombine.low %v681_v1, %v685_v2  ;;  %v673_v7 = vld [vmem:[#allocation5 + $0x180] sm:$0xff]  ;;  %v2812_v9 = vcombine.high %v682_v3, %v686_v5  ;;  %v2811_v10 = vcombine.low %v682_v3, %v686_v5  ;;  %v674_v12 = vld [vmem:[#allocation5 + $0x188] sm:$0xff]  ;;  %v3333_v63 = vld [vmem:[#allocation2 + $0x10] sm:$0xff]  ;;  %s3201_s0 = smov [#allocation8]  }
  0x2c   :  { %v677_v8 = vld [vmem:[#allocation5 + $0x1a0] sm:$0xff]  ;;  %v678_v13 = vld [vmem:[#allocation5 + $0x1a8] sm:$0xff]  ;;  %vm122_vm5 = vcmask 1046534   ;;  %v3337_v2 = vld [vmem:[#allocation2 + $0x30] sm:$0xff]  ;;  %vm125_vm6 = vcmask 1047559   ;;  %s2724_s2 = sshll.u32 %s3201_s0, 4  ;;  %s2725_s2 = int_to_ptr.vmem [resolvable:$true] %s2724_s2 }
  0x2d   :  { %v2802_v11 = vcombine.high %v673_v7, %v677_v8  ;;  %v3241_v14 = vld [vmem:[#allocation5 + $0x140] sm:$0xff]  ;;  %1051 = vmatprep.subr.bf16.mxu0 %v2810_v4  ;;  %v2804_v15 = vcombine.high %v674_v12, %v678_v13  ;;  %v3245_v17 = vld [vmem:[#allocation5 + $0x148] sm:$0xff]  ;;  %1244 = vmatprep.subr.bf16.mxu1 %v2812_v9  ;;  %v2801_v19 = vcombine.low %v673_v7, %v677_v8  ;;  %v106_v8 = vrot.slane %v3333_v63, 7  ;;  %v3391_v60 = vld [vmem:[#allocation5 + $0x1d0] sm:$0xff]  ;;  %s3145_s7 = scalar_lea.vmem %s2725_s2, 8192  ;;  %p3150_p2 = scmp.lt.s32.totalorder %s2725_s2, %s2725_s2 }
  0x2e   :  { %v3243_v16 = vld [vmem:[#allocation5 + $0x160] sm:$0xff]  ;;  %v3247_v18 = vld [vmem:[#allocation5 + $0x168] sm:$0xff]  ;;  %1052 = vmatpush1.bf16.msra.mxu0 %v2809_v6  ;;  %1245 = vmatpush1.bf16.msra.mxu1 %v2811_v10  ;;  %v2803_v23 = vcombine.low %v674_v12, %v678_v13  ;;  %v3344_v6 = vld [vmem:[#allocation2 + $0x50] sm:$0xff]  ;;  %v112_v10 = vrot.slane %v3337_v2, 5  ;;  %p3146_p1 = scmp.ne.s32.totalorder %s2725_s2, %s3145_s7  ;;  %p3151_p3 = scmp.lt.s32.totalorder %s3145_s7, %s3145_s7 }
  0x2f   :  { %v3249_v20 = vld [vmem:[#allocation5 + $0x100] sm:$0xff]  ;;  %v3253_v22 = vld [vmem:[#allocation5 + $0x108] sm:$0xff]  ;;  %1053 = vmatprep.subr.bf16.mxu0 %v2802_v11  ;;  %v2794_v24 = vcombine.high %v3241_v14, %v3243_v16  ;;  %1246 = vmatprep.subr.bf16.mxu1 %v2804_v15  ;;  %v2796_v28 = vcombine.high %v3245_v17, %v3247_v18  ;;  %v2793_v29 = vcombine.low %v3241_v14, %v3243_v16  ;;  %v3355_v13 = vld [vmem:[#allocation2 + $0x70] sm:$0xff] }
  0x30   :  { %v3251_v21 = vld [vmem:[#allocation5 + $0x120] sm:$0xff]  ;;  %v3257_v25 = vld [vmem:[#allocation5 + $0x128] sm:$0xff]  ;;  %v2795_v33 = vcombine.low %v3245_v17, %v3247_v18  ;;  %v3359_v15 = vld [vmem:[#allocation2 + $0x90] sm:$0xff]  ;;  %v118_v17 = vrot.slane %v3344_v6, 3  ;;  %p3152_p4 = por %p3151_p3, %p3150_p2 }
  0x31   :  { %v3259_v26 = vld [vmem:[#allocation5 + $0xc0] sm:$0xff]  ;;  %v3267_v30 = vld [vmem:[#allocation5 + $0xc8] sm:$0xff]  ;;  %v2786_v34 = vcombine.high %v3249_v20, %v3251_v21  ;;  %v2788_v35 = vcombine.high %v3253_v22, %v3257_v25  ;;  %v2785_v36 = vcombine.low %v3249_v20, %v3251_v21  ;;  %v2787_v40 = vcombine.low %v3253_v22, %v3257_v25 }
  0x32   :  { %v3261_v27 = vld [vmem:[#allocation5 + $0xe0] sm:$0xff]  ;;  %v3269_v31 = vld [vmem:[#allocation5 + $0xe8] sm:$0xff]  ;;  %1054 = vmatpush1.bf16.msra.mxu0 %v2801_v19  ;;  %1247 = vmatpush1.bf16.msra.mxu1 %v2803_v23  ;;  %v3365_v19 = vld [vmem:[#allocation2 + $0xb0] sm:$0xff]  ;;  %v124_v22 = vrot.slane %v3355_v13, 1  ;;  %p3153_p5 = pnand %p3152_p4, %p3146_p1 }
  0x33   :  { %v3271_v32 = vld [vmem:[#allocation5 + $0x80] sm:$0xff]  ;;  %v3283_v38 = vld [vmem:[#allocation5 + $0x88] sm:$0xff]  ;;  %v2778_v41 = vcombine.high %v3259_v26, %v3261_v27  ;;  %v2780_v42 = vcombine.high %v3267_v30, %v3269_v31  ;;  %v2777_v43 = vcombine.low %v3259_v26, %v3261_v27  ;;  %1055 = vmatprep.subr.bf16.mxu0 %v2794_v24  ;;  %v2779_v47 = vcombine.low %v3267_v30, %v3269_v31 }
  0x34   :  { %v3281_v37 = vld [vmem:[#allocation5 + $0xa0] sm:$0xff]  ;;  %v3285_v39 = vld [vmem:[#allocation5 + $0xa8] sm:$0xff]  ;;  %1248 = vmatprep.subr.bf16.mxu1 %v2796_v28  ;;  %v131_v11 = vrot.slane %v3365_v19, 5 }
  0x35   :  { %v3295_v44 = vld [vmem:[#allocation5 + $0x40] sm:$0xff]  ;;  %v3299_v46 = vld [vmem:[#allocation5 + $0x48] sm:$0xff]  ;;  %v2770_v48 = vcombine.high %v3271_v32, %v3281_v37  ;;  %v2772_v49 = vcombine.high %v3283_v38, %v3285_v39  ;;  %v2769_v53 = vcombine.low %v3271_v32, %v3281_v37  ;;  %v2771_v54 = vcombine.low %v3283_v38, %v3285_v39 }
  0x36   :  { %v3297_v45 = vld [vmem:[#allocation5 + $0x60] sm:$0xff]  ;;  %v3307_v50 = vld [vmem:[#allocation5 + $0x68] sm:$0xff]  ;;  %1056 = vmatpush1.bf16.msra.mxu0 %v2793_v29  ;;  %1249 = vmatpush1.bf16.msra.mxu1 %v2795_v33  ;;  %v127_v29 = vrot.slane %v3359_v15, 7  ;;  %v177_v39 = vrot.slane %v3337_v2, 7 }
  0x37   :  { %v3309_v51 = vld [vmem:[#allocation5] sm:$0xff]  ;;  %v2762_v55 = vcombine.high %v3295_v44, %v3297_v45  ;;  %v3321_v57 = vld [vmem:[#allocation5 + $0x8] sm:$0xff]  ;;  %1057 = vmatprep.subr.bf16.mxu0 %v2786_v34  ;;  %1250 = vmatprep.subr.bf16.mxu1 %v2788_v35  ;;  %v3374_v34 = vld [vmem:[#allocation2 + $0xd0] sm:$0xff] }
  0x38   :  { %v3311_v52 = vld [vmem:[#allocation5 + $0x20] sm:$0xff]  ;;  %v3323_v58 = vld [vmem:[#allocation5 + $0x28] sm:$0xff]  ;;  %v3378_v35 = vld [vmem:[#allocation2 + $0xf0] sm:$0xff]  ;;  %v135_v56 = vrot.slane %v3374_v34, 3 }
  0x39   :  { %v3325_v59 = vld [vmem:[#allocation2] sm:$0xff]  ;;  %v169_v38 = vrot.slane %v3378_v35, 2 }
  0x3a   :  { %v3335_v1 = vld [vmem:[#allocation2 + $0x20] sm:$0xff]  ;;  %v143_v3 = vrot.slane %v3325_v59, 1  ;;  %v108_v24 = vsel %vm107_vm0, %v106_v8, %v3325_v59  ;;  %1058 = vmatpush1.bf16.msra.mxu0 %v2785_v36  ;;  %1251 = vmatpush1.bf16.msra.mxu1 %v2787_v40  ;;  %v139_v40 = vrot.slane %v3378_v35, 1 }
  0x3b   :  { %v3342_v5 = vld [vmem:[#allocation2 + $0x40] sm:$0xff]  ;;  %v109_v9 = vrot.slane %v3335_v1, 6  ;;  %v145_v33 = vrot.slane %v3335_v1, 7  ;;  %1059 = vmatprep.subr.bf16.mxu0 %v2778_v41  ;;  %1252 = vmatprep.subr.bf16.mxu1 %v2780_v42  ;;  %v3414_v41 = vld [vmem:[#allocation5 + $0x1d8] sm:$0xff] }
  0x3c   :  { %v3346_v7 = vld [vmem:[#allocation2 + $0x60] sm:$0xff]  ;;  %v115_v16 = vrot.slane %v3342_v5, 4 }
  0x3d   :  { %v3357_v14 = vld [vmem:[#allocation2 + $0x80] sm:$0xff]  ;;  %v121_v28 = vrot.slane %v3346_v7, 2  ;;  %v111_v12 = vsel %vm110_vm1, %v109_v9, %v108_v24  ;;  %v3393_v9 = vld [vmem:[#allocation5 + $0x1f0] sm:$0xff]  ;;  %v144_v24 = vsel %vm107_vm0, %v3333_v63, %v143_v3 }
  0x3e   :  { %v3363_v18 = vld [vmem:[#allocation2 + $0xa0] sm:$0xff]  ;;  %v114_v62 = vsel %vm113_vm2, %v112_v10, %v111_v12  ;;  %v128_v61 = vsel %vm107_vm0, %v127_v29, %v3357_v14  ;;  %v173_v10 = vrot.slane %v3325_v59, 2  ;;  %v2813_v12 = vcombine.low %v3391_v60, %v3393_v9  ;;  %1060 = vmatpush1.bf16.msra.mxu0 %v2777_v43  ;;  %1253 = vmatpush1.bf16.msra.mxu1 %v2779_v47 }
  0x3f   :  { %v3367_v23 = vld [vmem:[#allocation2 + $0xc0] sm:$0xff]  ;;  %v129_v4 = vrot.slane %v3363_v18, 6  ;;  %v117_v20 = vsel %vm116_vm3, %v115_v16, %v114_v62  ;;  %v3416_v62 = vld [vmem:[#allocation5 + $0x1f8] sm:$0xff]  ;;  %v146_v42 = vsel %vm110_vm1, %v145_v33, %v144_v24  ;;  %v2814_v16 = vcombine.high %v3391_v60, %v3393_v9  ;;  %1061 = vmatprep.subr.bf16.mxu0 %v2770_v48  ;;  %1254 = vmatprep.subr.bf16.mxu1 %v2772_v49 }
  0x40   :  { %v3376_v0 = vld [vmem:[#allocation2 + $0xe0] sm:$0xff]  ;;  %v133_v8 = vrot.slane %v3367_v23, 4  ;;  %v120_v3 = vsel %vm119_vm4, %v118_v17, %v117_v20  ;;  %v147_v17 = vrot.slane %v3337_v2, 6  ;;  %v2815_v27 = vcombine.low %v3414_v41, %v3416_v62 }
  0x41   :  { %v130_v21 = vsel %vm110_vm1, %v129_v4, %v128_v61  ;;  %v137_v36 = vrot.slane %v3376_v0, 2  ;;  %v123_v61 = vsel %vm122_vm5, %v121_v28, %v120_v3  ;;  %v149_v28 = vrot.slane %v3342_v5, 5 }
  0x42   :  { %v132_v25 = vsel %vm113_vm2, %v131_v11, %v130_v21  ;;  %v151_v43 = vrot.slane %v3344_v6, 4  ;;  %v126_v30 = vsel %vm125_vm6, %v124_v22, %v123_v61  ;;  %v148_v31 = vsel %vm113_vm2, %v147_v17, %v146_v42  ;;  %1062 = vmatpush1.bf16.msra.mxu0 %v2769_v53  ;;  %1255 = vmatpush1.bf16.msra.mxu1 %v2771_v54 }
  0x43   :  { %v134_v4 = vsel %vm116_vm3, %v133_v8, %v132_v25  ;;  %v157_v47 = vrot.slane %v3357_v14, 1  ;;  %v159_v48 = vrot.slane %v3363_v18, 7  ;;  %v150_v29 = vsel %vm116_vm3, %v149_v28, %v148_v31  ;;  %1063 = vmatprep.subr.bf16.mxu0 %v2762_v55 }
  0x44   :  { %v136_v11 = vsel %vm119_vm4, %v135_v56, %v134_v4  ;;  %v153_v56 = vrot.slane %v3346_v7, 3  ;;  %v155_v33 = vrot.slane %v3355_v13, 2  ;;  %v161_v8 = vrot.slane %v3365_v19, 6 }
  0x45   :  { %v138_v26 = vsel %vm122_vm5, %v137_v36, %v136_v11  ;;  %v163_v24 = vrot.slane %v3367_v23, 5  ;;  %v152_v20 = vsel %vm119_vm4, %v151_v43, %v150_v29  ;;  %v158_v21 = vsel %vm107_vm0, %v3359_v15, %v157_v47 }
  0x46   :  { %v140_v49 = vsel %vm125_vm6, %v139_v40, %v138_v26  ;;  %v165_v36 = vrot.slane %v3374_v34, 4  ;;  %v154_v32 = vsel %vm122_vm5, %v153_v56, %v152_v20  ;;  %v160_v37 = vsel %vm110_vm1, %v159_v48, %v158_v21  ;;  %v675_v21 = vld [vmem:[#allocation5 + $0x190] sm:$0xff] }
  0x47   :  { %v167_v53 = vrot.slane %v3376_v0, 3  ;;  %v174_v3 = vrot.slane %v3333_v63, 1  ;;  %v4429_v22 = vcombine.high %v3299_v46, %v3307_v50  ;;  %v162_v25 = vsel %vm113_vm2, %v161_v8, %v160_v37 }
  0x48   :  { %v179_v54 = vrot.slane %v3342_v5, 6  ;;  %v156_v55 = vsel %vm125_vm6, %v155_v33, %v154_v32  ;;  %v164_v40 = vsel %vm116_vm3, %v163_v24, %v162_v25  ;;  %v181_v4 = vrot.slane %v3344_v6, 5 }
  0x49   :  { %1256 = vmatprep.subr.bf16.mxu1 %v4429_v22  ;;  %v175_v61 = vsel %vm107_vm0, %v174_v3, %v173_v10  ;;  %v4430_v42 = vcombine.low %v3295_v44, %v3297_v45  ;;  %v166_v11 = vsel %vm119_vm4, %v165_v36, %v164_v40  ;;  %v183_v28 = vrot.slane %v3346_v7, 4  ;;  %v679_v36 = vld [vmem:[#allocation5 + $0x1b0] sm:$0xff]  ;;  %v676_v3 = vld [vmem:[#allocation5 + $0x198] sm:$0xff] }
  0x4a   :  { %v176_v17 = vsel %vm110_vm1, %v3335_v1, %v175_v61  ;;  %v187_v26 = vrot.slane %v3357_v14, 2  ;;  %v4431_v43 = vcombine.low %v3299_v46, %v3307_v50  ;;  %v4432_v10 = vcombine.high %v3309_v51, %v3311_v52  ;;  %v680_v22 = vld [vmem:[#allocation5 + $0x1b8] sm:$0xff] }
  0x4b   :  { %1064 = vmatpush1.bf16.msra.mxu0 %v4430_v42  ;;  %v168_v44 = vsel %vm122_vm5, %v167_v53, %v166_v11  ;;  %v178_v45 = vsel %vm113_vm2, %v177_v39, %v176_v17  ;;  %v188_v56 = vrot.slane %v3359_v15, 1  ;;  %v191_v31 = vrot.slane %v3365_v19, 7 }
  0x4c   :  { %1257 = vmatpush1.bf16.msra.mxu1 %v4431_v43  ;;  %1065 = vmatprep.subr.bf16.mxu0 %v4432_v10  ;;  %v4433_v47 = vcombine.high %v3321_v57, %v3323_v58  ;;  %v2816_v46 = vcombine.high %v3414_v41, %v3416_v62  ;;  %v170_v50 = vsel %vm125_vm6, %v169_v38, %v168_v44  ;;  %v193_v29 = vrot.slane %v3367_v23, 6 }
  0x4d   :  { %v180_v48 = vsel %vm116_vm3, %v179_v54, %v178_v45  ;;  %v3508_v33 = vpack.c.bf16 %v140_v49, %v126_v30  ;;  %v189_v24 = vsel %vm107_vm0, %v188_v56, %v187_v26  ;;  %v195_v20 = vrot.slane %v3374_v34, 5 }
  0x4e   :  { %1258 = vmatprep.subr.bf16.mxu1 %v4433_v47  ;;  %v182_v8 = vsel %vm119_vm4, %v181_v4, %v180_v48  ;;  %v4434_v32 = vcombine.low %v3309_v51, %v3311_v52  ;;  %v3516_v37 = vpack.c.bf16 %v170_v50, %v156_v55  ;;  %v185_v53 = vrot.slane %v3355_v13, 3 }
  0x4f   :  { %v190_v30 = vsel %vm110_vm1, %v3363_v18, %v189_v24  ;;  %v197_v49 = vrot.slane %v3376_v0, 4  ;;  %v4435_v25 = vcombine.low %v3321_v57, %v3323_v58  ;;  %v184_v51 = vsel %vm122_vm5, %v183_v28, %v182_v8 }
  0x50   :  { %1066 = vmatpush1.bf16.msra.mxu0 %v4434_v32  ;;  %v192_v52 = vsel %vm113_vm2, %v191_v31, %v190_v30  ;;  %v199_v38 = vrot.slane %v3378_v35, 3  ;;  %v203_v39 = vrot.slane %v3325_v59, 3  ;;  %v2805_v55 = vcombine.low %v675_v21, %v679_v36 }
  0x51   :  { %1259 = vmatpush1.bf16.msra.mxu1 %v4435_v25  ;;  %1437 = vmatprep.subr.bf16.mxu0 %v2814_v16  ;;  %v194_v54 = vsel %vm116_vm3, %v193_v29, %v192_v52  ;;  %v2806_v40 = vcombine.high %v675_v21, %v679_v36  ;;  %v204_v57 = vrot.slane %v3333_v63, 2  ;;  %v2808_v16 = vcombine.high %v676_v3, %v680_v22 }
  0x52   :  { %1630 = vmatprep.subr.bf16.mxu1 %v2816_v46  ;;  %v196_v58 = vsel %vm119_vm4, %v195_v20, %v194_v54  ;;  %v206_v61 = vrot.slane %v3335_v1, 1  ;;  %v209_v4 = vrot.slane %v3342_v5, 7  ;;  %v186_v42 = vsel %vm125_vm6, %v185_v53, %v184_v51 }
  0x53   :  { %1084 = vmatmul.mubr.bf16.vlgmr.msra.gmra.mxu0 %v3508_v33  ;;  %v2807_v11 = vcombine.low %v676_v3, %v680_v22  ;;  %v205_v17 = vsel %vm107_vm0, %v204_v57, %v203_v39  ;;  %v211_v28 = vrot.slane %v3344_v6, 6  ;;  %v4436_v26 = vmov 0   ;;  %v667_v57 = vld [vmem:[#allocation5 + $0x150] sm:$0xff] }
  0x54   :  { %1277 = vmatmul.mubr.bf16.vlgmr.msra.gmra.mxu1 %v3508_v33  ;;  %1438 = vmatpush1.bf16.msra.mxu0 %v2813_v12  ;;  %v198_v43 = vsel %vm122_vm5, %v197_v49, %v196_v58  ;;  %v207_v10 = vsel %vm110_vm1, %v206_v61, %v205_v17  ;;  %v217_v60 = vrot.slane %v3357_v14, 3  ;;  %v218_v9 = vrot.slane %v3359_v15, 2  ;;  %v671_v58 = vld [vmem:[#allocation5 + $0x170] sm:$0xff]  ;;  %v668_v17 = vld [vmem:[#allocation5 + $0x158] sm:$0xff] }
  0x55   :  { %1631 = vmatpush1.bf16.msra.mxu1 %v2815_v27  ;;  %1093 = vmatprep.mubr.bf16.mxu0 %v4436_v26  ;;  %v208_v12 = vsel %vm113_vm2, %v3337_v2, %v207_v10  ;;  %v213_v44 = vrot.slane %v3346_v7, 5  ;;  %v220_v41 = vrot.slane %v3363_v18, 1  ;;  %v223_v62 = vrot.slane %v3367_v23, 7 }
  0x56   :  { %1286 = vmatprep.mubr.bf16.mxu1 %v4436_v26  ;;  %1439 = vmatprep.subr.bf16.mxu0 %v2806_v40  ;;  %v210_v27 = vsel %vm116_vm3, %v209_v4, %v208_v12  ;;  %v215_v45 = vrot.slane %v3355_v13, 4  ;;  %v219_v56 = vsel %vm107_vm0, %v218_v9, %v217_v60  ;;  %v225_v31 = vrot.slane %v3374_v34, 6 }
  0x57   :  { %1632 = vmatprep.subr.bf16.mxu1 %v2808_v16  ;;  %v212_v47 = vsel %vm119_vm4, %v211_v28, %v210_v27  ;;  %v221_v46 = vsel %vm110_vm1, %v220_v41, %v219_v56  ;;  %v227_v50 = vrot.slane %v3376_v0, 5  ;;  %v233_v48 = vrot.slane %v3325_v59, 4 }
  0x58   :  { %1440 = vmatpush1.bf16.msra.mxu0 %v2805_v55  ;;  %v200_v29 = vsel %vm125_vm6, %v199_v38, %v198_v43  ;;  %v222_v8 = vsel %vm113_vm2, %v3365_v19, %v221_v46  ;;  %v234_v24 = vrot.slane %v3333_v63, 3  ;;  %v236_v20 = vrot.slane %v3335_v1, 2 }
  0x59   :  { %1633 = vmatpush1.bf16.msra.mxu1 %v2807_v11  ;;  %v214_v21 = vsel %vm122_vm5, %v213_v44, %v212_v47  ;;  %v224_v36 = vsel %vm116_vm3, %v223_v62, %v222_v8  ;;  %v229_v32 = vrot.slane %v3378_v35, 4  ;;  %v238_v53 = vrot.slane %v3337_v2, 1 }
  0x5a   :  { %v226_v30 = vsel %vm119_vm4, %v225_v31, %v224_v36  ;;  %v235_v49 = vsel %vm107_vm0, %v234_v24, %v233_v48  ;;  %v241_v3 = vrot.slane %v3344_v6, 7  ;;  %v243_v22 = vrot.slane %v3346_v7, 6 }
  0x5b   :  { %1094 = vmatmul.mubr.bf16.gmra.mxu0 %v3516_v37  ;;  %v228_v25 = vsel %vm122_vm5, %v227_v50, %v226_v30  ;;  %v237_v51 = vsel %vm110_vm1, %v236_v20, %v235_v49  ;;  %v247_v52 = vrot.slane %v3357_v14, 4  ;;  %v248_v38 = vrot.slane %v3359_v15, 3 }
  0x5c   :  { %1287 = vmatmul.mubr.bf16.gmra.mxu1 %v3516_v37  ;;  %1103 = vmatprep.mubr.bf16.mxu0 %v4436_v26  ;;  %v3588_v39 = vpack.c.bf16 %v200_v29, %v186_v42  ;;  %v239_v54 = vsel %vm113_vm2, %v238_v53, %v237_v51  ;;  %v250_v55 = vrot.slane %v3363_v18, 2  ;;  %v252_v40 = vrot.slane %v3365_v19, 1  ;;  %v672_v42 = vld [vmem:[#allocation5 + $0x178] sm:$0xff] }
  0x5d   :  { %1296 = vmatprep.mubr.bf16.mxu1 %v4436_v26  ;;  %v216_v16 = vsel %vm125_vm6, %v215_v45, %v214_v21  ;;  %v240_v61 = vsel %vm116_vm3, %v3342_v5, %v239_v54  ;;  %v249_v4 = vsel %vm107_vm0, %v248_v38, %v247_v52  ;;  %v255_v11 = vrot.slane %v3374_v34, 7 }
  0x5e   :  { %v230_v28 = vsel %vm125_vm6, %v229_v32, %v228_v25  ;;  %v242_v43 = vsel %vm119_vm4, %v241_v3, %v240_v61  ;;  %v245_v10 = vrot.slane %v3355_v13, 5  ;;  %v251_v60 = vsel %vm110_vm1, %v250_v55, %v249_v4 }
  0x5f   :  { %v244_v9 = vsel %vm122_vm5, %v243_v22, %v242_v43  ;;  %v253_v12 = vsel %vm113_vm2, %v252_v40, %v251_v60  ;;  %v257_v44 = vrot.slane %v3376_v0, 6  ;;  %v2798_v41 = vcombine.high %v667_v57, %v671_v58 }
  0x60   :  { %v254_v62 = vsel %vm116_vm3, %v3367_v23, %v253_v12  ;;  %v2797_v27 = vcombine.low %v667_v57, %v671_v58  ;;  %v2799_v45 = vcombine.low %v668_v17, %v672_v42  ;;  %v2800_v56 = vcombine.high %v668_v17, %v672_v42 }
  0x61   :  { %v256_v31 = vsel %vm119_vm4, %v255_v11, %v254_v62  ;;  %1441 = vmatprep.subr.bf16.mxu0 %v2798_v41  ;;  %v263_v47 = vrot.slane %v3325_v59, 5  ;;  %v264_v46 = vrot.slane %v3333_v63, 4  ;;  %v266_v50 = vrot.slane %v3335_v1, 3 }
  0x62   :  { %v3612_v48 = vpack.c.bf16 %v230_v28, %v216_v16  ;;  %1634 = vmatprep.subr.bf16.mxu1 %v2800_v56  ;;  %v268_v29 = vrot.slane %v3337_v2, 2  ;;  %v270_v8 = vrot.slane %v3342_v5, 1  ;;  %v246_v24 = vsel %vm125_vm6, %v245_v10, %v244_v9  ;;  %1442 = vmatpush1.bf16.msra.mxu0 %v2797_v27 }
  0x63   :  { %1104 = vmatmul.mubr.bf16.gmra.mxu0 %v3588_v39  ;;  %v259_v20 = vrot.slane %v3378_v35, 5  ;;  %v265_v21 = vsel %vm107_vm0, %v264_v46, %v263_v47  ;;  %v277_v36 = vrot.slane %v3357_v14, 5  ;;  %v258_v32 = vsel %vm122_vm5, %v257_v44, %v256_v31  ;;  %1635 = vmatpush1.bf16.msra.mxu1 %v2799_v45  ;;  %v659_v47 = vld [vmem:[#allocation5 + $0x110] sm:$0xff] }
  0x64   :  { %1297 = vmatmul.mubr.bf16.gmra.mxu1 %v3588_v39  ;;  %1113 = vmatprep.mubr.bf16.mxu0 %v4436_v26  ;;  %v267_v53 = vsel %vm110_vm1, %v266_v50, %v265_v21  ;;  %v278_v30 = vrot.slane %v3359_v15, 4  ;;  %v280_v49 = vrot.slane %v3363_v18, 3  ;;  %v273_v22 = vrot.slane %v3346_v7, 7  ;;  %v663_v46 = vld [vmem:[#allocation5 + $0x130] sm:$0xff]  ;;  %v664_v21 = vld [vmem:[#allocation5 + $0x138] sm:$0xff] }
  0x65   :  { %1306 = vmatprep.mubr.bf16.mxu1 %v4436_v26  ;;  %v269_v3 = vsel %vm113_vm2, %v268_v29, %v267_v53  ;;  %v282_v25 = vrot.slane %v3365_v19, 2  ;;  %v284_v51 = vrot.slane %v3367_v23, 1  ;;  %v287_v54 = vrot.slane %v3376_v0, 7 }
  0x66   :  { %v271_v52 = vsel %vm116_vm3, %v270_v8, %v269_v3  ;;  %v279_v38 = vsel %vm107_vm0, %v278_v30, %v277_v36  ;;  %v293_v55 = vrot.slane %v3325_v59, 6  ;;  %v294_v58 = vrot.slane %v3333_v63, 5 }
  0x67   :  { %v272_v40 = vsel %vm119_vm4, %v3344_v6, %v271_v52  ;;  %v281_v57 = vsel %vm110_vm1, %v280_v49, %v279_v38  ;;  %v296_v16 = vrot.slane %v3335_v1, 4  ;;  %v260_v61 = vsel %vm125_vm6, %v259_v20, %v258_v32  ;;  %v660_v20 = vld [vmem:[#allocation5 + $0x118] sm:$0xff] }
  0x68   :  { %v275_v4 = vrot.slane %v3355_v13, 6  ;;  %v283_v11 = vsel %vm113_vm2, %v282_v25, %v281_v57  ;;  %v298_v17 = vrot.slane %v3337_v2, 3  ;;  %v274_v42 = vsel %vm122_vm5, %v273_v22, %v272_v40 }
  0x69   :  { %v285_v28 = vsel %vm116_vm3, %v284_v51, %v283_v11  ;;  %v289_v43 = vrot.slane %v3378_v35, 6  ;;  %v295_v10 = vsel %vm107_vm0, %v294_v58, %v293_v55  ;;  %v300_v12 = vrot.slane %v3342_v5, 2  ;;  %v3691_v11 = vld [vmem:[#allocation2 + $0x18] sm:$0xff] }
  0x6a   :  { %v286_v60 = vsel %vm119_vm4, %v3374_v34, %v285_v28  ;;  %v297_v9 = vsel %vm110_vm1, %v296_v16, %v295_v10  ;;  %v307_v44 = vrot.slane %v3357_v14, 6  ;;  %v308_v27 = vrot.slane %v3359_v15, 5  ;;  %v3701_v10 = vld [vmem:[#allocation2 + $0x38] sm:$0xff] }
  0x6b   :  { %1114 = vmatmul.mubr.bf16.gmra.mxu0 %v3612_v48  ;;  %v288_v41 = vsel %vm122_vm5, %v287_v54, %v286_v60  ;;  %v299_v62 = vsel %vm113_vm2, %v298_v17, %v297_v9  ;;  %v310_v45 = vrot.slane %v3363_v18, 4  ;;  %v312_v56 = vrot.slane %v3365_v19, 3 }
  0x6c   :  { %1307 = vmatmul.mubr.bf16.gmra.mxu1 %v3612_v48  ;;  %1123 = vmatprep.mubr.bf16.mxu0 %v4436_v26  ;;  %v314_v31 = vrot.slane %v3367_v23, 2  ;;  %v3663_v50 = vpack.c.bf16 %v260_v61, %v246_v24  ;;  %v302_v29 = vrot.slane %v3344_v6, 1  ;;  %v309_v8 = vsel %vm107_vm0, %v308_v27, %v307_v44  ;;  %v3709_v44 = vld [vmem:[#allocation2 + $0x48] sm:$0xff] }
  0x6d   :  { %1316 = vmatprep.mubr.bf16.mxu1 %v4436_v26  ;;  %v276_v36 = vsel %vm125_vm6, %v275_v4, %v274_v42  ;;  %v290_v32 = vsel %vm125_vm6, %v289_v43, %v288_v41  ;;  %v301_v53 = vsel %vm116_vm3, %v300_v12, %v299_v62  ;;  %v311_v30 = vsel %vm110_vm1, %v310_v45, %v309_v8  ;;  %v3699_v43 = vld [vmem:[#allocation2 + $0x28] sm:$0xff]  ;;  %v3718_v45 = vld [vmem:[#allocation2 + $0x58] sm:$0xff] }
  0x6e   :  { %v313_v49 = vsel %vm113_vm2, %v312_v56, %v311_v30  ;;  %v316_v3 = vrot.slane %v3374_v34, 1  ;;  %v2789_v24 = vcombine.low %v659_v47, %v663_v46  ;;  %v2790_v22 = vcombine.high %v659_v47, %v663_v46  ;;  %v3707_v12 = vld [vmem:[#allocation2 + $0x8] sm:$0xff]  ;;  %v3728_v8 = vld [vmem:[#allocation2 + $0xb8] sm:$0xff] }
  0x6f   :  { %v315_v25 = vsel %vm116_vm3, %v314_v31, %v313_v49  ;;  %v2792_v51 = vcombine.high %v660_v20, %v664_v21  ;;  %v323_v52 = vrot.slane %v3325_v59, 7  ;;  %v324_v38 = vrot.slane %v3333_v63, 6  ;;  %v3738_v30 = vld [vmem:[#allocation2 + $0xc8] sm:$0xff] }
  0x70   :  { %v303_v54 = vsel %vm119_vm4, %v302_v29, %v301_v53  ;;  %1443 = vmatprep.subr.bf16.mxu0 %v2790_v22  ;;  %v2791_v55 = vcombine.low %v660_v20, %v664_v21  ;;  %v326_v40 = vrot.slane %v3335_v1, 5  ;;  %v328_v57 = vrot.slane %v3337_v2, 4  ;;  %v3726_v29 = vld [vmem:[#allocation2 + $0xa8] sm:$0xff]  ;;  %v3745_v22 = vld [vmem:[#allocation2 + $0xd8] sm:$0xff] }
  0x71   :  { %v3680_v58 = vpack.c.bf16 %v290_v32, %v276_v36  ;;  %v305_v16 = vrot.slane %v3355_v13, 7  ;;  %1636 = vmatprep.subr.bf16.mxu1 %v2792_v51  ;;  %v325_v61 = vsel %vm107_vm0, %v324_v38, %v323_v52  ;;  %v330_v59 = vrot.slane %v3342_v5, 3  ;;  %1444 = vmatpush1.bf16.msra.mxu0 %v2789_v24  ;;  %v3736_v53 = vld [vmem:[#allocation2 + $0x88] sm:$0xff] }
  0x72   :  { %v317_v63 = vsel %vm119_vm4, %v316_v3, %v315_v25  ;;  %v327_v1 = vsel %vm110_vm1, %v326_v40, %v325_v61  ;;  %v337_v2 = vrot.slane %v3357_v14, 7  ;;  %v338_v4 = vrot.slane %v3359_v15, 6  ;;  %1637 = vmatpush1.bf16.msra.mxu1 %v2791_v55  ;;  %v3743_v24 = vld [vmem:[#allocation2 + $0x68] sm:$0xff]  ;;  %v651_v40 = vld [vmem:[#allocation5 + $0xd0] sm:$0xff] }
  0x73   :  { %1124 = vmatmul.mubr.bf16.gmra.mxu0 %v3663_v50  ;;  %v304_v17 = vsel %vm122_vm5, %v3346_v7, %v303_v54  ;;  %v329_v5 = vsel %vm113_vm2, %v328_v57, %v327_v1  ;;  %v340_v42 = vrot.slane %v3363_v18, 5  ;;  %v342_v28 = vrot.slane %v3365_v19, 4  ;;  %v3753_v38 = vld [vmem:[#allocation2 + $0xe8] sm:$0xff]  ;;  %v656_v1 = vld [vmem:[#allocation5 + $0xf8] sm:$0xff] }
  0x74   :  { %1317 = vmatmul.mubr.bf16.gmra.mxu1 %v3663_v50  ;;  %1133 = vmatprep.mubr.bf16.mxu0 %v4436_v26  ;;  %v319_v14 = vrot.slane %v3378_v35, 7  ;;  %v332_v15 = vrot.slane %v3344_v6, 2  ;;  %v339_v60 = vsel %vm107_vm0, %v338_v4, %v337_v2  ;;  %v344_v9 = vrot.slane %v3367_v23, 3  ;;  %v3720_v23 = vld [vmem:[#allocation2 + $0x98] sm:$0xff] }
  0x75   :  { %1326 = vmatprep.mubr.bf16.mxu1 %v4436_v26  ;;  %v318_v18 = vsel %vm122_vm5, %v3376_v0, %v317_v63  ;;  %v331_v19 = vsel %vm116_vm3, %v330_v59, %v329_v5  ;;  %v341_v41 = vsel %vm110_vm1, %v340_v42, %v339_v60  ;;  %v369_v62 = vrot.slane %v3691_v11, 7  ;;  %v655_v59 = vld [vmem:[#allocation5 + $0xf0] sm:$0xff]  ;;  %v652_v63 = vld [vmem:[#allocation5 + $0xd8] sm:$0xff] }
  0x76   :  { %v343_v27 = vsel %vm113_vm2, %v342_v28, %v341_v41  ;;  %v346_v6 = vrot.slane %v3374_v34, 2  ;;  %v371_v56 = vrot.slane %v3699_v43, 6  ;;  %v373_v31 = vrot.slane %v3701_v10, 5  ;;  %v3769_v28 = vld [vmem:[#allocation2 + $0x78] sm:$0xff] }
  0x77   :  { %v306_v47 = vsel %vm125_vm6, %v305_v16, %v304_v17  ;;  %v345_v46 = vsel %vm116_vm3, %v344_v9, %v343_v27  ;;  %v370_v20 = vsel %vm107_vm0, %v369_v62, %v3707_v12  ;;  %v375_v34 = vrot.slane %v3709_v44, 4  ;;  %v3775_v62 = vld [vmem:[#allocation2 + $0xf8] sm:$0xff] }
  0x78   :  { %v320_v21 = vsel %vm125_vm6, %v319_v14, %v318_v18  ;;  %v333_v36 = vsel %vm119_vm4, %v332_v15, %v331_v19  ;;  %v334_v32 = vrot.slane %v3346_v7, 1  ;;  %v372_v49 = vsel %vm110_vm1, %v371_v56, %v370_v20 }
  0x79   :  { %v348_v3 = vrot.slane %v3376_v0, 1  ;;  %v374_v25 = vsel %vm113_vm2, %v373_v31, %v372_v49  ;;  %v377_v51 = vrot.slane %v3718_v45, 3  ;;  %v383_v7 = vrot.slane %v3720_v23, 7 }
  0x7a   :  { %v347_v52 = vsel %vm119_vm4, %v346_v6, %v345_v46  ;;  %v376_v0 = vsel %vm116_vm3, %v375_v34, %v374_v25  ;;  %v385_v54 = vrot.slane %v3726_v29, 6  ;;  %v387_v55 = vrot.slane %v3728_v8, 5 }
  0x7b   :  { %1134 = vmatmul.mubr.bf16.gmra.mxu0 %v3680_v58  ;;  %v3759_v57 = vpack.c.bf16 %v320_v21, %v306_v47  ;;  %v384_v16 = vsel %vm107_vm0, %v383_v7, %v3736_v53  ;;  %v389_v61 = vrot.slane %v3738_v30, 4  ;;  %v335_v2 = vsel %vm122_vm5, %v334_v32, %v333_v36 }
  0x7c   :  { %1327 = vmatmul.mubr.bf16.gmra.mxu1 %v3680_v58  ;;  %1143 = vmatprep.mubr.bf16.mxu0 %v4436_v26  ;;  %v379_v4 = vrot.slane %v3743_v24, 2  ;;  %v386_v17 = vsel %vm110_vm1, %v385_v54, %v384_v16  ;;  %v391_v5 = vrot.slane %v3745_v22, 3  ;;  %v349_v42 = vsel %vm122_vm5, %v348_v3, %v347_v52 }
  0x7d   :  { %1336 = vmatprep.mubr.bf16.mxu1 %v4436_v26  ;;  %v378_v14 = vsel %vm119_vm4, %v377_v51, %v376_v0  ;;  %v388_v15 = vsel %vm113_vm2, %v387_v55, %v386_v17  ;;  %v393_v60 = vrot.slane %v3753_v38, 2  ;;  %v2782_v18 = vcombine.high %v651_v40, %v655_v59 }
  0x7e   :  { %v390_v9 = vsel %vm116_vm3, %v389_v61, %v388_v15  ;;  %v2783_v19 = vcombine.low %v652_v63, %v656_v1  ;;  %v2784_v41 = vcombine.high %v652_v63, %v656_v1  ;;  %v2781_v27 = vcombine.low %v651_v40, %v655_v59 }
  0x7f   :  { %v399_v6 = vrot.slane %v3707_v12, 1  ;;  %v401_v56 = vrot.slane %v3699_v43, 7  ;;  %v403_v31 = vrot.slane %v3701_v10, 6  ;;  %v336_v47 = vsel %vm125_vm6, %v3355_v13, %v335_v2  ;;  %1445 = vmatprep.subr.bf16.mxu0 %v2782_v18 }
  0x80   :  { %v350_v46 = vsel %vm125_vm6, %v3378_v35, %v349_v42  ;;  %v381_v20 = vrot.slane %v3769_v28, 1  ;;  %v392_v34 = vsel %vm119_vm4, %v391_v5, %v390_v9  ;;  %1638 = vmatprep.subr.bf16.mxu1 %v2784_v41  ;;  %v380_v21 = vsel %vm122_vm5, %v379_v4, %v378_v14  ;;  %1446 = vmatpush1.bf16.msra.mxu0 %v2781_v27 }
  0x81   :  { %1639 = vmatpush1.bf16.msra.mxu1 %v2783_v19  ;;  %v400_v36 = vsel %vm107_vm0, %v3691_v11, %v399_v6  ;;  %v405_v32 = vrot.slane %v3709_v44, 5  ;;  %v413_v13 = vrot.slane %v3736_v53, 1  ;;  %v395_v35 = vrot.slane %v3775_v62, 1 }
  0x82   :  { %v402_v49 = vsel %vm110_vm1, %v401_v56, %v400_v36  ;;  %v415_v3 = vrot.slane %v3726_v29, 7  ;;  %v417_v25 = vrot.slane %v3728_v8, 6  ;;  %v394_v51 = vsel %vm122_vm5, %v393_v60, %v392_v34  ;;  %v643_v56 = vld [vmem:[#allocation5 + $0x90] sm:$0xff]  ;;  %v648_v36 = vld [vmem:[#allocation5 + $0xb8] sm:$0xff] }
  0x83   :  { %1144 = vmatmul.mubr.bf16.gmra.mxu0 %v3759_v57  ;;  %v404_v7 = vsel %vm113_vm2, %v403_v31, %v402_v49  ;;  %v414_v52 = vsel %vm107_vm0, %v3720_v23, %v413_v13  ;;  %v3803_v0 = vpack.c.bf16 %v350_v46, %v336_v47  ;;  %v407_v54 = vrot.slane %v3718_v45, 4  ;;  %v647_v31 = vld [vmem:[#allocation5 + $0xb0] sm:$0xff] }
  0x84   :  { %1337 = vmatmul.mubr.bf16.gmra.mxu1 %v3759_v57  ;;  %1153 = vmatprep.mubr.bf16.mxu0 %v4436_v26  ;;  %v416_v55 = vsel %vm110_vm1, %v415_v3, %v414_v52  ;;  %v419_v40 = vrot.slane %v3738_v30, 5  ;;  %v406_v16 = vsel %vm116_vm3, %v405_v32, %v404_v7  ;;  %v429_v59 = vrot.slane %v3707_v12, 2 }
  0x85   :  { %1346 = vmatprep.mubr.bf16.mxu1 %v4436_v26  ;;  %v418_v61 = vsel %vm113_vm2, %v417_v25, %v416_v55  ;;  %v430_v63 = vrot.slane %v3691_v11, 1  ;;  %v382_v1 = vsel %vm125_vm6, %v381_v20, %v380_v21  ;;  %v396_v2 = vsel %vm125_vm6, %v395_v35, %v394_v51  ;;  %v644_v21 = vld [vmem:[#allocation5 + $0x98] sm:$0xff] }
  0x86   :  { %v433_v4 = vrot.slane %v3701_v10, 7  ;;  %v409_v17 = vrot.slane %v3743_v24, 3  ;;  %v411_v5 = vrot.slane %v3769_v28, 2  ;;  %v421_v42 = vrot.slane %v3745_v22, 4 }
  0x87   :  { %v431_v14 = vsel %vm107_vm0, %v430_v63, %v429_v59  ;;  %v408_v15 = vsel %vm119_vm4, %v407_v54, %v406_v16  ;;  %v420_v60 = vsel %vm116_vm3, %v419_v40, %v418_v61  ;;  %v435_v18 = vrot.slane %v3709_v44, 6 }
  0x88   :  { %v432_v9 = vsel %vm110_vm1, %v3699_v43, %v431_v14  ;;  %v3825_v19 = vpack.c.bf16 %v396_v2, %v382_v1  ;;  %v443_v27 = vrot.slane %v3736_v53, 2  ;;  %v444_v6 = vrot.slane %v3720_v23, 1 }
  0x89   :  { %v434_v41 = vsel %vm113_vm2, %v433_v4, %v432_v9  ;;  %v423_v47 = vrot.slane %v3753_v38, 3  ;;  %v425_v46 = vrot.slane %v3775_v62, 2  ;;  %v447_v20 = vrot.slane %v3728_v8, 7 }
  0x8a   :  { %v449_v34 = vrot.slane %v3738_v30, 6  ;;  %v410_v32 = vsel %vm122_vm5, %v409_v17, %v408_v15  ;;  %v422_v13 = vsel %vm119_vm4, %v421_v42, %v420_v60  ;;  %v437_v35 = vrot.slane %v3718_v45, 5 }
  0x8b   :  { %1154 = vmatmul.mubr.bf16.gmra.mxu0 %v3803_v0  ;;  %v445_v49 = vsel %vm107_vm0, %v444_v6, %v443_v27  ;;  %v436_v3 = vsel %vm116_vm3, %v435_v18, %v434_v41  ;;  %v451_v51 = vrot.slane %v3745_v22, 5  ;;  %v2773_v7 = vcombine.low %v643_v56, %v647_v31 }
  0x8c   :  { %1347 = vmatmul.mubr.bf16.gmra.mxu1 %v3803_v0  ;;  %1163 = vmatprep.mubr.bf16.mxu0 %v4436_v26  ;;  %v446_v25 = vsel %vm110_vm1, %v3726_v29, %v445_v49  ;;  %v439_v52 = vrot.slane %v3743_v24, 4  ;;  %v2774_v55 = vcombine.high %v643_v56, %v647_v31  ;;  %v2775_v40 = vcombine.low %v644_v21, %v648_v36 }
  0x8d   :  { %1356 = vmatprep.mubr.bf16.mxu1 %v4436_v26  ;;  %v448_v54 = vsel %vm113_vm2, %v447_v20, %v446_v25  ;;  %v2776_v61 = vcombine.high %v644_v21, %v648_v36  ;;  %v459_v59 = vrot.slane %v3707_v12, 3  ;;  %v460_v63 = vrot.slane %v3691_v11, 2 }
  0x8e   :  { %v450_v16 = vsel %vm116_vm3, %v449_v34, %v448_v54  ;;  %v424_v1 = vsel %vm122_vm5, %v423_v47, %v422_v13  ;;  %v438_v2 = vsel %vm119_vm4, %v437_v35, %v436_v3  ;;  %v453_v4 = vrot.slane %v3753_v38, 4  ;;  %1447 = vmatprep.subr.bf16.mxu0 %v2774_v55 }
  0x8f   :  { %v462_v17 = vrot.slane %v3699_v43, 1  ;;  %v412_v42 = vsel %vm125_vm6, %v411_v5, %v410_v32  ;;  %v452_v14 = vsel %vm119_vm4, %v451_v51, %v450_v16  ;;  %1640 = vmatprep.subr.bf16.mxu1 %v2776_v61  ;;  %1448 = vmatpush1.bf16.msra.mxu0 %v2773_v7  ;;  %v461_v15 = vsel %vm107_vm0, %v460_v63, %v459_v59 }
  0x90   :  { %v465_v60 = vrot.slane %v3709_v44, 7  ;;  %v441_v9 = vrot.slane %v3769_v28, 3  ;;  %1641 = vmatpush1.bf16.msra.mxu1 %v2775_v40  ;;  %v473_v41 = vrot.slane %v3736_v53, 3  ;;  %v474_v27 = vrot.slane %v3720_v23, 2 }
  0x91   :  { %v463_v18 = vsel %vm110_vm1, %v462_v17, %v461_v15  ;;  %v426_v5 = vsel %vm125_vm6, %v425_v46, %v424_v1  ;;  %v440_v6 = vsel %vm122_vm5, %v439_v52, %v438_v2  ;;  %v476_v31 = vrot.slane %v3726_v29, 1 }
  0x92   :  { %v464_v56 = vsel %vm113_vm2, %v3701_v10, %v463_v18  ;;  %v454_v47 = vsel %vm122_vm5, %v453_v4, %v452_v14  ;;  %v455_v20 = vrot.slane %v3775_v62, 3  ;;  %v467_v34 = vrot.slane %v3718_v45, 6  ;;  %v639_v14 = vld [vmem:[#allocation5 + $0x70] sm:$0xff] }
  0x93   :  { %1164 = vmatmul.mubr.bf16.gmra.mxu0 %v3825_v19  ;;  %v475_v21 = vsel %vm107_vm0, %v474_v27, %v473_v41  ;;  %v466_v36 = vsel %vm116_vm3, %v465_v60, %v464_v56  ;;  %v479_v32 = vrot.slane %v3738_v30, 7  ;;  %v489_v13 = vrot.slane %v3707_v12, 4  ;;  %v636_v41 = vld [vmem:[#allocation5 + $0x58] sm:$0xff] }
  0x94   :  { %1357 = vmatmul.mubr.bf16.gmra.mxu1 %v3825_v19  ;;  %1173 = vmatprep.mubr.bf16.mxu0 %v4436_v26  ;;  %v477_v46 = vsel %vm110_vm1, %v476_v31, %v475_v21  ;;  %v3879_v35 = vpack.c.bf16 %v426_v5, %v412_v42  ;;  %v490_v3 = vrot.slane %v3691_v11, 3  ;;  %v492_v25 = vrot.slane %v3699_v43, 2  ;;  %v635_v42 = vld [vmem:[#allocation5 + $0x50] sm:$0xff]  ;;  %v640_v27 = vld [vmem:[#allocation5 + $0x78] sm:$0xff] }
  0x95   :  { %1366 = vmatprep.mubr.bf16.mxu1 %v4436_v26  ;;  %v478_v49 = vsel %vm113_vm2, %v3728_v8, %v477_v46  ;;  %v442_v51 = vsel %vm125_vm6, %v441_v9, %v440_v6  ;;  %v469_v7 = vrot.slane %v3743_v24, 5  ;;  %v494_v52 = vrot.slane %v3701_v10, 1 }
  0x96   :  { %v456_v54 = vsel %vm125_vm6, %v455_v20, %v454_v47  ;;  %v468_v55 = vsel %vm119_vm4, %v467_v34, %v466_v36  ;;  %v481_v40 = vrot.slane %v3745_v22, 6  ;;  %v491_v16 = vsel %vm107_vm0, %v490_v3, %v489_v13 }
  0x97   :  { %v480_v61 = vsel %vm116_vm3, %v479_v32, %v478_v49  ;;  %v493_v59 = vsel %vm110_vm1, %v492_v25, %v491_v16  ;;  %v503_v63 = vrot.slane %v3736_v53, 4  ;;  %v504_v1 = vrot.slane %v3720_v23, 3 }
  0x98   :  { %v471_v2 = vrot.slane %v3769_v28, 4  ;;  %v506_v4 = vrot.slane %v3726_v29, 2  ;;  %v508_v17 = vrot.slane %v3728_v8, 1  ;;  %v3902_v15 = vpack.c.bf16 %v456_v54, %v442_v51 }
  0x99   :  { %v483_v60 = vrot.slane %v3753_v38, 5  ;;  %v495_v9 = vsel %vm113_vm2, %v494_v52, %v493_v59  ;;  %v505_v18 = vsel %vm107_vm0, %v504_v1, %v503_v63  ;;  %v470_v5 = vsel %vm122_vm5, %v469_v7, %v468_v55 }
  0x9a   :  { %v482_v6 = vsel %vm119_vm4, %v481_v40, %v480_v61  ;;  %v497_v56 = vrot.slane %v3718_v45, 7  ;;  %v507_v31 = vsel %vm110_vm1, %v506_v4, %v505_v18  ;;  %v511_v20 = vrot.slane %v3745_v22, 7 }
  0x9b   :  { %1174 = vmatmul.mubr.bf16.gmra.mxu0 %v3879_v35  ;;  %v509_v47 = vsel %vm113_vm2, %v508_v17, %v507_v31  ;;  %v2765_v34 = vcombine.low %v635_v42, %v639_v14  ;;  %v2766_v21 = vcombine.high %v635_v42, %v639_v14  ;;  %v496_v36 = vsel %vm116_vm3, %v3709_v44, %v495_v9 }
  0x9c   :  { %1367 = vmatmul.mubr.bf16.gmra.mxu1 %v3879_v35  ;;  %1183 = vmatprep.mubr.bf16.mxu0 %v4436_v26  ;;  %v510_v46 = vsel %vm116_vm3, %v3738_v30, %v509_v47  ;;  %v2767_v32 = vcombine.low %v636_v41, %v640_v27  ;;  %v2768_v13 = vcombine.high %v636_v41, %v640_v27  ;;  %v485_v49 = vrot.slane %v3775_v62, 4 }
  0x9d   :  { %1376 = vmatprep.mubr.bf16.mxu1 %v4436_v26  ;;  %1449 = vmatprep.subr.bf16.mxu0 %v2766_v21  ;;  %v519_v3 = vrot.slane %v3707_v12, 5  ;;  %v520_v25 = vrot.slane %v3691_v11, 4  ;;  %v522_v51 = vrot.slane %v3699_v43, 3  ;;  %v472_v7 = vsel %vm125_vm6, %v471_v2, %v470_v5 }
  0x9e   :  { %v484_v52 = vsel %vm122_vm5, %v483_v60, %v482_v6  ;;  %v499_v54 = vrot.slane %v3743_v24, 6  ;;  %v513_v55 = vrot.slane %v3753_v38, 6  ;;  %1642 = vmatprep.subr.bf16.mxu1 %v2768_v13  ;;  %1450 = vmatpush1.bf16.msra.mxu0 %v2765_v34  ;;  %v498_v40 = vsel %vm119_vm4, %v497_v56, %v496_v36 }
  0x9f   :  { %v512_v16 = vsel %vm119_vm4, %v511_v20, %v510_v46  ;;  %1643 = vmatpush1.bf16.msra.mxu1 %v2767_v32  ;;  %v521_v61 = vsel %vm107_vm0, %v520_v25, %v519_v3  ;;  %v533_v59 = vrot.slane %v3736_v53, 5  ;;  %v501_v63 = vrot.slane %v3769_v28, 5 }
  0xa0   :  { %v524_v1 = vrot.slane %v3701_v10, 2  ;;  %v534_v2 = vrot.slane %v3720_v23, 4  ;;  %v536_v4 = vrot.slane %v3726_v29, 3  ;;  %v486_v17 = vsel %vm125_vm6, %v485_v49, %v484_v52 }
  0xa1   :  { %v515_v42 = vrot.slane %v3775_v62, 5  ;;  %v523_v14 = vsel %vm110_vm1, %v522_v51, %v521_v61  ;;  %v538_v60 = vrot.slane %v3728_v8, 2  ;;  %v500_v9 = vsel %vm122_vm5, %v499_v54, %v498_v40  ;;  %v627_v51 = vld [vmem:[#allocation5 + $0x10] sm:$0xff]  ;;  %v632_v61 = vld [vmem:[#allocation5 + $0x38] sm:$0xff] }
  0xa2   :  { %v514_v18 = vsel %vm122_vm5, %v513_v55, %v512_v16  ;;  %v535_v41 = vsel %vm107_vm0, %v534_v2, %v533_v59  ;;  %v526_v27 = vrot.slane %v3709_v44, 1  ;;  %v549_v6 = vrot.slane %v3707_v12, 6  ;;  %v628_v16 = vld [vmem:[#allocation5 + $0x18] sm:$0xff] }
  0xa3   :  { %1184 = vmatmul.mubr.bf16.gmra.mxu0 %v3902_v15  ;;  %v537_v5 = vsel %vm110_vm1, %v536_v4, %v535_v41  ;;  %v550_v56 = vrot.slane %v3691_v11, 5  ;;  %v3949_v31 = vpack.c.bf16 %v486_v17, %v472_v7  ;;  %v525_v47 = vsel %vm113_vm2, %v524_v1, %v523_v14  ;;  %v631_v7 = vld [vmem:[#allocation5 + $0x30] sm:$0xff] }
  0xa4   :  { %1377 = vmatmul.mubr.bf16.gmra.mxu1 %v3902_v15  ;;  %1193 = vmatprep.mubr.bf16.mxu0 %v4436_v26  ;;  %v540_v20 = vrot.slane %v3738_v30, 1  ;;  %v502_v34 = vsel %vm125_vm6, %v501_v63, %v500_v9  ;;  %v516_v21 = vsel %vm125_vm6, %v515_v42, %v514_v18  ;;  %v539_v36 = vsel %vm113_vm2, %v538_v60, %v537_v5 }
  0xa5   :  { %1386 = vmatprep.mubr.bf16.mxu1 %v4436_v26  ;;  %v552_v46 = vrot.slane %v3699_v43, 4  ;;  %v563_v32 = vrot.slane %v3736_v53, 6  ;;  %v527_v13 = vsel %vm116_vm3, %v526_v27, %v525_v47  ;;  %v551_v49 = vsel %vm107_vm0, %v550_v56, %v549_v6 }
  0xa6   :  { %v564_v3 = vrot.slane %v3720_v23, 5  ;;  %v566_v25 = vrot.slane %v3726_v29, 4  ;;  %v3963_v52 = vpack.c.bf16 %v516_v21, %v502_v34  ;;  %v529_v54 = vrot.slane %v3743_v24, 7 }
  0xa7   :  { %v531_v55 = vrot.slane %v3769_v28, 6  ;;  %v541_v40 = vsel %vm116_vm3, %v540_v20, %v539_v36  ;;  %v543_v59 = vrot.slane %v3753_v38, 7  ;;  %v554_v63 = vrot.slane %v3701_v10, 3 }
  0xa8   :  { %v565_v1 = vsel %vm107_vm0, %v564_v3, %v563_v32  ;;  %v568_v2 = vrot.slane %v3728_v8, 3  ;;  %v528_v4 = vsel %vm119_vm4, %v3718_v45, %v527_v13  ;;  %v553_v17 = vsel %vm110_vm1, %v552_v46, %v551_v49 }
  0xa9   :  { %v567_v42 = vsel %vm110_vm1, %v566_v25, %v565_v1  ;;  %v2757_v14 = vcombine.low %v627_v51, %v631_v7  ;;  %v542_v60 = vsel %vm119_vm4, %v3745_v22, %v541_v40  ;;  %v556_v9 = vrot.slane %v3709_v44, 2 }
  0xaa   :  { %v2758_v18 = vcombine.high %v627_v51, %v631_v7  ;;  %v2759_v41 = vcombine.low %v628_v16, %v632_v61  ;;  %v570_v27 = vrot.slane %v3738_v30, 2  ;;  %v2760_v5 = vcombine.high %v628_v16, %v632_v61 }
  0xab   :  { %1194 = vmatmul.mubr.bf16.gmra.mxu0 %v3949_v31  ;;  %v579_v6 = vrot.slane %v3707_v12, 7  ;;  %v580_v56 = vrot.slane %v3691_v11, 6  ;;  %v530_v47 = vsel %vm122_vm5, %v529_v54, %v528_v4  ;;  %v545_v20 = vrot.slane %v3775_v62, 6 }
  0xac   :  { %1387 = vmatmul.mubr.bf16.gmra.mxu1 %v3949_v31  ;;  %1203 = vmatprep.mubr.bf16.mxu0 %v4436_v26  ;;  %v555_v34 = vsel %vm113_vm2, %v554_v63, %v553_v17  ;;  %v569_v21 = vsel %vm113_vm2, %v568_v2, %v567_v42  ;;  %v544_v36 = vsel %vm122_vm5, %v543_v59, %v542_v60  ;;  %v558_v46 = vrot.slane %v3718_v45, 1 }
  0xad   :  { %1396 = vmatprep.mubr.bf16.mxu1 %v4436_v26  ;;  %1451 = vmatprep.subr.bf16.mxu0 %v2758_v18  ;;  %v582_v32 = vrot.slane %v3699_v43, 5  ;;  %v572_v12 = vrot.slane %v3745_v22, 1  ;;  %v581_v11 = vsel %vm107_vm0, %v580_v56, %v579_v6  ;;  %v593_v13 = vrot.slane %v3736_v53, 7 }
  0xae   :  { %1644 = vmatprep.subr.bf16.mxu1 %v2760_v5  ;;  %1452 = vmatpush1.bf16.msra.mxu0 %v2757_v14  ;;  %v594_v49 = vrot.slane %v3720_v23, 6  ;;  %v532_v3 = vsel %vm125_vm6, %v531_v55, %v530_v47  ;;  %v557_v25 = vsel %vm116_vm3, %v556_v9, %v555_v34  ;;  %v571_v51 = vsel %vm116_vm3, %v570_v27, %v569_v21 }
  0xaf   :  { %1645 = vmatpush1.bf16.msra.mxu1 %v2759_v41  ;;  %v596_v7 = vrot.slane %v3726_v29, 5  ;;  %v546_v43 = vsel %vm125_vm6, %v545_v20, %v544_v36  ;;  %v584_v53 = vrot.slane %v3701_v10, 4  ;;  %v598_v54 = vrot.slane %v3728_v8, 4 }
  0xb0   :  { %v595_v23 = vsel %vm107_vm0, %v594_v49, %v593_v13  ;;  %v583_v55 = vsel %vm110_vm1, %v582_v32, %v581_v11  ;;  %v559_v29 = vsel %vm119_vm4, %v558_v46, %v557_v25  ;;  %v573_v16 = vsel %vm119_vm4, %v572_v12, %v571_v51 }
  0xb1   :  { %v597_v40 = vsel %vm110_vm1, %v596_v7, %v595_v23  ;;  %v4012_v61 = vpack.c.bf16 %v546_v43, %v532_v3  ;;  %v586_v59 = vrot.slane %v3709_v44, 3  ;;  %v600_v10 = vrot.slane %v3738_v30, 3 }
  0xb2   :  { %v561_v63 = vrot.slane %v3769_v28, 7  ;;  %v575_v8 = vrot.slane %v3775_v62, 7  ;;  %v585_v1 = vsel %vm113_vm2, %v584_v53, %v583_v55  ;;  %v599_v2 = vsel %vm113_vm2, %v598_v54, %v597_v40 }
  0xb3   :  { %1204 = vmatmul.mubr.bf16.gmra.mxu0 %v3963_v52  ;;  %v560_v4 = vsel %vm122_vm5, %v3743_v24, %v559_v29  ;;  %v574_v17 = vsel %vm122_vm5, %v3753_v38, %v573_v16  ;;  %v588_v42 = vrot.slane %v3718_v45, 2  ;;  %v602_v44 = vrot.slane %v3745_v22, 2 }
  0xb4   :  { %1397 = vmatmul.mubr.bf16.gmra.mxu1 %v3963_v52  ;;  %1213 = vmatprep.mubr.bf16.mxu0 %v4436_v26  ;;  %v587_v30 = vsel %vm116_vm3, %v586_v59, %v585_v1  ;;  %v601_v14 = vsel %vm116_vm3, %v600_v10, %v599_v2  ;;  %v562_v60 = vsel %vm125_vm6, %v561_v63, %v560_v4  ;;  %v590_v45 = vrot.slane %v3743_v24, 1 }
  0xb5   :  { %1406 = vmatprep.mubr.bf16.mxu1 %v4436_v26  ;;  %v576_v9 = vsel %vm125_vm6, %v575_v8, %v574_v17  ;;  %v604_v22 = vrot.slane %v3753_v38, 1  ;;  %v589_v18 = vsel %vm119_vm4, %v588_v42, %v587_v30  ;;  %v603_v41 = vsel %vm119_vm4, %v602_v44, %v601_v14 }
  0xb6   :  { %v4038_v27 = vpack.c.bf16 %v576_v9, %v562_v60  ;;  %v591_v5 = vsel %vm122_vm5, %v590_v45, %v589_v18 }
  0xb7   :  { %v605_v6 = vsel %vm122_vm5, %v604_v22, %v603_v41  ;;  %v592_v24 = vsel %vm125_vm6, %v3769_v28, %v591_v5 }
  0xb8   :  { %v606_v38 = vsel %vm125_vm6, %v3775_v62, %v605_v6 }
  0xb9   :  { %v4050_v56 = vpack.c.bf16 %v606_v38, %v592_v24 }
  0xbb   :  { %1214 = vmatmul.mubr.bf16.gmra.mxu0 %v4012_v61 }
  0xbc   :  { %1407 = vmatmul.mubr.bf16.gmra.mxu1 %v4012_v61  ;;  %1223 = vmatprep.mubr.bf16.mxu0 %v4436_v26 }
  0xbd   :  { %1416 = vmatprep.mubr.bf16.mxu1 %v4436_v26 }
  0xc3   :  { %1224 = vmatmul.mubr.bf16.gmra.mxu0 %v4038_v27 }
  0xc4   :  { %1417 = vmatmul.mubr.bf16.gmra.mxu1 %v4038_v27  ;;  %1233 = vmatprep.mubr.bf16.mxu0 %v4436_v26 }
  0xc5   :  { %1426 = vmatprep.mubr.bf16.mxu1 %v4436_v26 }
  0xcb   :  { %1234 = vmatmul.mubr.bf16.gmra.mxu0 %v4050_v56 }
  0xcc   :  { %1427 = vmatmul.mubr.bf16.gmra.mxu1 %v4050_v56  ;;  %1469 = vmatprep.mubr.bf16.mxu0 %v4436_v26 }
  0xcd   :  { %1662 = vmatprep.mubr.bf16.mxu1 %v4436_v26 }
  0xd3   :  { %1470 = vmatmul.mubr.bf16.vlgmr.msra.gmra.mxu0 %v3508_v33 }
  0xd4   :  { %1663 = vmatmul.mubr.bf16.vlgmr.msra.gmra.mxu1 %v3508_v33  ;;  %1479 = vmatprep.mubr.bf16.mxu0 %v4436_v26  ;;  %v691_v33 = vlaneseq }
  0xd5   :  { %1672 = vmatprep.mubr.bf16.mxu1 %v4436_v26 }
  0xdb   :  { %1480 = vmatmul.mubr.bf16.gmra.mxu0 %v3516_v37 }
  0xdc   :  { %1673 = vmatmul.mubr.bf16.gmra.mxu1 %v3516_v37  ;;  %1489 = vmatprep.mubr.bf16.mxu0 %v4436_v26  ;;  %v4084_v37 = vshrl.u32 %v691_v33, 7 }
  0xdd   :  { %1682 = vmatprep.mubr.bf16.mxu1 %v4436_v26 }
  0xe3   :  { %1490 = vmatmul.mubr.bf16.gmra.mxu0 %v3588_v39 }
  0xe4   :  { %1683 = vmatmul.mubr.bf16.gmra.mxu1 %v3588_v39  ;;  %1499 = vmatprep.mubr.bf16.mxu0 %v4436_v26  ;;  %v693_v39 = vsub.s32 0, %v4084_v37 }
  0xe5   :  { %1692 = vmatprep.mubr.bf16.mxu1 %v4436_v26 }
  0xeb   :  { %1500 = vmatmul.mubr.bf16.gmra.mxu0 %v3612_v48 }
  0xec   :  { %1693 = vmatmul.mubr.bf16.gmra.mxu1 %v3612_v48  ;;  %1509 = vmatprep.mubr.bf16.mxu0 %v4436_v26  ;;  %v697_v48 = vsub.s32 1, %v4084_v37 }
  0xed   :  { %1702 = vmatprep.mubr.bf16.mxu1 %v4436_v26 }
  0xf3   :  { %1510 = vmatmul.mubr.bf16.gmra.mxu0 %v3663_v50 }
  0xf4   :  { %1703 = vmatmul.mubr.bf16.gmra.mxu1 %v3663_v50  ;;  %1519 = vmatprep.mubr.bf16.mxu0 %v4436_v26  ;;  %v4092_v50 = vld [vmem:[#allocation7] sm:$0xff] }
  0xf5   :  { %1712 = vmatprep.mubr.bf16.mxu1 %v4436_v26  ;;  %v4097_v28 = vrot.slane %v4092_v50, %v693_v39  ;;  %v4100_v62 = vrot.slane %v4092_v50, %v697_v48 }
  0xfb   :  { %1520 = vmatmul.mubr.bf16.gmra.mxu0 %v3680_v58 }
  0xfc   :  { %1713 = vmatmul.mubr.bf16.gmra.mxu1 %v3680_v58  ;;  %1529 = vmatprep.mubr.bf16.mxu0 %v4436_v26  ;;  %v701_v58 = vsub.s32 2, %v4084_v37 }
  0xfd   :  { %1722 = vmatprep.mubr.bf16.mxu1 %v4436_v26 }
  0xfe   :  { %v4103_v47 = vrot.slane %v4092_v50, %v701_v58 }
 0x103   :  { %1530 = vmatmul.mubr.bf16.gmra.mxu0 %v3759_v57 }
 0x104   :  { %1723 = vmatmul.mubr.bf16.gmra.mxu1 %v3759_v57  ;;  %1539 = vmatprep.mubr.bf16.mxu0 %v4436_v26  ;;  %v705_v57 = vsub.s32 3, %v4084_v37 }
 0x105   :  { %1732 = vmatprep.mubr.bf16.mxu1 %v4436_v26 }
 0x106   :  { %v4107_v20 = vrot.slane %v4092_v50, %v705_v57 }
 0x10b   :  { %1540 = vmatmul.mubr.bf16.gmra.mxu0 %v3803_v0 }
 0x10c   :  { %1733 = vmatmul.mubr.bf16.gmra.mxu1 %v3803_v0  ;;  %1549 = vmatprep.mubr.bf16.mxu0 %v4436_v26 }
 0x10d   :  { %1742 = vmatprep.mubr.bf16.mxu1 %v4436_v26 }
 0x113   :  { %v1085_v0 = vpop.f32.mrf.mxu0  ;;  %1550 = vmatmul.mubr.bf16.gmra.mxu0 %v3825_v19 }
 0x114   :  { %v1278_v34 = vpop.f32.mrf.mxu1  ;;  %1743 = vmatmul.mubr.bf16.gmra.mxu1 %v3825_v19  ;;  %1559 = vmatprep.mubr.bf16.mxu0 %v4436_v26  ;;  %v1086_v36 = vadd.f32 %v1085_v0, %v4097_v28 }
 0x115   :  { %v1087_v21 = vpop.f32.mrf.mxu0  ;;  %1752 = vmatprep.mubr.bf16.mxu1 %v4436_v26  ;;  %v1279_v12 = vadd.f32 %v1278_v34, %v4103_v47 }
 0x116   :  { %v1088_v46 = vadd.f32 %v1087_v21, %v4100_v62  ;;  %v1280_v32 = vpop.f32.mrf.mxu1 }
 0x117   :  { %v1281_v11 = vadd.f32 %v1280_v32, %v4107_v20  ;;  %v1089_v13 = vpop.f32.mrf.mxu0 }
 0x118   :  { %v2945_v49 = vpack.c.bf16 %v1088_v46, %v1086_v36  ;;  %v1282_v3 = vpop.f32.mrf.mxu1  ;;  %v1090_v19 = vadd.f32 %v1089_v13, %v4097_v28 }
 0x119   :  { %v2946_v25 = vpack.c.bf16 %v1281_v11, %v1279_v12  ;;  %v1091_v51 = vpop.f32.mrf.mxu0  ;;  %v1283_v53 = vadd.f32 %v1282_v3, %v4103_v47 }
 0x11a   :  { %2207 = vst [vmem:[#allocation8] sm:$0xff] %v2945_v49  ;;  %v1092_v7 = vadd.f32 %v1091_v51, %v4100_v62  ;;  %v1284_v43 = vpop.f32.mrf.mxu1 }
 0x11b   :  { %2208 = vst [vmem:[#allocation8 + $0x8] sm:$0xff] %v2946_v25  ;;  %v1285_v23 = vadd.f32 %v1284_v43, %v4107_v20  ;;  %v1095_v54 = vpop.f32.mrf.mxu0  ;;  %1560 = vmatmul.mubr.bf16.gmra.mxu0 %v3879_v35 }
 0x11c   :  { %v2947_v55 = vpack.c.bf16 %v1092_v7, %v1090_v19  ;;  %v1288_v40 = vpop.f32.mrf.mxu1  ;;  %1753 = vmatmul.mubr.bf16.gmra.mxu1 %v3879_v35  ;;  %1569 = vmatprep.mubr.bf16.mxu0 %v4436_v26  ;;  %v1096_v59 = vadd.f32 %v1095_v54, %v4097_v28 }
 0x11d   :  { %v2948_v29 = vpack.c.bf16 %v1285_v23, %v1283_v53  ;;  %v1097_v16 = vpop.f32.mrf.mxu0  ;;  %1762 = vmatprep.mubr.bf16.mxu1 %v4436_v26  ;;  %v1289_v8 = vadd.f32 %v1288_v40, %v4103_v47 }
 0x11e   :  { %2209 = vst [vmem:[#allocation8 + $0x10] sm:$0xff] %v2947_v55  ;;  %v1098_v10 = vadd.f32 %v1097_v16, %v4100_v62  ;;  %v1290_v63 = vpop.f32.mrf.mxu1 }
 0x11f   :  { %2210 = vst [vmem:[#allocation8 + $0x18] sm:$0xff] %v2948_v29  ;;  %v1291_v1 = vadd.f32 %v1290_v63, %v4107_v20  ;;  %v1099_v2 = vpop.f32.mrf.mxu0 }
 0x120   :  { %v2949_v4 = vpack.c.bf16 %v1098_v10, %v1096_v59  ;;  %v1292_v35 = vpop.f32.mrf.mxu1  ;;  %v1100_v44 = vadd.f32 %v1099_v2, %v4097_v28 }
 0x121   :  { %v2950_v17 = vpack.c.bf16 %v1291_v1, %v1289_v8  ;;  %v1101_v42 = vpop.f32.mrf.mxu0  ;;  %v1293_v60 = vadd.f32 %v1292_v35, %v4103_v47 }
 0x122   :  { %2211 = vst [vmem:[#allocation8 + $0x20] sm:$0xff] %v2949_v4  ;;  %v1102_v30 = vadd.f32 %v1101_v42, %v4100_v62  ;;  %v1294_v14 = vpop.f32.mrf.mxu1 }
 0x123   :  { %2212 = vst [vmem:[#allocation8 + $0x28] sm:$0xff] %v2950_v17  ;;  %v1295_v9 = vadd.f32 %v1294_v14, %v4107_v20  ;;  %v1105_v45 = vpop.f32.mrf.mxu0  ;;  %1570 = vmatmul.mubr.bf16.gmra.mxu0 %v3902_v15 }
 0x124   :  { %v2951_v22 = vpack.c.bf16 %v1102_v30, %v1100_v44  ;;  %v1298_v18 = vpop.f32.mrf.mxu1  ;;  %1763 = vmatmul.mubr.bf16.gmra.mxu1 %v3902_v15  ;;  %1579 = vmatprep.mubr.bf16.mxu0 %v4436_v26  ;;  %v1106_v6 = vadd.f32 %v1105_v45, %v4097_v28 }
 0x125   :  { %v2952_v41 = vpack.c.bf16 %v1295_v9, %v1293_v60  ;;  %v1107_v5 = vpop.f32.mrf.mxu0  ;;  %1772 = vmatprep.mubr.bf16.mxu1 %v4436_v26  ;;  %v1299_v33 = vadd.f32 %v1298_v18, %v4103_v47 }
 0x126   :  { %2213 = vst [vmem:[#allocation8 + $0x30] sm:$0xff] %v2951_v22  ;;  %v1108_v24 = vadd.f32 %v1107_v5, %v4100_v62  ;;  %v1300_v38 = vpop.f32.mrf.mxu1 }
 0x127   :  { %2214 = vst [vmem:[#allocation8 + $0x38] sm:$0xff] %v2952_v41  ;;  %v1301_v39 = vadd.f32 %v1300_v38, %v4107_v20  ;;  %v1109_v48 = vpop.f32.mrf.mxu0 }
 0x128   :  { %v2953_v58 = vpack.c.bf16 %v1108_v24, %v1106_v6  ;;  %v1302_v15 = vpop.f32.mrf.mxu1  ;;  %v1110_v34 = vadd.f32 %v1109_v48, %v4097_v28 }
 0x129   :  { %v2954_v57 = vpack.c.bf16 %v1301_v39, %v1299_v33  ;;  %v1111_v0 = vpop.f32.mrf.mxu0  ;;  %v1303_v46 = vadd.f32 %v1302_v15, %v4103_v47 }
 0x12a   :  { %2215 = vst [vmem:[#allocation8 + $0x40] sm:$0xff] %v2953_v58  ;;  %v1112_v21 = vadd.f32 %v1111_v0, %v4100_v62  ;;  %v1304_v36 = vpop.f32.mrf.mxu1 }
 0x12b   :  { %2216 = vst [vmem:[#allocation8 + $0x48] sm:$0xff] %v2954_v57  ;;  %v1305_v32 = vadd.f32 %v1304_v36, %v4107_v20  ;;  %v1115_v12 = vpop.f32.mrf.mxu0  ;;  %1580 = vmatmul.mubr.bf16.gmra.mxu0 %v3949_v31 }
 0x12c   :  { %v2955_v11 = vpack.c.bf16 %v1112_v21, %v1110_v34  ;;  %v1308_v13 = vpop.f32.mrf.mxu1  ;;  %1773 = vmatmul.mubr.bf16.gmra.mxu1 %v3949_v31  ;;  %1589 = vmatprep.mubr.bf16.mxu0 %v4436_v26  ;;  %v1116_v25 = vadd.f32 %v1115_v12, %v4097_v28 }
 0x12d   :  { %v2956_v49 = vpack.c.bf16 %v1305_v32, %v1303_v46  ;;  %v1117_v3 = vpop.f32.mrf.mxu0  ;;  %1782 = vmatprep.mubr.bf16.mxu1 %v4436_v26  ;;  %v1309_v7 = vadd.f32 %v1308_v13, %v4103_v47 }
 0x12e   :  { %2217 = vst [vmem:[#allocation8 + $0x50] sm:$0xff] %v2955_v11  ;;  %v1118_v51 = vadd.f32 %v1117_v3, %v4100_v62  ;;  %v1310_v19 = vpop.f32.mrf.mxu1 }
 0x12f   :  { %2218 = vst [vmem:[#allocation8 + $0x58] sm:$0xff] %v2956_v49  ;;  %v1311_v43 = vadd.f32 %v1310_v19, %v4107_v20  ;;  %v1119_v53 = vpop.f32.mrf.mxu0 }
 0x130   :  { %v2957_v23 = vpack.c.bf16 %v1118_v51, %v1116_v25  ;;  %v1312_v31 = vpop.f32.mrf.mxu1  ;;  %v1120_v40 = vadd.f32 %v1119_v53, %v4097_v28 }
 0x131   :  { %v2958_v54 = vpack.c.bf16 %v1311_v43, %v1309_v7  ;;  %v1121_v55 = vpop.f32.mrf.mxu0  ;;  %v1313_v59 = vadd.f32 %v1312_v31, %v4103_v47 }
 0x132   :  { %2219 = vst [vmem:[#allocation8 + $0x60] sm:$0xff] %v2957_v23  ;;  %v1122_v29 = vadd.f32 %v1121_v55, %v4100_v62  ;;  %v1314_v16 = vpop.f32.mrf.mxu1 }
 0x133   :  { %2220 = vst [vmem:[#allocation8 + $0x68] sm:$0xff] %v2958_v54  ;;  %v1315_v10 = vadd.f32 %v1314_v16, %v4107_v20  ;;  %v1125_v63 = vpop.f32.mrf.mxu0  ;;  %1590 = vmatmul.mubr.bf16.gmra.mxu0 %v3963_v52 }
 0x134   :  { %v2959_v8 = vpack.c.bf16 %v1122_v29, %v1120_v40  ;;  %v1318_v1 = vpop.f32.mrf.mxu1  ;;  %1783 = vmatmul.mubr.bf16.gmra.mxu1 %v3963_v52  ;;  %1599 = vmatprep.mubr.bf16.mxu0 %v4436_v26  ;;  %v1126_v35 = vadd.f32 %v1125_v63, %v4097_v28 }
 0x135   :  { %v2960_v2 = vpack.c.bf16 %v1315_v10, %v1313_v59  ;;  %v1127_v4 = vpop.f32.mrf.mxu0  ;;  %1792 = vmatprep.mubr.bf16.mxu1 %v4436_v26  ;;  %v1319_v44 = vadd.f32 %v1318_v1, %v4103_v47 }
 0x136   :  { %2221 = vst [vmem:[#allocation8 + $0x70] sm:$0xff] %v2959_v8  ;;  %v1128_v17 = vadd.f32 %v1127_v4, %v4100_v62  ;;  %v1320_v42 = vpop.f32.mrf.mxu1 }
 0x137   :  { %2222 = vst [vmem:[#allocation8 + $0x78] sm:$0xff] %v2960_v2  ;;  %v1321_v30 = vadd.f32 %v1320_v42, %v4107_v20  ;;  %v1129_v14 = vpop.f32.mrf.mxu0 }
 0x138   :  { %v2961_v60 = vpack.c.bf16 %v1128_v17, %v1126_v35  ;;  %v1322_v52 = vpop.f32.mrf.mxu1  ;;  %v1130_v22 = vadd.f32 %v1129_v14, %v4097_v28 }
 0x139   :  { %v2962_v9 = vpack.c.bf16 %v1321_v30, %v1319_v44  ;;  %v1131_v45 = vpop.f32.mrf.mxu0  ;;  %v1323_v5 = vadd.f32 %v1322_v52, %v4103_v47 }
 0x13a   :  { %2223 = vst [vmem:[#allocation8 + $0x80] sm:$0xff] %v2961_v60  ;;  %v1132_v18 = vadd.f32 %v1131_v45, %v4100_v62  ;;  %v1324_v41 = vpop.f32.mrf.mxu1 }
 0x13b   :  { %2224 = vst [vmem:[#allocation8 + $0x88] sm:$0xff] %v2962_v9  ;;  %v1325_v6 = vadd.f32 %v1324_v41, %v4107_v20  ;;  %v1135_v24 = vpop.f32.mrf.mxu0  ;;  %1600 = vmatmul.mubr.bf16.gmra.mxu0 %v4012_v61 }
 0x13c   :  { %v2963_v38 = vpack.c.bf16 %v1132_v18, %v1130_v22  ;;  %v1328_v33 = vpop.f32.mrf.mxu1  ;;  %1793 = vmatmul.mubr.bf16.gmra.mxu1 %v4012_v61  ;;  %1609 = vmatprep.mubr.bf16.mxu0 %v4436_v26  ;;  %v1136_v58 = vadd.f32 %v1135_v24, %v4097_v28 }
 0x13d   :  { %v2964_v39 = vpack.c.bf16 %v1325_v6, %v1323_v5  ;;  %v1137_v48 = vpop.f32.mrf.mxu0  ;;  %1802 = vmatprep.mubr.bf16.mxu1 %v4436_v26  ;;  %v1329_v0 = vadd.f32 %v1328_v33, %v4103_v47 }
 0x13e   :  { %2225 = vst [vmem:[#allocation8 + $0x90] sm:$0xff] %v2963_v38  ;;  %v1138_v15 = vadd.f32 %v1137_v48, %v4100_v62  ;;  %v1330_v57 = vpop.f32.mrf.mxu1 }
 0x13f   :  { %2226 = vst [vmem:[#allocation8 + $0x98] sm:$0xff] %v2964_v39  ;;  %v1331_v34 = vadd.f32 %v1330_v57, %v4107_v20  ;;  %v1139_v21 = vpop.f32.mrf.mxu0 }
 0x140   :  { %v2965_v36 = vpack.c.bf16 %v1138_v15, %v1136_v58  ;;  %v1332_v61 = vpop.f32.mrf.mxu1  ;;  %v1140_v12 = vadd.f32 %v1139_v21, %v4097_v28 }
 0x141   :  { %v2966_v46 = vpack.c.bf16 %v1331_v34, %v1329_v0  ;;  %v1141_v32 = vpop.f32.mrf.mxu0  ;;  %v1333_v49 = vadd.f32 %v1332_v61, %v4103_v47 }
 0x142   :  { %2227 = vst [vmem:[#allocation8 + $0xa0] sm:$0xff] %v2965_v36  ;;  %v1142_v11 = vadd.f32 %v1141_v32, %v4100_v62  ;;  %v1334_v13 = vpop.f32.mrf.mxu1 }
 0x143   :  { %2228 = vst [vmem:[#allocation8 + $0xa8] sm:$0xff] %v2966_v46  ;;  %v1335_v3 = vadd.f32 %v1334_v13, %v4107_v20  ;;  %v1145_v25 = vpop.f32.mrf.mxu0  ;;  %1610 = vmatmul.mubr.bf16.gmra.mxu0 %v4038_v27 }
 0x144   :  { %v2967_v51 = vpack.c.bf16 %v1142_v11, %v1140_v12  ;;  %v1338_v19 = vpop.f32.mrf.mxu1  ;;  %1803 = vmatmul.mubr.bf16.gmra.mxu1 %v4038_v27  ;;  %1619 = vmatprep.mubr.bf16.mxu0 %v4436_v26  ;;  %v1146_v53 = vadd.f32 %v1145_v25, %v4097_v28 }
 0x145   :  { %v2968_v7 = vpack.c.bf16 %v1335_v3, %v1333_v49  ;;  %v1147_v43 = vpop.f32.mrf.mxu0  ;;  %1812 = vmatprep.mubr.bf16.mxu1 %v4436_v26  ;;  %v1339_v54 = vadd.f32 %v1338_v19, %v4103_v47 }
 0x146   :  { %2229 = vst [vmem:[#allocation8 + $0xb0] sm:$0xff] %v2967_v51  ;;  %v1148_v23 = vadd.f32 %v1147_v43, %v4100_v62  ;;  %v1340_v31 = vpop.f32.mrf.mxu1 }
 0x147   :  { %2230 = vst [vmem:[#allocation8 + $0xb8] sm:$0xff] %v2968_v7  ;;  %v1341_v55 = vadd.f32 %v1340_v31, %v4107_v20  ;;  %v1149_v40 = vpop.f32.mrf.mxu0 }
 0x148   :  { %v2969_v29 = vpack.c.bf16 %v1148_v23, %v1146_v53  ;;  %v1342_v27 = vpop.f32.mrf.mxu1  ;;  %v1150_v10 = vadd.f32 %v1149_v40, %v4097_v28 }
 0x149   :  { %v2970_v16 = vpack.c.bf16 %v1341_v55, %v1339_v54  ;;  %v1151_v59 = vpop.f32.mrf.mxu0  ;;  %v1343_v8 = vadd.f32 %v1342_v27, %v4103_v47 }
 0x14a   :  { %2231 = vst [vmem:[#allocation8 + $0xc0] sm:$0xff] %v2969_v29  ;;  %v1152_v26 = vadd.f32 %v1151_v59, %v4100_v62  ;;  %v1344_v63 = vpop.f32.mrf.mxu1 }
 0x14b   :  { %2232 = vst [vmem:[#allocation8 + $0xc8] sm:$0xff] %v2970_v16  ;;  %v1345_v1 = vadd.f32 %v1344_v63, %v4107_v20  ;;  %v1155_v2 = vpop.f32.mrf.mxu0  ;;  %1620 = vmatmul.mubr.bf16.gmra.mxu0 %v4050_v56 }
 0x14c   :  { %v2971_v4 = vpack.c.bf16 %v1152_v26, %v1150_v10  ;;  %v1348_v35 = vpop.f32.mrf.mxu1  ;;  %1813 = vmatmul.mubr.bf16.gmra.mxu1 %v4050_v56  ;;  %v1156_v44 = vadd.f32 %v1155_v2, %v4097_v28 }
 0x14d   :  { %v2972_v17 = vpack.c.bf16 %v1345_v1, %v1343_v8  ;;  %v1157_v42 = vpop.f32.mrf.mxu0  ;;  %v1349_v60 = vadd.f32 %v1348_v35, %v4103_v47 }
 0x14e   :  { %2233 = vst [vmem:[#allocation8 + $0xd0] sm:$0xff] %v2971_v4  ;;  %v1158_v30 = vadd.f32 %v1157_v42, %v4100_v62  ;;  %v1350_v14 = vpop.f32.mrf.mxu1 }
 0x14f   :  { %2234 = vst [vmem:[#allocation8 + $0xd8] sm:$0xff] %v2972_v17  ;;  %v1351_v52 = vadd.f32 %v1350_v14, %v4107_v20  ;;  %v1159_v9 = vpop.f32.mrf.mxu0 }
 0x150   :  { %v2973_v45 = vpack.c.bf16 %v1158_v30, %v1156_v44  ;;  %v1352_v22 = vpop.f32.mrf.mxu1  ;;  %v1160_v56 = vadd.f32 %v1159_v9, %v4097_v28 }
 0x151   :  { %v2974_v18 = vpack.c.bf16 %v1351_v52, %v1349_v60  ;;  %v1161_v41 = vpop.f32.mrf.mxu0  ;;  %v1353_v24 = vadd.f32 %v1352_v22, %v4103_v47 }
 0x152   :  { %2235 = vst [vmem:[#allocation8 + $0xe0] sm:$0xff] %v2973_v45  ;;  %v1162_v5 = vadd.f32 %v1161_v41, %v4100_v62  ;;  %v1354_v6 = vpop.f32.mrf.mxu1 }
 0x153   :  { %2236 = vst [vmem:[#allocation8 + $0xe8] sm:$0xff] %v2974_v18  ;;  %v1355_v38 = vadd.f32 %v1354_v6, %v4107_v20  ;;  %v1165_v33 = vpop.f32.mrf.mxu0 }
 0x154   :  { %v2975_v39 = vpack.c.bf16 %v1162_v5, %v1160_v56  ;;  %v1358_v48 = vpop.f32.mrf.mxu1  ;;  %v1166_v57 = vadd.f32 %v1165_v33, %v4097_v28 }
 0x155   :  { %v2976_v58 = vpack.c.bf16 %v1355_v38, %v1353_v24  ;;  %v1167_v15 = vpop.f32.mrf.mxu0  ;;  %v1359_v21 = vadd.f32 %v1358_v48, %v4103_v47 }
 0x156   :  { %2237 = vst [vmem:[#allocation8 + $0xf0] sm:$0xff] %v2975_v39  ;;  %v1168_v0 = vadd.f32 %v1167_v15, %v4100_v62  ;;  %v1360_v34 = vpop.f32.mrf.mxu1 }
 0x157   :  { %2238 = vst [vmem:[#allocation8 + $0xf8] sm:$0xff] %v2976_v58  ;;  %v1361_v36 = vadd.f32 %v1360_v34, %v4107_v20  ;;  %v1169_v61 = vpop.f32.mrf.mxu0 }
 0x158   :  { %v2977_v46 = vpack.c.bf16 %v1168_v0, %v1166_v57  ;;  %v1362_v32 = vpop.f32.mrf.mxu1  ;;  %v1170_v13 = vadd.f32 %v1169_v61, %v4097_v28 }
 0x159   :  { %v2978_v12 = vpack.c.bf16 %v1361_v36, %v1359_v21  ;;  %v1171_v11 = vpop.f32.mrf.mxu0  ;;  %v1363_v25 = vadd.f32 %v1362_v32, %v4103_v47 }
 0x15a   :  { %2239 = vst [vmem:[#allocation8 + $0x100] sm:$0xff] %v2977_v46  ;;  %v1172_v49 = vadd.f32 %v1171_v11, %v4100_v62  ;;  %v1364_v3 = vpop.f32.mrf.mxu1 }
 0x15b   :  { %2240 = vst [vmem:[#allocation8 + $0x108] sm:$0xff] %v2978_v12  ;;  %v1365_v51 = vadd.f32 %v1364_v3, %v4107_v20  ;;  %v1175_v19 = vpop.f32.mrf.mxu0 }
 0x15c   :  { %v2979_v7 = vpack.c.bf16 %v1172_v49, %v1170_v13  ;;  %v1368_v43 = vpop.f32.mrf.mxu1  ;;  %v1176_v31 = vadd.f32 %v1175_v19, %v4097_v28 }
 0x15d   :  { %v2980_v53 = vpack.c.bf16 %v1365_v51, %v1363_v25  ;;  %v1177_v23 = vpop.f32.mrf.mxu0  ;;  %v1369_v40 = vadd.f32 %v1368_v43, %v4103_v47 }
 0x15e   :  { %2241 = vst [vmem:[#allocation8 + $0x110] sm:$0xff] %v2979_v7  ;;  %v1178_v54 = vadd.f32 %v1177_v23, %v4100_v62  ;;  %v1370_v55 = vpop.f32.mrf.mxu1 }
 0x15f   :  { %2242 = vst [vmem:[#allocation8 + $0x118] sm:$0xff] %v2980_v53  ;;  %v1371_v29 = vadd.f32 %v1370_v55, %v4107_v20  ;;  %v1179_v27 = vpop.f32.mrf.mxu0 }
 0x160   :  { %v2981_v16 = vpack.c.bf16 %v1178_v54, %v1176_v31  ;;  %v1372_v59 = vpop.f32.mrf.mxu1  ;;  %v1180_v63 = vadd.f32 %v1179_v27, %v4097_v28 }
 0x161   :  { %v2982_v10 = vpack.c.bf16 %v1371_v29, %v1369_v40  ;;  %v1181_v26 = vpop.f32.mrf.mxu0  ;;  %v1373_v2 = vadd.f32 %v1372_v59, %v4103_v47 }
 0x162   :  { %2243 = vst [vmem:[#allocation8 + $0x120] sm:$0xff] %v2981_v16  ;;  %v1182_v8 = vadd.f32 %v1181_v26, %v4100_v62  ;;  %v1374_v1 = vpop.f32.mrf.mxu1 }
 0x163   :  { %2244 = vst [vmem:[#allocation8 + $0x128] sm:$0xff] %v2982_v10  ;;  %v1375_v4 = vadd.f32 %v1374_v1, %v4107_v20  ;;  %v1185_v35 = vpop.f32.mrf.mxu0 }
 0x164   :  { %v2983_v17 = vpack.c.bf16 %v1182_v8, %v1180_v63  ;;  %v1378_v42 = vpop.f32.mrf.mxu1  ;;  %v1186_v14 = vadd.f32 %v1185_v35, %v4097_v28 }
 0x165   :  { %v2984_v44 = vpack.c.bf16 %v1375_v4, %v1373_v2  ;;  %v1187_v30 = vpop.f32.mrf.mxu0  ;;  %v1379_v9 = vadd.f32 %v1378_v42, %v4103_v47 }
 0x166   :  { %2245 = vst [vmem:[#allocation8 + $0x130] sm:$0xff] %v2983_v17  ;;  %v1188_v60 = vadd.f32 %v1187_v30, %v4100_v62  ;;  %v1380_v52 = vpop.f32.mrf.mxu1 }
 0x167   :  { %2246 = vst [vmem:[#allocation8 + $0x138] sm:$0xff] %v2984_v44  ;;  %v1381_v45 = vadd.f32 %v1380_v52, %v4107_v20  ;;  %v1189_v22 = vpop.f32.mrf.mxu0 }
 0x168   :  { %v2985_v18 = vpack.c.bf16 %v1188_v60, %v1186_v14  ;;  %v1382_v41 = vpop.f32.mrf.mxu1  ;;  %v1190_v6 = vadd.f32 %v1189_v22, %v4097_v28 }
 0x169   :  { %v2986_v56 = vpack.c.bf16 %v1381_v45, %v1379_v9  ;;  %v1191_v5 = vpop.f32.mrf.mxu0  ;;  %v1383_v33 = vadd.f32 %v1382_v41, %v4103_v47 }
 0x16a   :  { %2247 = vst [vmem:[#allocation8 + $0x140] sm:$0xff] %v2985_v18  ;;  %v1192_v24 = vadd.f32 %v1191_v5, %v4100_v62  ;;  %v1384_v38 = vpop.f32.mrf.mxu1 }
 0x16b   :  { %2248 = vst [vmem:[#allocation8 + $0x148] sm:$0xff] %v2986_v56  ;;  %v1385_v39 = vadd.f32 %v1384_v38, %v4107_v20  ;;  %v1195_v48 = vpop.f32.mrf.mxu0 }
 0x16c   :  { %v2987_v58 = vpack.c.bf16 %v1192_v24, %v1190_v6  ;;  %v1388_v15 = vpop.f32.mrf.mxu1  ;;  %v1196_v34 = vadd.f32 %v1195_v48, %v4097_v28 }
 0x16d   :  { %v2988_v57 = vpack.c.bf16 %v1385_v39, %v1383_v33  ;;  %v1197_v0 = vpop.f32.mrf.mxu0  ;;  %v1389_v61 = vadd.f32 %v1388_v15, %v4103_v47 }
 0x16e   :  { %2249 = vst [vmem:[#allocation8 + $0x150] sm:$0xff] %v2987_v58  ;;  %v1198_v21 = vadd.f32 %v1197_v0, %v4100_v62  ;;  %v1390_v36 = vpop.f32.mrf.mxu1 }
 0x16f   :  { %2250 = vst [vmem:[#allocation8 + $0x158] sm:$0xff] %v2988_v57  ;;  %v1391_v46 = vadd.f32 %v1390_v36, %v4107_v20  ;;  %v1199_v32 = vpop.f32.mrf.mxu0 }
 0x170   :  { %v2989_v12 = vpack.c.bf16 %v1198_v21, %v1196_v34  ;;  %v1392_v11 = vpop.f32.mrf.mxu1  ;;  %v1200_v3 = vadd.f32 %v1199_v32, %v4097_v28 }
 0x171   :  { %v2990_v13 = vpack.c.bf16 %v1391_v46, %v1389_v61  ;;  %v1201_v49 = vpop.f32.mrf.mxu0  ;;  %v1393_v19 = vadd.f32 %v1392_v11, %v4103_v47 }
 0x172   :  { %2251 = vst [vmem:[#allocation8 + $0x160] sm:$0xff] %v2989_v12  ;;  %v1202_v25 = vadd.f32 %v1201_v49, %v4100_v62  ;;  %v1394_v51 = vpop.f32.mrf.mxu1 }
 0x173   :  { %2252 = vst [vmem:[#allocation8 + $0x168] sm:$0xff] %v2990_v13  ;;  %v1395_v7 = vadd.f32 %v1394_v51, %v4107_v20  ;;  %v1205_v43 = vpop.f32.mrf.mxu0 }
 0x174   :  { %v2991_v53 = vpack.c.bf16 %v1202_v25, %v1200_v3  ;;  %v1398_v23 = vpop.f32.mrf.mxu1  ;;  %v1206_v55 = vadd.f32 %v1205_v43, %v4097_v28 }
 0x175   :  { %v2992_v31 = vpack.c.bf16 %v1395_v7, %v1393_v19  ;;  %v1207_v54 = vpop.f32.mrf.mxu0  ;;  %v1399_v27 = vadd.f32 %v1398_v23, %v4103_v47 }
 0x176   :  { %2253 = vst [vmem:[#allocation8 + $0x170] sm:$0xff] %v2991_v53  ;;  %v1208_v40 = vadd.f32 %v1207_v54, %v4100_v62  ;;  %v1400_v29 = vpop.f32.mrf.mxu1 }
 0x177   :  { %2254 = vst [vmem:[#allocation8 + $0x178] sm:$0xff] %v2992_v31  ;;  %v1401_v16 = vadd.f32 %v1400_v29, %v4107_v20  ;;  %v1209_v59 = vpop.f32.mrf.mxu0 }
 0x178   :  { %v2993_v10 = vpack.c.bf16 %v1208_v40, %v1206_v55  ;;  %v1402_v26 = vpop.f32.mrf.mxu1  ;;  %v1210_v1 = vadd.f32 %v1209_v59, %v4097_v28  ;;  %v709_v59 = vsub.s32 4, %v4084_v37 }
 0x179   :  { %v2994_v63 = vpack.c.bf16 %v1401_v16, %v1399_v27  ;;  %v1211_v8 = vpop.f32.mrf.mxu0  ;;  %v1403_v35 = vadd.f32 %v1402_v26, %v4103_v47 }
 0x17a   :  { %2255 = vst [vmem:[#allocation8 + $0x180] sm:$0xff] %v2993_v10  ;;  %v1212_v2 = vadd.f32 %v1211_v8, %v4100_v62  ;;  %v1404_v4 = vpop.f32.mrf.mxu1  ;;  %v713_v10 = vsub.s32 5, %v4084_v37 }
 0x17b   :  { %2256 = vst [vmem:[#allocation8 + $0x188] sm:$0xff] %v2994_v63  ;;  %v1405_v17 = vadd.f32 %v1404_v4, %v4107_v20  ;;  %v1215_v42 = vpop.f32.mrf.mxu0 }
 0x17c   :  { %v2995_v44 = vpack.c.bf16 %v1212_v2, %v1210_v1  ;;  %v1408_v30 = vpop.f32.mrf.mxu1  ;;  %v1216_v52 = vadd.f32 %v1215_v42, %v4097_v28  ;;  %v717_v1 = vsub.s32 6, %v4084_v37  ;;  %v721_v2 = vsub.s32 7, %v4084_v37 }
 0x17d   :  { %v2996_v14 = vpack.c.bf16 %v1405_v17, %v1403_v35  ;;  %v1217_v60 = vpop.f32.mrf.mxu0  ;;  %v1409_v22 = vadd.f32 %v1408_v30, %v4103_v47 }
 0x17e   :  { %2257 = vst [vmem:[#allocation8 + $0x190] sm:$0xff] %v2995_v44  ;;  %v1218_v9 = vadd.f32 %v1217_v60, %v4100_v62  ;;  %v1410_v45 = vpop.f32.mrf.mxu1  ;;  %v4269_v60 = vrot.slane %v4092_v50, %v709_v59 }
 0x17f   :  { %2258 = vst [vmem:[#allocation8 + $0x198] sm:$0xff] %v2996_v14  ;;  %v1411_v18 = vadd.f32 %v1410_v45, %v4107_v20  ;;  %v1219_v41 = vpop.f32.mrf.mxu0 }
 0x180   :  { %v2997_v56 = vpack.c.bf16 %v1218_v9, %v1216_v52  ;;  %v1412_v5 = vpop.f32.mrf.mxu1  ;;  %v1220_v38 = vadd.f32 %v1219_v41, %v4097_v28  ;;  %v4272_v52 = vrot.slane %v4092_v50, %v713_v10 }
 0x181   :  { %v2998_v6 = vpack.c.bf16 %v1411_v18, %v1409_v22  ;;  %v1221_v24 = vpop.f32.mrf.mxu0  ;;  %v1413_v48 = vadd.f32 %v1412_v5, %v4103_v47  ;;  %v4277_v22 = vrot.slane %v4092_v50, %v717_v1 }
 0x182   :  { %2259 = vst [vmem:[#allocation8 + $0x1a0] sm:$0xff] %v2997_v56  ;;  %v1222_v33 = vadd.f32 %v1221_v24, %v4100_v62  ;;  %v1414_v39 = vpop.f32.mrf.mxu1 }
 0x183   :  { %2260 = vst [vmem:[#allocation8 + $0x1a8] sm:$0xff] %v2998_v6  ;;  %v1415_v58 = vadd.f32 %v1414_v39, %v4107_v20  ;;  %v1225_v15 = vpop.f32.mrf.mxu0 }
 0x184   :  { %v2999_v57 = vpack.c.bf16 %v1222_v33, %v1220_v38  ;;  %v1418_v0 = vpop.f32.mrf.mxu1  ;;  %v1226_v36 = vadd.f32 %v1225_v15, %v4097_v28 }
 0x185   :  { %v3000_v34 = vpack.c.bf16 %v1415_v58, %v1413_v48  ;;  %v1227_v21 = vpop.f32.mrf.mxu0  ;;  %v1419_v32 = vadd.f32 %v1418_v0, %v4103_v47 }
 0x186   :  { %2261 = vst [vmem:[#allocation8 + $0x1b0] sm:$0xff] %v2999_v57  ;;  %v1228_v61 = vadd.f32 %v1227_v21, %v4100_v62  ;;  %v1420_v46 = vpop.f32.mrf.mxu1 }
 0x187   :  { %2262 = vst [vmem:[#allocation8 + $0x1b8] sm:$0xff] %v3000_v34  ;;  %v1421_v12 = vadd.f32 %v1420_v46, %v4107_v20  ;;  %v1229_v11 = vpop.f32.mrf.mxu0 }
 0x188   :  { %v3001_v13 = vpack.c.bf16 %v1228_v61, %v1226_v36  ;;  %v1422_v49 = vpop.f32.mrf.mxu1  ;;  %v1230_v51 = vadd.f32 %v1229_v11, %v4097_v28 }
 0x189   :  { %v3002_v3 = vpack.c.bf16 %v1421_v12, %v1419_v32  ;;  %v1231_v25 = vpop.f32.mrf.mxu0  ;;  %v1423_v43 = vadd.f32 %v1422_v49, %v4103_v47 }
 0x18a   :  { %2263 = vst [vmem:[#allocation8 + $0x1c0] sm:$0xff] %v3001_v13  ;;  %v1232_v19 = vadd.f32 %v1231_v25, %v4100_v62  ;;  %v1424_v7 = vpop.f32.mrf.mxu1 }
 0x18b   :  { %2264 = vst [vmem:[#allocation8 + $0x1c8] sm:$0xff] %v3002_v3  ;;  %v1425_v53 = vadd.f32 %v1424_v7, %v4107_v20  ;;  %v1235_v23 = vpop.f32.mrf.mxu0 }
 0x18c   :  { %v3003_v31 = vpack.c.bf16 %v1232_v19, %v1230_v51  ;;  %v1428_v54 = vpop.f32.mrf.mxu1  ;;  %v1236_v29 = vadd.f32 %v1235_v23, %v4097_v28 }
 0x18d   :  { %v3004_v55 = vpack.c.bf16 %v1425_v53, %v1423_v43  ;;  %v1237_v40 = vpop.f32.mrf.mxu0  ;;  %v1429_v26 = vadd.f32 %v1428_v54, %v4103_v47 }
 0x18e   :  { %2265 = vst [vmem:[#allocation8 + $0x1d0] sm:$0xff] %v3003_v31  ;;  %v1238_v27 = vadd.f32 %v1237_v40, %v4100_v62  ;;  %v1430_v16 = vpop.f32.mrf.mxu1 }
 0x18f   :  { %2266 = vst [vmem:[#allocation8 + $0x1d8] sm:$0xff] %v3004_v55  ;;  %v1431_v63 = vadd.f32 %v1430_v16, %v4107_v20  ;;  %v1239_v8 = vpop.f32.mrf.mxu0 }
 0x190   :  { %v3005_v4 = vpack.c.bf16 %v1238_v27, %v1236_v29  ;;  %v1432_v35 = vpop.f32.mrf.mxu1  ;;  %v1240_v44 = vadd.f32 %v1239_v8, %v4097_v28  ;;  %v4280_v28 = vrot.slane %v4092_v50, %v721_v2 }
 0x191   :  { %v3006_v17 = vpack.c.bf16 %v1431_v63, %v1429_v26  ;;  %v1241_v42 = vpop.f32.mrf.mxu0  ;;  %v1433_v9 = vadd.f32 %v1432_v35, %v4103_v47 }
 0x192   :  { %2267 = vst [vmem:[#allocation8 + $0x1e0] sm:$0xff] %v3005_v4  ;;  %v1242_v30 = vadd.f32 %v1241_v42, %v4100_v62  ;;  %v1434_v14 = vpop.f32.mrf.mxu1 }
 0x193   :  { %2268 = vst [vmem:[#allocation8 + $0x1e8] sm:$0xff] %v3006_v17  ;;  %v1435_v37 = vadd.f32 %v1434_v14, %v4107_v20  ;;  %v1471_v45 = vpop.f32.mrf.mxu0 }
 0x194   :  { %v3007_v62 = vpack.c.bf16 %v1242_v30, %v1240_v44  ;;  %v1664_v18 = vpop.f32.mrf.mxu1  ;;  %v1472_v5 = vadd.f32 %v1471_v45, %v4269_v60 }
 0x195   :  { %v3008_v41 = vpack.c.bf16 %v1435_v37, %v1433_v9  ;;  %v1473_v56 = vpop.f32.mrf.mxu0  ;;  %v1665_v47 = vadd.f32 %v1664_v18, %v4277_v22 }
 0x196   :  { %2269 = vst [vmem:[#allocation8 + $0x1f0] sm:$0xff] %v3007_v62  ;;  %v1474_v6 = vadd.f32 %v1473_v56, %v4272_v52  ;;  %v1666_v24 = vpop.f32.mrf.mxu1 }
 0x197   :  { %2270 = vst [vmem:[#allocation8 + $0x1f8] sm:$0xff] %v3008_v41  ;;  %v1667_v20 = vadd.f32 %v1666_v24, %v4280_v28  ;;  %v1475_v38 = vpop.f32.mrf.mxu0 }
 0x198   :  { %v3009_v50 = vpack.c.bf16 %v1474_v6, %v1472_v5  ;;  %v1668_v33 = vpop.f32.mrf.mxu1 }
 0x199   :  { %v3010_v39 = vpack.c.bf16 %v1667_v20, %v1665_v47  ;;  %v1477_v48 = vpop.f32.mrf.mxu0 }
 0x19a   :  { %3156 = shalt.err (!%p3153_p5)
}
 0x19b   :  { %s3202_s8 = smov 256   ;;  %s3203_s9 = smov 16   ;;  %2655 = vst [vmem:[#allocation9] sm:$0xff] %v3009_v50  ;;  %v1476_v58 = vadd.f32 %v1475_v38, %v4269_v60  ;;  %v1478_v15 = vadd.f32 %v1477_v48, %v4272_v52  ;;  %v1670_v57 = vpop.f32.mrf.mxu1  ;;  %2656 = vst [vmem:[#allocation9 + $0x8] sm:$0xff] %v3010_v39  ;;  %v1669_v0 = vadd.f32 %v1668_v33, %v4277_v22  ;;  %v1481_v21 = vpop.f32.mrf.mxu0 }
 0x19c   :  { %2730 = dma.vmem_to_hbm [thread:$0]  %s2725_s2, 8192, %s4425_s3, [#allocation4], %s3202_s8, %s3202_s8, %s3203_s9   ;;  %v1671_v34 = vadd.f32 %v1670_v57, %v4280_v28  ;;  %v1482_v12 = vadd.f32 %v1481_v21, %v4269_v60 }
 0x19d   :  { %v3011_v36 = vpack.c.bf16 %v1478_v15, %v1476_v58  ;;  %v1674_v61 = vpop.f32.mrf.mxu1  ;;  %v1483_v32 = vpop.f32.mrf.mxu0  ;;  %s3204_s3 = smov [#allocation9]  }
 0x19e   :  { %v3012_v46 = vpack.c.bf16 %v1671_v34, %v1669_v0  ;;  %v1484_v11 = vadd.f32 %v1483_v32, %v4272_v52  ;;  %v1675_v49 = vadd.f32 %v1674_v61, %v4277_v22  ;;  %s2736_s12 = sshll.u32 %s3204_s3, 4  ;;  %s2737_s12 = int_to_ptr.vmem [resolvable:$true] %s2736_s12 }
 0x19f   :  { %2657 = vst [vmem:[#allocation9 + $0x10] sm:$0xff] %v3011_v36  ;;  %v1676_v13 = vpop.f32.mrf.mxu1  ;;  %v1485_v25 = vpop.f32.mrf.mxu0  ;;  %s3165_s13 = scalar_lea.vmem %s2737_s12, 8192  ;;  %p3170_p7 = scmp.lt.s32.totalorder %s2737_s12, %s2737_s12 }
 0x1a0   :  { %2658 = vst [vmem:[#allocation9 + $0x18] sm:$0xff] %v3012_v46  ;;  %v1677_v3 = vadd.f32 %v1676_v13, %v4280_v28  ;;  %v3013_v51 = vpack.c.bf16 %v1484_v11, %v1482_v12  ;;  %v1486_v53 = vadd.f32 %v1485_v25, %v4269_v60  ;;  %p3166_p6 = scmp.ne.s32.totalorder %s2737_s12, %s3165_s13  ;;  %p3171_p8 = scmp.lt.s32.totalorder %s3165_s13, %s3165_s13 }
 0x1a1   :  { %v1678_v19 = vpop.f32.mrf.mxu1  ;;  %v1487_v43 = vpop.f32.mrf.mxu0 }
 0x1a2   :  { %v3014_v7 = vpack.c.bf16 %v1677_v3, %v1675_v49  ;;  %2659 = vst [vmem:[#allocation9 + $0x20] sm:$0xff] %v3013_v51  ;;  %v1488_v23 = vadd.f32 %v1487_v43, %v4272_v52  ;;  %v1679_v54 = vadd.f32 %v1678_v19, %v4277_v22  ;;  %p3172_p9 = por %p3171_p8, %p3170_p7 }
 0x1a3   :  { %v1680_v31 = vpop.f32.mrf.mxu1  ;;  %v1491_v40 = vpop.f32.mrf.mxu0 }
 0x1a4   :  { %2660 = vst [vmem:[#allocation9 + $0x28] sm:$0xff] %v3014_v7  ;;  %v1681_v55 = vadd.f32 %v1680_v31, %v4280_v28  ;;  %v3015_v29 = vpack.c.bf16 %v1488_v23, %v1486_v53  ;;  %v1492_v10 = vadd.f32 %v1491_v40, %v4269_v60  ;;  %p3173_p10 = pnand %p3172_p9, %p3166_p6 }
 0x1a5   :  { %v1684_v27 = vpop.f32.mrf.mxu1  ;;  %v1493_v59 = vpop.f32.mrf.mxu0 }
 0x1a6   :  { %v3016_v16 = vpack.c.bf16 %v1681_v55, %v1679_v54  ;;  %2661 = vst [vmem:[#allocation9 + $0x30] sm:$0xff] %v3015_v29  ;;  %v1494_v26 = vadd.f32 %v1493_v59, %v4272_v52  ;;  %v1685_v8 = vadd.f32 %v1684_v27, %v4277_v22 }
 0x1a7   :  { %v1686_v63 = vpop.f32.mrf.mxu1  ;;  %v1495_v2 = vpop.f32.mrf.mxu0 }
 0x1a8   :  { %2662 = vst [vmem:[#allocation9 + $0x38] sm:$0xff] %v3016_v16  ;;  %v1687_v1 = vadd.f32 %v1686_v63, %v4280_v28  ;;  %v3017_v4 = vpack.c.bf16 %v1494_v26, %v1492_v10  ;;  %v1496_v44 = vadd.f32 %v1495_v2, %v4269_v60 }
 0x1a9   :  { %v1688_v35 = vpop.f32.mrf.mxu1  ;;  %v1497_v42 = vpop.f32.mrf.mxu0 }
 0x1aa   :  { %v3018_v17 = vpack.c.bf16 %v1687_v1, %v1685_v8  ;;  %2663 = vst [vmem:[#allocation9 + $0x40] sm:$0xff] %v3017_v4  ;;  %v1498_v30 = vadd.f32 %v1497_v42, %v4272_v52  ;;  %v1689_v9 = vadd.f32 %v1688_v35, %v4277_v22 }
 0x1ab   :  { %v1690_v14 = vpop.f32.mrf.mxu1  ;;  %v1501_v45 = vpop.f32.mrf.mxu0 }
 0x1ac   :  { %2664 = vst [vmem:[#allocation9 + $0x48] sm:$0xff] %v3018_v17  ;;  %v1691_v37 = vadd.f32 %v1690_v14, %v4280_v28  ;;  %v3019_v62 = vpack.c.bf16 %v1498_v30, %v1496_v44  ;;  %v1502_v5 = vadd.f32 %v1501_v45, %v4269_v60 }
 0x1ad   :  { %v1694_v18 = vpop.f32.mrf.mxu1  ;;  %v1503_v56 = vpop.f32.mrf.mxu0 }
 0x1ae   :  { %v3020_v41 = vpack.c.bf16 %v1691_v37, %v1689_v9  ;;  %2665 = vst [vmem:[#allocation9 + $0x50] sm:$0xff] %v3019_v62  ;;  %v1504_v6 = vadd.f32 %v1503_v56, %v4272_v52  ;;  %v1695_v47 = vadd.f32 %v1694_v18, %v4277_v22 }
 0x1af   :  { %v1696_v24 = vpop.f32.mrf.mxu1  ;;  %v1505_v38 = vpop.f32.mrf.mxu0 }
 0x1b0   :  { %2666 = vst [vmem:[#allocation9 + $0x58] sm:$0xff] %v3020_v41  ;;  %v1697_v20 = vadd.f32 %v1696_v24, %v4280_v28  ;;  %v3021_v50 = vpack.c.bf16 %v1504_v6, %v1502_v5  ;;  %v1506_v58 = vadd.f32 %v1505_v38, %v4269_v60 }
 0x1b1   :  { %v1698_v33 = vpop.f32.mrf.mxu1  ;;  %v1507_v48 = vpop.f32.mrf.mxu0 }
 0x1b2   :  { %v3022_v39 = vpack.c.bf16 %v1697_v20, %v1695_v47  ;;  %2667 = vst [vmem:[#allocation9 + $0x60] sm:$0xff] %v3021_v50  ;;  %v1508_v15 = vadd.f32 %v1507_v48, %v4272_v52  ;;  %v1699_v0 = vadd.f32 %v1698_v33, %v4277_v22 }
 0x1b3   :  { %v1700_v57 = vpop.f32.mrf.mxu1  ;;  %v1511_v21 = vpop.f32.mrf.mxu0 }
 0x1b4   :  { %2668 = vst [vmem:[#allocation9 + $0x68] sm:$0xff] %v3022_v39  ;;  %v1701_v34 = vadd.f32 %v1700_v57, %v4280_v28  ;;  %v3023_v36 = vpack.c.bf16 %v1508_v15, %v1506_v58  ;;  %v1512_v12 = vadd.f32 %v1511_v21, %v4269_v60 }
 0x1b5   :  { %v1704_v61 = vpop.f32.mrf.mxu1  ;;  %v1513_v32 = vpop.f32.mrf.mxu0 }
 0x1b6   :  { %v3024_v46 = vpack.c.bf16 %v1701_v34, %v1699_v0  ;;  %2669 = vst [vmem:[#allocation9 + $0x70] sm:$0xff] %v3023_v36  ;;  %v1514_v11 = vadd.f32 %v1513_v32, %v4272_v52  ;;  %v1705_v49 = vadd.f32 %v1704_v61, %v4277_v22 }
 0x1b7   :  { %v1706_v13 = vpop.f32.mrf.mxu1  ;;  %v1515_v25 = vpop.f32.mrf.mxu0 }
 0x1b8   :  { %2670 = vst [vmem:[#allocation9 + $0x78] sm:$0xff] %v3024_v46  ;;  %v1707_v3 = vadd.f32 %v1706_v13, %v4280_v28  ;;  %v3025_v51 = vpack.c.bf16 %v1514_v11, %v1512_v12  ;;  %v1516_v53 = vadd.f32 %v1515_v25, %v4269_v60 }
 0x1b9   :  { %v1708_v19 = vpop.f32.mrf.mxu1  ;;  %v1517_v43 = vpop.f32.mrf.mxu0 }
 0x1ba   :  { %v3026_v7 = vpack.c.bf16 %v1707_v3, %v1705_v49  ;;  %2671 = vst [vmem:[#allocation9 + $0x80] sm:$0xff] %v3025_v51  ;;  %v1518_v23 = vadd.f32 %v1517_v43, %v4272_v52  ;;  %v1709_v54 = vadd.f32 %v1708_v19, %v4277_v22 }
 0x1bb   :  { %v1710_v31 = vpop.f32.mrf.mxu1  ;;  %v1521_v40 = vpop.f32.mrf.mxu0 }
 0x1bc   :  { %2672 = vst [vmem:[#allocation9 + $0x88] sm:$0xff] %v3026_v7  ;;  %v1711_v55 = vadd.f32 %v1710_v31, %v4280_v28  ;;  %v3027_v29 = vpack.c.bf16 %v1518_v23, %v1516_v53  ;;  %v1522_v10 = vadd.f32 %v1521_v40, %v4269_v60 }
 0x1bd   :  { %v1714_v27 = vpop.f32.mrf.mxu1  ;;  %v1523_v59 = vpop.f32.mrf.mxu0 }
 0x1be   :  { %v3028_v16 = vpack.c.bf16 %v1711_v55, %v1709_v54  ;;  %2673 = vst [vmem:[#allocation9 + $0x90] sm:$0xff] %v3027_v29  ;;  %v1524_v26 = vadd.f32 %v1523_v59, %v4272_v52  ;;  %v1715_v8 = vadd.f32 %v1714_v27, %v4277_v22 }
 0x1bf   :  { %v1716_v63 = vpop.f32.mrf.mxu1  ;;  %v1525_v2 = vpop.f32.mrf.mxu0 }
 0x1c0   :  { %2674 = vst [vmem:[#allocation9 + $0x98] sm:$0xff] %v3028_v16  ;;  %v1717_v1 = vadd.f32 %v1716_v63, %v4280_v28  ;;  %v3029_v4 = vpack.c.bf16 %v1524_v26, %v1522_v10  ;;  %v1526_v44 = vadd.f32 %v1525_v2, %v4269_v60 }
 0x1c1   :  { %v1718_v35 = vpop.f32.mrf.mxu1  ;;  %v1527_v42 = vpop.f32.mrf.mxu0 }
 0x1c2   :  { %v3030_v17 = vpack.c.bf16 %v1717_v1, %v1715_v8  ;;  %2675 = vst [vmem:[#allocation9 + $0xa0] sm:$0xff] %v3029_v4  ;;  %v1528_v30 = vadd.f32 %v1527_v42, %v4272_v52  ;;  %v1719_v9 = vadd.f32 %v1718_v35, %v4277_v22 }
 0x1c3   :  { %v1720_v14 = vpop.f32.mrf.mxu1  ;;  %v1531_v45 = vpop.f32.mrf.mxu0 }
 0x1c4   :  { %2676 = vst [vmem:[#allocation9 + $0xa8] sm:$0xff] %v3030_v17  ;;  %v1721_v37 = vadd.f32 %v1720_v14, %v4280_v28  ;;  %v3031_v62 = vpack.c.bf16 %v1528_v30, %v1526_v44  ;;  %v1532_v5 = vadd.f32 %v1531_v45, %v4269_v60 }
 0x1c5   :  { %v1724_v18 = vpop.f32.mrf.mxu1  ;;  %v1533_v56 = vpop.f32.mrf.mxu0 }
 0x1c6   :  { %v3032_v41 = vpack.c.bf16 %v1721_v37, %v1719_v9  ;;  %2677 = vst [vmem:[#allocation9 + $0xb0] sm:$0xff] %v3031_v62  ;;  %v1534_v6 = vadd.f32 %v1533_v56, %v4272_v52  ;;  %v1725_v47 = vadd.f32 %v1724_v18, %v4277_v22 }
 0x1c7   :  { %v1726_v24 = vpop.f32.mrf.mxu1  ;;  %v1535_v38 = vpop.f32.mrf.mxu0 }
 0x1c8   :  { %2678 = vst [vmem:[#allocation9 + $0xb8] sm:$0xff] %v3032_v41  ;;  %v1727_v20 = vadd.f32 %v1726_v24, %v4280_v28  ;;  %v3033_v50 = vpack.c.bf16 %v1534_v6, %v1532_v5  ;;  %v1536_v58 = vadd.f32 %v1535_v38, %v4269_v60 }
 0x1c9   :  { %v1728_v33 = vpop.f32.mrf.mxu1  ;;  %v1537_v48 = vpop.f32.mrf.mxu0 }
 0x1ca   :  { %v3034_v39 = vpack.c.bf16 %v1727_v20, %v1725_v47  ;;  %2679 = vst [vmem:[#allocation9 + $0xc0] sm:$0xff] %v3033_v50  ;;  %v1538_v15 = vadd.f32 %v1537_v48, %v4272_v52  ;;  %v1729_v0 = vadd.f32 %v1728_v33, %v4277_v22 }
 0x1cb   :  { %v1730_v57 = vpop.f32.mrf.mxu1  ;;  %v1541_v21 = vpop.f32.mrf.mxu0 }
 0x1cc   :  { %2680 = vst [vmem:[#allocation9 + $0xc8] sm:$0xff] %v3034_v39  ;;  %v1731_v34 = vadd.f32 %v1730_v57, %v4280_v28  ;;  %v3035_v36 = vpack.c.bf16 %v1538_v15, %v1536_v58  ;;  %v1542_v12 = vadd.f32 %v1541_v21, %v4269_v60 }
 0x1cd   :  { %v1734_v61 = vpop.f32.mrf.mxu1  ;;  %v1543_v32 = vpop.f32.mrf.mxu0 }
 0x1ce   :  { %v3036_v46 = vpack.c.bf16 %v1731_v34, %v1729_v0  ;;  %2681 = vst [vmem:[#allocation9 + $0xd0] sm:$0xff] %v3035_v36  ;;  %v1544_v11 = vadd.f32 %v1543_v32, %v4272_v52  ;;  %v1735_v49 = vadd.f32 %v1734_v61, %v4277_v22 }
 0x1cf   :  { %v1736_v13 = vpop.f32.mrf.mxu1  ;;  %v1545_v25 = vpop.f32.mrf.mxu0 }
 0x1d0   :  { %2682 = vst [vmem:[#allocation9 + $0xd8] sm:$0xff] %v3036_v46  ;;  %v1737_v3 = vadd.f32 %v1736_v13, %v4280_v28  ;;  %v3037_v51 = vpack.c.bf16 %v1544_v11, %v1542_v12  ;;  %v1546_v53 = vadd.f32 %v1545_v25, %v4269_v60 }
 0x1d1   :  { %v1738_v19 = vpop.f32.mrf.mxu1  ;;  %v1547_v43 = vpop.f32.mrf.mxu0 }
 0x1d2   :  { %v3038_v7 = vpack.c.bf16 %v1737_v3, %v1735_v49  ;;  %2683 = vst [vmem:[#allocation9 + $0xe0] sm:$0xff] %v3037_v51  ;;  %v1548_v23 = vadd.f32 %v1547_v43, %v4272_v52  ;;  %v1739_v54 = vadd.f32 %v1738_v19, %v4277_v22 }
 0x1d3   :  { %v1740_v31 = vpop.f32.mrf.mxu1  ;;  %v1551_v40 = vpop.f32.mrf.mxu0 }
 0x1d4   :  { %2684 = vst [vmem:[#allocation9 + $0xe8] sm:$0xff] %v3038_v7  ;;  %v1741_v55 = vadd.f32 %v1740_v31, %v4280_v28  ;;  %v3039_v29 = vpack.c.bf16 %v1548_v23, %v1546_v53  ;;  %v1552_v10 = vadd.f32 %v1551_v40, %v4269_v60 }
 0x1d5   :  { %v1744_v27 = vpop.f32.mrf.mxu1  ;;  %v1553_v59 = vpop.f32.mrf.mxu0 }
 0x1d6   :  { %v3040_v16 = vpack.c.bf16 %v1741_v55, %v1739_v54  ;;  %2685 = vst [vmem:[#allocation9 + $0xf0] sm:$0xff] %v3039_v29  ;;  %v1554_v26 = vadd.f32 %v1553_v59, %v4272_v52  ;;  %v1745_v8 = vadd.f32 %v1744_v27, %v4277_v22 }
 0x1d7   :  { %v1746_v63 = vpop.f32.mrf.mxu1  ;;  %v1555_v2 = vpop.f32.mrf.mxu0 }
 0x1d8   :  { %2686 = vst [vmem:[#allocation9 + $0xf8] sm:$0xff] %v3040_v16  ;;  %v1747_v1 = vadd.f32 %v1746_v63, %v4280_v28  ;;  %v3041_v4 = vpack.c.bf16 %v1554_v26, %v1552_v10  ;;  %v1556_v44 = vadd.f32 %v1555_v2, %v4269_v60 }
 0x1d9   :  { %v1748_v35 = vpop.f32.mrf.mxu1  ;;  %v1557_v42 = vpop.f32.mrf.mxu0 }
 0x1da   :  { %v3042_v17 = vpack.c.bf16 %v1747_v1, %v1745_v8  ;;  %2687 = vst [vmem:[#allocation9 + $0x100] sm:$0xff] %v3041_v4  ;;  %v1558_v30 = vadd.f32 %v1557_v42, %v4272_v52  ;;  %v1749_v9 = vadd.f32 %v1748_v35, %v4277_v22 }
 0x1db   :  { %v1750_v14 = vpop.f32.mrf.mxu1  ;;  %v1561_v45 = vpop.f32.mrf.mxu0 }
 0x1dc   :  { %2688 = vst [vmem:[#allocation9 + $0x108] sm:$0xff] %v3042_v17  ;;  %v1751_v37 = vadd.f32 %v1750_v14, %v4280_v28  ;;  %v3043_v62 = vpack.c.bf16 %v1558_v30, %v1556_v44  ;;  %v1562_v5 = vadd.f32 %v1561_v45, %v4269_v60 }
 0x1dd   :  { %v1754_v18 = vpop.f32.mrf.mxu1  ;;  %v1563_v56 = vpop.f32.mrf.mxu0 }
 0x1de   :  { %v3044_v41 = vpack.c.bf16 %v1751_v37, %v1749_v9  ;;  %2689 = vst [vmem:[#allocation9 + $0x110] sm:$0xff] %v3043_v62  ;;  %v1564_v6 = vadd.f32 %v1563_v56, %v4272_v52  ;;  %v1755_v47 = vadd.f32 %v1754_v18, %v4277_v22 }
 0x1df   :  { %v1756_v24 = vpop.f32.mrf.mxu1  ;;  %v1565_v38 = vpop.f32.mrf.mxu0 }
 0x1e0   :  { %2690 = vst [vmem:[#allocation9 + $0x118] sm:$0xff] %v3044_v41  ;;  %v1757_v20 = vadd.f32 %v1756_v24, %v4280_v28  ;;  %v3045_v50 = vpack.c.bf16 %v1564_v6, %v1562_v5  ;;  %v1566_v58 = vadd.f32 %v1565_v38, %v4269_v60 }
 0x1e1   :  { %v1758_v33 = vpop.f32.mrf.mxu1  ;;  %v1567_v48 = vpop.f32.mrf.mxu0 }
 0x1e2   :  { %v3046_v39 = vpack.c.bf16 %v1757_v20, %v1755_v47  ;;  %2691 = vst [vmem:[#allocation9 + $0x120] sm:$0xff] %v3045_v50  ;;  %v1568_v15 = vadd.f32 %v1567_v48, %v4272_v52  ;;  %v1759_v0 = vadd.f32 %v1758_v33, %v4277_v22 }
 0x1e3   :  { %v1760_v57 = vpop.f32.mrf.mxu1  ;;  %v1571_v21 = vpop.f32.mrf.mxu0 }
 0x1e4   :  { %2692 = vst [vmem:[#allocation9 + $0x128] sm:$0xff] %v3046_v39  ;;  %v1761_v34 = vadd.f32 %v1760_v57, %v4280_v28  ;;  %v3047_v36 = vpack.c.bf16 %v1568_v15, %v1566_v58  ;;  %v1572_v12 = vadd.f32 %v1571_v21, %v4269_v60 }
 0x1e5   :  { %v1764_v61 = vpop.f32.mrf.mxu1  ;;  %v1573_v32 = vpop.f32.mrf.mxu0 }
 0x1e6   :  { %v3048_v46 = vpack.c.bf16 %v1761_v34, %v1759_v0  ;;  %2693 = vst [vmem:[#allocation9 + $0x130] sm:$0xff] %v3047_v36  ;;  %v1574_v11 = vadd.f32 %v1573_v32, %v4272_v52  ;;  %v1765_v49 = vadd.f32 %v1764_v61, %v4277_v22 }
 0x1e7   :  { %v1766_v13 = vpop.f32.mrf.mxu1  ;;  %v1575_v25 = vpop.f32.mrf.mxu0 }
 0x1e8   :  { %2694 = vst [vmem:[#allocation9 + $0x138] sm:$0xff] %v3048_v46  ;;  %v1767_v3 = vadd.f32 %v1766_v13, %v4280_v28  ;;  %v3049_v51 = vpack.c.bf16 %v1574_v11, %v1572_v12  ;;  %v1576_v53 = vadd.f32 %v1575_v25, %v4269_v60 }
 0x1e9   :  { %v1768_v19 = vpop.f32.mrf.mxu1  ;;  %v1577_v43 = vpop.f32.mrf.mxu0 }
 0x1ea   :  { %v3050_v7 = vpack.c.bf16 %v1767_v3, %v1765_v49  ;;  %2695 = vst [vmem:[#allocation9 + $0x140] sm:$0xff] %v3049_v51  ;;  %v1578_v23 = vadd.f32 %v1577_v43, %v4272_v52  ;;  %v1769_v54 = vadd.f32 %v1768_v19, %v4277_v22 }
 0x1eb   :  { %v1770_v31 = vpop.f32.mrf.mxu1  ;;  %v1581_v40 = vpop.f32.mrf.mxu0 }
 0x1ec   :  { %2696 = vst [vmem:[#allocation9 + $0x148] sm:$0xff] %v3050_v7  ;;  %v1771_v55 = vadd.f32 %v1770_v31, %v4280_v28  ;;  %v3051_v29 = vpack.c.bf16 %v1578_v23, %v1576_v53  ;;  %v1582_v10 = vadd.f32 %v1581_v40, %v4269_v60 }
 0x1ed   :  { %v1774_v27 = vpop.f32.mrf.mxu1  ;;  %v1583_v59 = vpop.f32.mrf.mxu0 }
 0x1ee   :  { %v3052_v16 = vpack.c.bf16 %v1771_v55, %v1769_v54  ;;  %2697 = vst [vmem:[#allocation9 + $0x150] sm:$0xff] %v3051_v29  ;;  %v1584_v26 = vadd.f32 %v1583_v59, %v4272_v52  ;;  %v1775_v8 = vadd.f32 %v1774_v27, %v4277_v22 }
 0x1ef   :  { %v1776_v63 = vpop.f32.mrf.mxu1  ;;  %v1585_v2 = vpop.f32.mrf.mxu0 }
 0x1f0   :  { %2698 = vst [vmem:[#allocation9 + $0x158] sm:$0xff] %v3052_v16  ;;  %v1777_v1 = vadd.f32 %v1776_v63, %v4280_v28  ;;  %v3053_v4 = vpack.c.bf16 %v1584_v26, %v1582_v10  ;;  %v1586_v44 = vadd.f32 %v1585_v2, %v4269_v60 }
 0x1f1   :  { %v1778_v35 = vpop.f32.mrf.mxu1  ;;  %v1587_v42 = vpop.f32.mrf.mxu0 }
 0x1f2   :  { %v3054_v17 = vpack.c.bf16 %v1777_v1, %v1775_v8  ;;  %2699 = vst [vmem:[#allocation9 + $0x160] sm:$0xff] %v3053_v4  ;;  %v1588_v30 = vadd.f32 %v1587_v42, %v4272_v52  ;;  %v1779_v9 = vadd.f32 %v1778_v35, %v4277_v22 }
 0x1f3   :  { %v1780_v14 = vpop.f32.mrf.mxu1  ;;  %v1591_v45 = vpop.f32.mrf.mxu0 }
 0x1f4   :  { %2700 = vst [vmem:[#allocation9 + $0x168] sm:$0xff] %v3054_v17  ;;  %v1781_v37 = vadd.f32 %v1780_v14, %v4280_v28  ;;  %v3055_v62 = vpack.c.bf16 %v1588_v30, %v1586_v44  ;;  %v1592_v5 = vadd.f32 %v1591_v45, %v4269_v60 }
 0x1f5   :  { %v1784_v18 = vpop.f32.mrf.mxu1  ;;  %v1593_v56 = vpop.f32.mrf.mxu0 }
 0x1f6   :  { %v3056_v41 = vpack.c.bf16 %v1781_v37, %v1779_v9  ;;  %2701 = vst [vmem:[#allocation9 + $0x170] sm:$0xff] %v3055_v62  ;;  %v1594_v6 = vadd.f32 %v1593_v56, %v4272_v52  ;;  %v1785_v47 = vadd.f32 %v1784_v18, %v4277_v22 }
 0x1f7   :  { %v1786_v24 = vpop.f32.mrf.mxu1  ;;  %v1595_v38 = vpop.f32.mrf.mxu0 }
 0x1f8   :  { %2702 = vst [vmem:[#allocation9 + $0x178] sm:$0xff] %v3056_v41  ;;  %v1787_v20 = vadd.f32 %v1786_v24, %v4280_v28  ;;  %v3057_v50 = vpack.c.bf16 %v1594_v6, %v1592_v5  ;;  %v1596_v58 = vadd.f32 %v1595_v38, %v4269_v60 }
 0x1f9   :  { %v1788_v33 = vpop.f32.mrf.mxu1  ;;  %v1597_v48 = vpop.f32.mrf.mxu0 }
 0x1fa   :  { %v3058_v39 = vpack.c.bf16 %v1787_v20, %v1785_v47  ;;  %2703 = vst [vmem:[#allocation9 + $0x180] sm:$0xff] %v3057_v50  ;;  %v1598_v15 = vadd.f32 %v1597_v48, %v4272_v52  ;;  %v1789_v0 = vadd.f32 %v1788_v33, %v4277_v22 }
 0x1fb   :  { %v1790_v57 = vpop.f32.mrf.mxu1  ;;  %v1601_v21 = vpop.f32.mrf.mxu0 }
 0x1fc   :  { %2704 = vst [vmem:[#allocation9 + $0x188] sm:$0xff] %v3058_v39  ;;  %v1791_v34 = vadd.f32 %v1790_v57, %v4280_v28  ;;  %v3059_v36 = vpack.c.bf16 %v1598_v15, %v1596_v58  ;;  %v1602_v12 = vadd.f32 %v1601_v21, %v4269_v60 }
 0x1fd   :  { %v1794_v61 = vpop.f32.mrf.mxu1  ;;  %v1603_v32 = vpop.f32.mrf.mxu0 }
 0x1fe   :  { %v3060_v46 = vpack.c.bf16 %v1791_v34, %v1789_v0  ;;  %2705 = vst [vmem:[#allocation9 + $0x190] sm:$0xff] %v3059_v36  ;;  %v1604_v11 = vadd.f32 %v1603_v32, %v4272_v52  ;;  %v1795_v49 = vadd.f32 %v1794_v61, %v4277_v22 }
 0x1ff   :  { %v1796_v13 = vpop.f32.mrf.mxu1  ;;  %v1605_v25 = vpop.f32.mrf.mxu0 }
 0x200   :  { %2706 = vst [vmem:[#allocation9 + $0x198] sm:$0xff] %v3060_v46  ;;  %v1797_v3 = vadd.f32 %v1796_v13, %v4280_v28  ;;  %v3061_v51 = vpack.c.bf16 %v1604_v11, %v1602_v12  ;;  %v1606_v53 = vadd.f32 %v1605_v25, %v4269_v60 }
 0x201   :  { %v1798_v19 = vpop.f32.mrf.mxu1  ;;  %v1607_v43 = vpop.f32.mrf.mxu0 }
 0x202   :  { %v3062_v7 = vpack.c.bf16 %v1797_v3, %v1795_v49  ;;  %2707 = vst [vmem:[#allocation9 + $0x1a0] sm:$0xff] %v3061_v51  ;;  %v1608_v23 = vadd.f32 %v1607_v43, %v4272_v52  ;;  %v1799_v54 = vadd.f32 %v1798_v19, %v4277_v22 }
 0x203   :  { %v1800_v31 = vpop.f32.mrf.mxu1  ;;  %v1611_v40 = vpop.f32.mrf.mxu0 }
 0x204   :  { %2708 = vst [vmem:[#allocation9 + $0x1a8] sm:$0xff] %v3062_v7  ;;  %v1801_v55 = vadd.f32 %v1800_v31, %v4280_v28  ;;  %v3063_v29 = vpack.c.bf16 %v1608_v23, %v1606_v53  ;;  %v1612_v10 = vadd.f32 %v1611_v40, %v4269_v60 }
 0x205   :  { %v1804_v27 = vpop.f32.mrf.mxu1  ;;  %v1613_v59 = vpop.f32.mrf.mxu0 }
 0x206   :  { %v3064_v16 = vpack.c.bf16 %v1801_v55, %v1799_v54  ;;  %2709 = vst [vmem:[#allocation9 + $0x1b0] sm:$0xff] %v3063_v29  ;;  %v1614_v26 = vadd.f32 %v1613_v59, %v4272_v52  ;;  %v1805_v8 = vadd.f32 %v1804_v27, %v4277_v22 }
 0x207   :  { %v1806_v63 = vpop.f32.mrf.mxu1  ;;  %v1615_v2 = vpop.f32.mrf.mxu0 }
 0x208   :  { %2710 = vst [vmem:[#allocation9 + $0x1b8] sm:$0xff] %v3064_v16  ;;  %v1807_v1 = vadd.f32 %v1806_v63, %v4280_v28  ;;  %v3065_v4 = vpack.c.bf16 %v1614_v26, %v1612_v10  ;;  %v1616_v44 = vadd.f32 %v1615_v2, %v4269_v60 }
 0x209   :  { %v1808_v35 = vpop.f32.mrf.mxu1  ;;  %v1617_v42 = vpop.f32.mrf.mxu0 }
 0x20a   :  { %v3066_v17 = vpack.c.bf16 %v1807_v1, %v1805_v8  ;;  %2711 = vst [vmem:[#allocation9 + $0x1c0] sm:$0xff] %v3065_v4  ;;  %v1618_v30 = vadd.f32 %v1617_v42, %v4272_v52  ;;  %v1809_v9 = vadd.f32 %v1808_v35, %v4277_v22 }
 0x20b   :  { %v1810_v14 = vpop.f32.mrf.mxu1  ;;  %v1621_v45 = vpop.f32.mrf.mxu0 }
 0x20c   :  { %2712 = vst [vmem:[#allocation9 + $0x1c8] sm:$0xff] %v3066_v17  ;;  %v1811_v37 = vadd.f32 %v1810_v14, %v4280_v28  ;;  %v3067_v62 = vpack.c.bf16 %v1618_v30, %v1616_v44  ;;  %v1622_v5 = vadd.f32 %v1621_v45, %v4269_v60 }
 0x20d   :  { %v1814_v18 = vpop.f32.mrf.mxu1  ;;  %v1623_v56 = vpop.f32.mrf.mxu0 }
 0x20e   :  { %v3068_v41 = vpack.c.bf16 %v1811_v37, %v1809_v9  ;;  %2713 = vst [vmem:[#allocation9 + $0x1d0] sm:$0xff] %v3067_v62  ;;  %v1624_v6 = vadd.f32 %v1623_v56, %v4272_v52  ;;  %v1815_v47 = vadd.f32 %v1814_v18, %v4277_v22 }
 0x20f   :  { %v1816_v24 = vpop.f32.mrf.mxu1  ;;  %v1625_v38 = vpop.f32.mrf.mxu0 }
 0x210   :  { %2714 = vst [vmem:[#allocation9 + $0x1d8] sm:$0xff] %v3068_v41  ;;  %v1817_v20 = vadd.f32 %v1816_v24, %v4280_v28  ;;  %v3069_v50 = vpack.c.bf16 %v1624_v6, %v1622_v5  ;;  %v1626_v58 = vadd.f32 %v1625_v38, %v4269_v60 }
 0x211   :  { %v1818_v33 = vpop.f32.mrf.mxu1  ;;  %v1627_v48 = vpop.f32.mrf.mxu0 }
 0x212   :  { %v3070_v39 = vpack.c.bf16 %v1817_v20, %v1815_v47  ;;  %2715 = vst [vmem:[#allocation9 + $0x1e0] sm:$0xff] %v3069_v50  ;;  %v1628_v15 = vadd.f32 %v1627_v48, %v4272_v52  ;;  %v1819_v0 = vadd.f32 %v1818_v33, %v4277_v22 }
 0x213   :  { %v1820_v57 = vpop.f32.mrf.mxu1 }
 0x214   :  { %2716 = vst [vmem:[#allocation9 + $0x1e8] sm:$0xff] %v3070_v39  ;;  %v1821_v34 = vadd.f32 %v1820_v57, %v4280_v28  ;;  %v3071_v21 = vpack.c.bf16 %v1628_v15, %v1626_v58 }
 0x216   :  { %v3072_v36 = vpack.c.bf16 %v1821_v34, %v1819_v0  ;;  %2717 = vst [vmem:[#allocation9 + $0x1f0] sm:$0xff] %v3071_v21 }
 0x218   :  { %2718 = vst [vmem:[#allocation9 + $0x1f8] sm:$0xff] %v3072_v36 }
 0x219   :  { %3176 = shalt.err (!%p3173_p10)
}
 0x21a   :  { %2742 = dma.vmem_to_hbm [thread:$0]  %s2737_s12, 8192, %s4426_s4, [#allocation10], %s3202_s8, %s3202_s8, %s3203_s9  }
 0x21b   :  { %3189 = dma.done.wait [#allocation4], 8192  }
 0x21c   :  { %3190 = vsyncadd [#allocation4], 4294959104 }
 0x21d   :  { %3191 = dma.done.wait [#allocation10], 8192  }
 0x21e   :  { %3192 = vsyncadd [#allocation10], 4294959104 }
 0x21f   :  { %2749 = vsyncpa [#allocation3], 1 }
 0x220   :  { %2750 = vsyncpa [#allocation6], 1 }
 0x221   :  { %2751 = vsyncpa [#allocation4], 1 }
 0x222   :  { %2752 = vsyncpa [#allocation10], 1 }

</bundles_post_ra>
